<compile_context>
chip_gen: v7x
topology: tpu7x:2x2x1
jax: 0.10.0
libtpu: 0.0.40
codegen_flags: <defaults>
</compile_context>

<pallas_src>
import math
import functools

import jax
import jax.numpy as jnp
from jax import lax
from jax.experimental import pallas as pl
from jax.experimental.pallas import tpu as pltpu


def _self_attn_kernel(f1_ref, f2_ref, p1_ref, p2_ref, q2_ref, g_ref,
                      attn_ref, h2_ref, *, alpha):
    hp = lax.Precision.HIGHEST
    f1 = f1_ref[...]                       # (TM, N*wd1)  lane-dense
    f2 = f2_ref[...]                       # (TM, N*wd1)

    # e_flat[m, i*N + j] = f1[m,i,:]@(W@a1) + f2[m,j,:]@(W@a2)
    e = (jnp.dot(f1, p1_ref[...], precision=hp, preferred_element_type=jnp.float32)
         + jnp.dot(f2, p2_ref[...], precision=hp, preferred_element_type=jnp.float32))
    e = jnp.where(e > 0, e, alpha * e)     # LeakyReLU(alpha)

    # Softmax over each group of N consecutive lanes (fixed i, varying j).
    # Subtracting the row-global max is equivalent (per-group shift invariance)
    # and avoids any segmented/reshaped reduction.
    e_max = jnp.max(e, axis=-1, keepdims=True)
    p = jnp.exp(e - e_max)

    # Per-group sums broadcast back to every lane of the group via one matmul
    # with the block-diagonal all-ones matrix G.
    denom = jnp.dot(p, g_ref[...], precision=hp, preferred_element_type=jnp.float32)

    # EUP approximate reciprocal + one Newton step (error ~ eps^2, effectively exact).
    r = pl.reciprocal(denom, approx=True)
    r = r * (2.0 - denom * r)
    attn_ref[...] = (p * r).astype(attn_ref.dtype)

    # h2_flat[m, i*wd2 + c] = f2[m, i, :] @ W[:, c]   via Q2 = kron(I_N, W)
    h2 = jnp.dot(f2, q2_ref[...], precision=hp, preferred_element_type=jnp.float32)
    h2_ref[...] = h2.astype(h2_ref.dtype)

    # TODO(synk): F.dropout(training=True) is not applied; eval-mode / p=0 semantics.


def _pick_tm(M, cap=256):
    """Largest multiple-of-8 divisor of M that is <= cap and gives grid >= 2."""
    best = M
    for t in range(8, min(cap, M) + 1, 8):
        if M % t == 0 and (M // t) >= 2:
            best = t
    return best


def self_attention_layer(feat1, feat2, W, a, alpha, *, tm=None):
    """Pallas version of SelfAttentionLayer.forward (eval mode)."""
    B, D1, D2, N, wd1 = feat1.shape
    wd2 = W.shape[1]
    ad = a.shape[0]
    assert ad == 2 * wd2, "ad must equal 2*wd2 for the concat to reshape cleanly"

    M = B * D1 * D2
    dtype = feat1.dtype

    # Lane-dense, contiguous views of the inputs (free reshapes in HBM).
    f1 = feat1.reshape(M, N * wd1)
    f2 = feat2.reshape(M, N * wd1)

    # ---- Fold `a` into W: wa1 = W @ a[:wd2], wa2 = W @ a[wd2:] (review item 1/4).
    a1 = a[:wd2, 0]
    a2 = a[wd2:, 0]
    wa1 = (W @ a1).astype(dtype)           # (wd1,)
    wa2 = (W @ a2).astype(dtype)           # (wd1,)

    eyeN = jnp.eye(N, dtype=dtype)
    # P1[(i,d),(i2,j)] = wa1[d] * (i == i2)      -> e contribution of f1[m,i,:]
    P1 = jnp.broadcast_to(
        eyeN[:, None, :, None] * wa1[None, :, None, None],
        (N, wd1, N, N)).reshape(N * wd1, N * N)
    # P2[(j,d),(i,j2)] = wa2[d] * (j == j2)      -> e contribution of f2[m,j,:]
    P2 = jnp.broadcast_to(
        eyeN[:, None, None, :] * wa2[None, :, None, None],
        (N, wd1, N, N)).reshape(N * wd1, N * N)
    # Q2 = kron(I_N, W): flattened projection f2[m,i,:] @ W in one dense matmul.
    Q2 = jnp.kron(eyeN, W.astype(dtype))                       # (N*wd1, N*wd2)
    # G = kron(I_N, ones(N,N)): per-group softmax sums broadcast to every lane.
    G = jnp.kron(eyeN, jnp.ones((N, N), dtype))                # (N*N, N*N)

    if tm is None:
        tm = _pick_tm(M)
    assert M % tm == 0
    grid = (M // tm,)

    kernel = functools.partial(_self_attn_kernel, alpha=alpha)

    attn_flat, h2_flat = pl.pallas_call(
        kernel,
        out_shape=(
            jax.ShapeDtypeStruct((M, N * N), dtype),     # lane-dense attention
            jax.ShapeDtypeStruct((M, N * wd2), dtype),   # lane-dense h2
        ),
        grid_spec=pltpu.PrefetchScalarGridSpec(
            num_scalar_prefetch=0,
            grid=grid,
            in_specs=[
                pl.BlockSpec((tm, N * wd1), lambda m: (m, 0)),
                pl.BlockSpec((tm, N * wd1), lambda m: (m, 0)),
                # Small constant operators: same block every step -> fetched once.
                pl.BlockSpec((N * wd1, N * N), lambda m: (0, 0)),
                pl.BlockSpec((N * wd1, N * N), lambda m: (0, 0)),
                pl.BlockSpec((N * wd1, N * wd2), lambda m: (0, 0)),
                pl.BlockSpec((N * N, N * N), lambda m: (0, 0)),
            ],
            out_specs=[
                pl.BlockSpec((tm, N * N), lambda m: (m, 0)),
                pl.BlockSpec((tm, N * wd2), lambda m: (m, 0)),
            ],
        ),
        compiler_params=pltpu.CompilerParams(
            dimension_semantics=("parallel",)),   # shards M-tiles across v7x cores
    )(f1, f2, P1, P2, Q2, G)

    attn = attn_flat.reshape(B, D1, D2, N, N)
    h2 = h2_flat.reshape(B, D1, D2, N, wd2)
    return attn, h2


def reference_forward(feat1, feat2, W, a, alpha):
    """Pure-JAX mirror of the PyTorch forward (eval mode)."""
    h1 = feat1 @ W
    h2 = feat2 @ W
    B, D1, D2, N, wd2 = h1.shape
    ad = a.shape[0]
    f1r = jnp.tile(h1, (1, 1, 1, 1, N)).reshape(B, D1, D2, N * N, wd2)
    f2r = jnp.tile(h2, (1, 1, 1, N, 1))
    feat_ = jnp.concatenate([f1r, f2r], axis=4).reshape(B, D1, D2, N, N, ad)
    e = jnp.squeeze(jnp.matmul(feat_, a), axis=5)
    e = jnp.where(e > 0, e, alpha * e)
    attn = jax.nn.softmax(e, axis=4)
    return attn, h2


if __name__ == "__main__":
    # Match f32 matmul accuracy between the kernel and the XLA reference.
    jax.config.update("jax_default_matmul_precision", "highest")

    # Small shapes consistent with the module's 5-D inputs.
    B, D1, D2, N = 2, 4, 16, 8          # M = B*D1*D2 = 128 batched rows
    wd1, wd2 = 32, 16
    ad = 2 * wd2
    alpha = 0.2
    dropout = 0.0  # eval / p=0 -> identity

    key = jax.random.PRNGKey(0)
    k1, k2, kw, ka = jax.random.split(key, 4)
    feat1 = jax.random.normal(k1, (B, D1, D2, N, wd1), jnp.float32)
    feat2 = jax.random.normal(k2, (B, D1, D2, N, wd1), jnp.float32)

    # Deterministic xavier_uniform-style init (gain=1.414), matching param shapes.
    gain = 1.414
    w_lim = gain * math.sqrt(6.0 / (wd1 + wd2))
    a_lim = gain * math.sqrt(6.0 / (ad + 1))
    W = jax.random.uniform(kw, (wd1, wd2), jnp.float32, -w_lim, w_lim)
    a = jax.random.uniform(ka, (ad, 1), jnp.float32, -a_lim, a_lim)

    attn, h2 = jax.block_until_ready(self_attention_layer(feat1, feat2, W, a, alpha))

    attn_ref, h2_ref = reference_forward(feat1, feat2, W, a, alpha)
    assert attn.shape == (B, D1, D2, N, N)
    assert h2.shape == (B, D1, D2, N, wd2)
    assert jnp.allclose(h2, h2_ref, atol=1e-4, rtol=1e-4), \
        float(jnp.max(jnp.abs(h2 - h2_ref)))
    # Slightly looser tolerance on attention: algebraic refactor (a folded into W)
    # and Newton-refined EUP reciprocal reorder f32 arithmetic.
    assert jnp.allclose(attn, attn_ref, atol=1e-4, rtol=1e-3), \
        float(jnp.max(jnp.abs(attn - attn_ref)))
    print("KERNEL_OK")
</pallas_src>

<mosaic_0001>
module attributes {stable_mosaic.version = 11 : i64} {
  func.func @_self_attn_kernel(%arg0: i32, %arg1: memref<64x256xf32, #tpu.memory_space<vmem>>, %arg2: memref<64x256xf32, #tpu.memory_space<vmem>>, %arg3: memref<256x64xf32, #tpu.memory_space<vmem>>, %arg4: memref<256x64xf32, #tpu.memory_space<vmem>>, %arg5: memref<256x128xf32, #tpu.memory_space<vmem>>, %arg6: memref<64x64xf32, #tpu.memory_space<vmem>>, %arg7: memref<64x64xf32, #tpu.memory_space<vmem>>, %arg8: memref<64x128xf32, #tpu.memory_space<vmem>>) attributes {dimension_semantics = [#tpu.dimension_semantics<parallel>], iteration_bounds = array<i64: 2>, scalar_prefetch = 0 : i64, scratch_operands = 0 : i64, tpu.core_type = #tpu.core_type<tc>, window_params = [{transform_indices = @transform_0, window_bounds = array<i64: 64, 256>}, {transform_indices = @transform_1, window_bounds = array<i64: 64, 256>}, {pipeline_mode = #tpu.pipeline_mode<synchronous>, transform_indices = @transform_2, window_bounds = array<i64: 256, 64>}, {pipeline_mode = #tpu.pipeline_mode<synchronous>, transform_indices = @transform_3, window_bounds = array<i64: 256, 64>}, {pipeline_mode = #tpu.pipeline_mode<synchronous>, transform_indices = @transform_4, window_bounds = array<i64: 256, 128>}, {pipeline_mode = #tpu.pipeline_mode<synchronous>, transform_indices = @transform_5, window_bounds = array<i64: 64, 64>}, {transform_indices = @transform_6, window_bounds = array<i64: 64, 64>}, {transform_indices = @transform_7, window_bounds = array<i64: 64, 128>}]} {
    %c0 = arith.constant 0 : index
    %c0_0 = arith.constant 0 : index
    %0 = vector.load %arg1[%c0, %c0_0] : memref<64x256xf32, #tpu.memory_space<vmem>>, vector<64x256xf32>
    %c0_1 = arith.constant 0 : index
    %c0_2 = arith.constant 0 : index
    %1 = vector.load %arg2[%c0_1, %c0_2] : memref<64x256xf32, #tpu.memory_space<vmem>>, vector<64x256xf32>
    %c0_3 = arith.constant 0 : index
    %c0_4 = arith.constant 0 : index
    %2 = vector.load %arg3[%c0_3, %c0_4] : memref<256x64xf32, #tpu.memory_space<vmem>>, vector<256x64xf32>
    %cst = arith.constant dense<0.000000e+00> : vector<64x64xf32>
    %3 = tpu.matmul %0, %2, %cst {dimension_numbers = #tpu.dot_dimension_numbers<[1], [0], [0], [1], [0, 0, 1, 1], [], []>, precision = #tpu.contract_precision<fp32>} : vector<64x256xf32>, vector<256x64xf32>, vector<64x64xf32> -> vector<64x64xf32>
    %c0_5 = arith.constant 0 : index
    %c0_6 = arith.constant 0 : index
    %4 = vector.load %arg4[%c0_5, %c0_6] : memref<256x64xf32, #tpu.memory_space<vmem>>, vector<256x64xf32>
    %cst_7 = arith.constant dense<0.000000e+00> : vector<64x64xf32>
    %5 = tpu.matmul %1, %4, %cst_7 {dimension_numbers = #tpu.dot_dimension_numbers<[1], [0], [0], [1], [0, 0, 1, 1], [], []>, precision = #tpu.contract_precision<fp32>} : vector<64x256xf32>, vector<256x64xf32>, vector<64x64xf32> -> vector<64x64xf32>
    %6 = arith.addf %3, %5 : vector<64x64xf32>
    %cst_8 = arith.constant 0.000000e+00 : f32
    %7 = vector.broadcast %cst_8 : f32 to vector<64x64xf32>
    %8 = arith.cmpf ogt, %6, %7 : vector<64x64xf32>
    %cst_9 = arith.constant 2.000000e-01 : f32
    %9 = vector.broadcast %cst_9 : f32 to vector<64x64xf32>
    %10 = arith.mulf %9, %6 : vector<64x64xf32>
    %11 = arith.select %8, %6, %10 : vector<64x64xi1>, vector<64x64xf32>
    %cst_10 = arith.constant dense<0xFF800000> : vector<64xf32>
    %12 = vector.multi_reduction <maximumf>, %11, %cst_10 [1] : vector<64x64xf32> to vector<64xf32>
    %13 = vector.shape_cast %12 : vector<64xf32> to vector<64x1xf32>
    %14 = vector.broadcast %13 : vector<64x1xf32> to vector<64x64xf32>
    %15 = arith.subf %11, %14 : vector<64x64xf32>
    %16 = math.exp %15 : vector<64x64xf32>
    %c0_11 = arith.constant 0 : index
    %c0_12 = arith.constant 0 : index
    %17 = vector.load %arg6[%c0_11, %c0_12] : memref<64x64xf32, #tpu.memory_space<vmem>>, vector<64x64xf32>
    %cst_13 = arith.constant dense<0.000000e+00> : vector<64x64xf32>
    %18 = tpu.matmul %16, %17, %cst_13 {dimension_numbers = #tpu.dot_dimension_numbers<[1], [0], [0], [1], [0, 0, 1, 1], [], []>, precision = #tpu.contract_precision<fp32>} : vector<64x64xf32>, vector<64x64xf32>, vector<64x64xf32> -> vector<64x64xf32>
    %19 = tpu.reciprocal %18 {approx = true} : vector<64x64xf32> -> vector<64x64xf32>
    %20 = arith.mulf %18, %19 : vector<64x64xf32>
    %cst_14 = arith.constant 2.000000e+00 : f32
    %21 = vector.broadcast %cst_14 : f32 to vector<64x64xf32>
    %22 = arith.subf %21, %20 : vector<64x64xf32>
    %23 = arith.mulf %19, %22 : vector<64x64xf32>
    %24 = arith.mulf %16, %23 : vector<64x64xf32>
    %c0_15 = arith.constant 0 : index
    %c0_16 = arith.constant 0 : index
    %25 = vector.load %arg7[%c0_15, %c0_16] : memref<64x64xf32, #tpu.memory_space<vmem>>, vector<64x64xf32>
    tpu.vector_store %arg7[%c0_15, %c0_16], %24 {strides = array<i32>} : memref<64x64xf32, #tpu.memory_space<vmem>>, vector<64x64xf32>,
    %c0_17 = arith.constant 0 : index
    %c0_18 = arith.constant 0 : index
    %26 = vector.load %arg5[%c0_17, %c0_18] : memref<256x128xf32, #tpu.memory_space<vmem>>, vector<256x128xf32>
    %cst_19 = arith.constant dense<0.000000e+00> : vector<64x128xf32>
    %27 = tpu.matmul %1, %26, %cst_19 {dimension_numbers = #tpu.dot_dimension_numbers<[1], [0], [0], [1], [0, 0, 1, 1], [], []>, precision = #tpu.contract_precision<fp32>} : vector<64x256xf32>, vector<256x128xf32>, vector<64x128xf32> -> vector<64x128xf32>
    %c0_20 = arith.constant 0 : index
    %c0_21 = arith.constant 0 : index
    %28 = vector.load %arg8[%c0_20, %c0_21] : memref<64x128xf32, #tpu.memory_space<vmem>>, vector<64x128xf32>
    tpu.vector_store %arg8[%c0_20, %c0_21], %27 {strides = array<i32>} : memref<64x128xf32, #tpu.memory_space<vmem>>, vector<64x128xf32>,
    return
  }
  func.func @transform_0(%arg0: i32) -> (i32, i32) {
    %c0_i32 = arith.constant 0 : i32
    %c0_i32_0 = arith.constant 0 : i32
    return %arg0, %c0_i32 : i32, i32
  }
  func.func @transform_1(%arg0: i32) -> (i32, i32) {
    %c0_i32 = arith.constant 0 : i32
    %c0_i32_0 = arith.constant 0 : i32
    return %arg0, %c0_i32 : i32, i32
  }
  func.func @transform_2(%arg0: i32) -> (i32, i32) {
    %c0_i32 = arith.constant 0 : i32
    %c0_i32_0 = arith.constant 0 : i32
    %c0_i32_1 = arith.constant 0 : i32
    return %c0_i32, %c0_i32_0 : i32, i32
  }
  func.func @transform_3(%arg0: i32) -> (i32, i32) {
    %c0_i32 = arith.constant 0 : i32
    %c0_i32_0 = arith.constant 0 : i32
    %c0_i32_1 = arith.constant 0 : i32
    return %c0_i32, %c0_i32_0 : i32, i32
  }
  func.func @transform_4(%arg0: i32) -> (i32, i32) {
    %c0_i32 = arith.constant 0 : i32
    %c0_i32_0 = arith.constant 0 : i32
    %c0_i32_1 = arith.constant 0 : i32
    return %c0_i32, %c0_i32_0 : i32, i32
  }
  func.func @transform_5(%arg0: i32) -> (i32, i32) {
    %c0_i32 = arith.constant 0 : i32
    %c0_i32_0 = arith.constant 0 : i32
    %c0_i32_1 = arith.constant 0 : i32
    return %c0_i32, %c0_i32_0 : i32, i32
  }
  func.func @transform_6(%arg0: i32) -> (i32, i32) {
    %c0_i32 = arith.constant 0 : i32
    %c0_i32_0 = arith.constant 0 : i32
    return %arg0, %c0_i32 : i32, i32
  }
  func.func @transform_7(%arg0: i32) -> (i32, i32) {
    %c0_i32 = arith.constant 0 : i32
    %c0_i32_0 = arith.constant 0 : i32
    return %arg0, %c0_i32 : i32, i32
  }
}

</mosaic_0001>

<bundles_post_ra>
// kernel: tpu_custom_call.1
= control target key start
LH: loop header
LB: loop body
LE: loop exit
PB: predicated region body
PF: predicated region fallthrough
CT: control target
= control target key end

     0   :  { %13 = vsyncpa [#allocation3], 0  ;;  %s10578_s0 = inlined_call_operand.vmem [shape: f32[128,256], index: 0, kind: input, shape index: {}]   ;;  %s10579_s1 = inlined_call_operand.vmem [shape: f32[128,256], index: 1, kind: input, shape index: {}]   ;;  %s10580_s2 = inlined_call_operand.vmem [shape: f32[256,64], index: 2, kind: input, shape index: {}]   ;;  %s10581_s3 = inlined_call_operand.vmem [shape: f32[256,64], index: 3, kind: input, shape index: {}]   ;;  %s10582_s4 = inlined_call_operand.vmem [shape: f32[256,128], index: 4, kind: input, shape index: {}]   ;;  %s10583_s5 = inlined_call_operand.hbm [shape: f32[64,64], index: 5, kind: input, shape index: {}]   ;;  %s10584_s6 = inlined_call_operand.vmem [shape: f32[128,64], index: 6, kind: output, shape index: {0}]   ;;  %s10585_s7 = inlined_call_operand.hbm [shape: f32[128,128], index: 7, kind: output, shape index: {1}]  }
   0x1   :  { %14 = vsyncpa [#allocation4], 0 }
   0x2   :  { %16 = vsyncpa [#allocation4 + $0x1], 0  ;;  %s7611_s24 = smov 0   ;;  %s7613_s25 = smov 0  }
   0x3   :  { %s7615_s26 = smov 0   ;;  %s7617_s27 = smov 0  }
   0x4 LB: > { %s7632_s28 = sadd.s32 4294967295, %s7563_s27   ;;  %s5360_s29 = sadd.s32 4294967294, %s7563_s27   ;;  %s7563_s27 = sphi %s7617_s27, %s11644_s27   ;;  %s7559_s26 = sphi %s7615_s26, %s11643_s26   ;;  %s7555_s25 = sphi %s7613_s25, %s11642_s25   ;;  %s7551_s24 = sphi %s7611_s24, %s11641_s24  }
   0x5   : > { %s7636_s30 = sadd.s32 1, %s7563_s27   ;;  %s191_s8 = sadd.s32 1, %s7559_s26 }
   0x6   : > { %s188_s9 = ssub.s32 %s7563_s27, %s7636_s30  ;;  %p201_p0 = scmp.ne.s32.totalorder %s7559_s26, %s7555_s25 }
   0x7   : > { %p189_p1 = scmp.eq.s32.totalorder %s188_s9, 0  ;;  %p202_p2 = scmp.eq.s32.totalorder %s7632_s28, 1 }
   0x8   : > { %p207_p3 = scmp.ne.s32.totalorder %s7555_s25, %s7551_s24  ;;  %p208_p4 = scmp.eq.s32.totalorder %s5360_s29, 1 }
   0x9   : > { %s7647_s10 = scalar_select %p189_p1, %s7559_s26, %s191_s8  }
   0xa   : > { %p7649_p5 = por %p202_p2, %p201_p0  ;;  %p7653_p6 = por %p208_p4, %p207_p3 }
   0xb   : > { %p5361_p7 = scmp.ge.s32.totalorder %s7563_s27, 1  ;;  %p215_p8 = scmp.lt.s32.totalorder %s7563_s27, 3 }
   0xc   : > { %s11011_s11 = scalar_select %p7649_p5, 1, 0 }
   0xd   : > { %s11012_s12 = scalar_select %p7653_p6, 1, 0 }
   0xe   : > { %p10586_p9 = scmp.eq.s32.totalorder %s7632_s28, 0  ;;  %p7660_p10 = pnand %p5361_p7, %p215_p8 }
   0xf   : > { %s7565_s14 = smov [#allocation2]   ;;  %s7469_s19 = scalar_lea.hbm %s10583_s5, 1024 }
  0x10   : > { %s11013_s13 = scalar_select %p7660_p10, 1, 0 }
  0x11   : > { %s236_s15 = sshll.u32 %s7565_s14, 4  ;;  %p7389_p11 = pneg %p7660_p10  ;;  %s237_s15 = int_to_ptr.vmem [resolvable:$true] %s236_s15 }
  0x12   : > { %p7470_p13 = scmp.ne.s32.totalorder %s10583_s5, %s7469_s19  ;;  %p7476_p3 = scmp.lt.u32.totalorder %s7469_s19, %s10583_s5 }
  0x13   : > { %p7668_p12 = pnand %p10586_p9, %p7389_p11 }
  0x15   : > { %p7471_p0 = pneg %p7668_p12 }
  0x17   : > { %p7472_p1 = pnand %p7471_p0, %p7470_p13 }
  0x19   : > { %p7473_p2 = pneg %p7472_p1 }
  0x1b   : > { %p7478_p4 = pnand %p7476_p3, %p7473_p2 }
  0x1d   : > { %7481 = shalt.err (!%p7478_p4)
}
  0x1e   : > { %s7482_s29 = scalar_lea.vmem %s237_s15, 1024  ;;  %p7490_p9 = scmp.lt.s32.totalorder %s237_s15, %s237_s15 }
  0x1f   : > { %p7483_p7 = scmp.ne.s32.totalorder %s237_s15, %s7482_s29  ;;  %p7491_p6 = scmp.lt.s32.totalorder %s7482_s29, %s7482_s29 }
  0x21   : > { %p7485_p8 = pnand %p7483_p7, %p7471_p0  ;;  %p7492_p5 = por %p7491_p6, %p7490_p9 }
  0x23   : > { %p7486_p11 = pneg %p7485_p8 }
  0x25   : > { %p7493_p10 = pnand %p7492_p5, %p7486_p11 }
  0x27   : > { %7496 = shalt.err (!%p7493_p10)
}
  0x28   : > { %s7566_s8 = smov 128   ;;  %s7567_s9 = smov 8  }
  0x29   : > { %7392 = dma.hbm_to_vmem [thread:$0]  (!%p7668_p12), %s10583_s5, 1024, %s237_s15, [#allocation3], %s7566_s8, %s7566_s8, %s7567_s9  }
  0x2a   : > { %p11015_p13 = scmp.ne.s32.totalorder %s11013_s13, 0 }
  0x2c   : > { %272 = sbr.rel (%p11015_p13) target bundleno = 1067 (0x42b), region = 44 }
  0x33   : > { %p11016_p1 = scmp.eq.s32.totalorder %s7632_s28, 0 }
  0x35   : > { %7542 = dma.done.wait (%p11016_p1), [#allocation3], 1024   ;;  %p11017_p0 = pmov %p11016_p1 }
  0x36   : > { %v417_v0 = vld [vmem:[%s10581_s3 + $0x80] sm:$0xff]  ;;  %v418_v1 = vld [vmem:[%s10581_s3 + $0x88] sm:$0xff]  ;;  %v419_v7 = vld [vmem:[%s10581_s3 + $0x90] sm:$0xff]  ;;  %s5367_s16 = sshll.u32 %s7632_s28, 3  ;;  %vm2965_vm0 = vcmask 523264   ;;  %s5382_s19 = sshll.u32 %s7632_s28, 10 }
  0x37   : > { %7544 = vsyncadd (%p11017_p0), [#allocation3], 4294966272  ;;  %v401_v2 = vld [vmem:[%s10581_s3] sm:$0xff]  ;;  %v482_v3 = vand.u32 4294901760, %v417_v0  ;;  %v485_v4 = vand.u32 4294901760, %v418_v1  ;;  %v402_v5 = vld [vmem:[%s10581_s3 + $0x8] sm:$0xff] }
  0x38   : > { %v434_v6 = vand.u32 4294901760, %v401_v2  ;;  %v420_v8 = vld [vmem:[%s10581_s3 + $0x98] sm:$0xff]  ;;  %v437_v9 = vand.u32 4294901760, %v402_v5  ;;  %v488_v10 = vand.u32 4294901760, %v419_v7  ;;  %v403_v12 = vld [vmem:[%s10581_s3 + $0x10] sm:$0xff]  ;;  %v421_v18 = vld [vmem:[%s10581_s3 + $0xa0] sm:$0xff] }
  0x39   : > { %v491_v11 = vand.u32 4294901760, %v420_v8  ;;  %v404_v13 = vld [vmem:[%s10581_s3 + $0x18] sm:$0xff]  ;;  %v7718_v14 = vpack.c.bf16 %v485_v4, %v482_v3  ;;  %v440_v16 = vand.u32 4294901760, %v403_v12  ;;  %v422_v19 = vld [vmem:[%s10581_s3 + $0xa8] sm:$0xff]  ;;  %v405_v24 = vld [vmem:[%s10581_s3 + $0x20] sm:$0xff]  ;;  %v494_v30 = vand.u32 4294901760, %v421_v18 }
  0x3a   : > { %v7720_v15 = vsub.f32 %v401_v2, %v434_v6  ;;  %v443_v17 = vand.u32 4294901760, %v404_v13  ;;  %v7728_v20 = vpack.c.bf16 %v437_v9, %v434_v6  ;;  %v7730_v21 = vsub.f32 %v402_v5, %v437_v9  ;;  %v406_v25 = vld [vmem:[%s10581_s3 + $0x28] sm:$0xff]  ;;  %v423_v38 = vld [vmem:[%s10581_s3 + $0xb0] sm:$0xff]  ;;  %v424_v43 = vld [vmem:[%s10581_s3 + $0xb8] sm:$0xff]  ;;  %p7889_p5 = scmp.lt.s32.totalorder %s5367_s16, 15  ;;  %p11639_p9 = scmp.ne.s32.totalorder %s11011_s11, 0 }
  0x3b   : > { %11018 = vst [vmem:[#allocation8_spill] sm:$0xff] %v7718_v14  ;;  %v7732_v22 = vpack.c.bf16 %v491_v11, %v488_v10  ;;  %v7734_v23 = vsub.f32 %v419_v7, %v488_v10  ;;  %6656 = vmatprep.subr.bf16.mxu0 %v7718_v14  ;;  %v7743_v26 = vsub.f32 %v420_v8, %v491_v11  ;;  %v497_v31 = vand.u32 4294901760, %v422_v19  ;;  %v407_v56 = vld [vmem:[%s10581_s3 + $0x30] sm:$0xff]  ;;  %v408_v57 = vld [vmem:[%s10581_s3 + $0x38] sm:$0xff]  ;;  %v425_v6 = vld [vmem:[%s10581_s3 + $0xc0] sm:$0xff]  ;;  %s7568_s28 = smov [#allocation5]  }
  0x3c   : > { %11019 = vst [vmem:[#allocation9_spill] sm:$0xff] %v7728_v20  ;;  %v7745_v27 = vpack.c.bf16 %v443_v17, %v440_v16  ;;  %v7747_v28 = vsub.f32 %v403_v12, %v440_v16  ;;  %v7749_v29 = vsub.f32 %v404_v13, %v443_v17  ;;  %6658 = vmatpush3.bf16.msra.mxu0 %v7728_v20  ;;  %v446_v34 = vand.u32 4294901760, %v405_v24  ;;  %v426_v7 = vld [vmem:[%s10581_s3 + $0xc8] sm:$0xff]  ;;  %v409_v12 = vld [vmem:[%s10581_s3 + $0x40] sm:$0xff]  ;;  %s11646_s16 = smov (!%p7889_p5, %s5367_s16), 15 }
  0x3d   : > { %v7752_v32 = vsub.f32 %v417_v0, %v482_v3  ;;  %v7754_v33 = vsub.f32 %v418_v1, %v485_v4  ;;  %6660 = vmatprep.subr.bf16.mxu0 %v7732_v22  ;;  %v449_v35 = vand.u32 4294901760, %v406_v25  ;;  %v10606_v36 = vand.u32 4294901760, %v7720_v15  ;;  %s5380_s15 = sshll.u32 %s11646_s16, 4  ;;  %s5374_s23 = sshll.u32 %s11646_s16, 3 }
  0x3e   : > { %11020 = vst [vmem:[#allocation10_spill] sm:$0xff] %v7745_v27  ;;  %v10605_v37 = vand.u32 4294901760, %v7730_v21  ;;  %v7762_v39 = vpack.c.bf16 %v497_v31, %v494_v30  ;;  %v7764_v40 = vsub.f32 %v421_v18, %v494_v30  ;;  %v7766_v41 = vsub.f32 %v422_v19, %v497_v31  ;;  %v410_v31 = vld [vmem:[%s10581_s3 + $0x48] sm:$0xff]  ;;  %s7986_s18 = scalar_lea.vmem %s10579_s1, %s5380_s15  ;;  %s8760_s21 = scalar_lea.vmem %s10578_s0, %s5380_s15 }
  0x3f   : > { %v10608_v42 = vand.u32 4294901760, %v7752_v32  ;;  %v10607_v44 = vand.u32 4294901760, %v7754_v33  ;;  %v7773_v45 = vpack.c.bf16 %v449_v35, %v446_v34  ;;  %v7775_v46 = vsub.f32 %v405_v24, %v446_v34  ;;  %s10473_s9 = scalar_lea.vmem %s10584_s6, %s5374_s23  ;;  %s313_s16 = sand.u32 1, %s7555_s25  }
  0x40   : > { %11021 = vst [vmem:[#allocation11_spill] sm:$0xff] %v7762_v39  ;;  %v7777_v47 = vsub.f32 %v406_v25, %v449_v35  ;;  %6662 = vmatpush3.bf16.msra.mxu0 %v7745_v27  ;;  %v654_v49 = vsub.f32 %v7720_v15, %v10606_v36  ;;  %v661_v50 = vsub.f32 %v7730_v21, %v10605_v37  ;;  %v500_v51 = vand.u32 4294901760, %v423_v38  ;;  %s5366_s14 = sshll.u32 %s313_s16, 6  ;;  %s10532_s15 = scalar_lea.hbm %s10585_s7, %s5382_s19 }
  0x41   : > { %v766_v48 = vsub.f32 %v7752_v32, %v10608_v42  ;;  %6664 = vmatprep.subr.bf16.mxu0 %v7762_v39  ;;  %v773_v52 = vsub.f32 %v7754_v33, %v10607_v44  ;;  %v503_v53 = vand.u32 4294901760, %v424_v43  ;;  %v10604_v54 = vand.u32 4294901760, %v7734_v23  ;;  %v354_v44 = vld [vmem:[%s7986_s18 + $0x8] sm:$0xff]  ;;  %v353_v42 = vld [vmem:[%s7986_s18] sm:$0xff]  ;;  %s10506_s17 = scalar_lea.vmem [#allocation5], %s5366_s14  ;;  %s10537_s22 = scalar_lea.sflag [#allocation4], %s313_s16 }
  0x42   : > { %v10601_v55 = vand.u32 4294901760, %v7743_v26  ;;  %v655_v59 = vand.u32 4294901760, %v654_v49  ;;  %v662_v60 = vand.u32 4294901760, %v661_v50  ;;  %v7801_v61 = vsub.f32 %v423_v38, %v500_v51  ;;  %s7501_s23 = sshll.u32 %s7568_s28, 4  ;;  %s7502_s23 = int_to_ptr.vmem [resolvable:$false] %s7501_s23 }
  0x43   : > { %v767_v58 = vand.u32 4294901760, %v766_v48  ;;  %v774_v62 = vand.u32 4294901760, %v773_v52  ;;  %v7803_v63 = vpack.c.bf16 %v503_v53, %v500_v51  ;;  %v7805_v0 = vsub.f32 %v424_v43, %v503_v53  ;;  %s7503_s29 = scalar_lea.vmem %s7502_s23, 2048 }
  0x44   : > { %v780_v1 = vsub.f32 %v7734_v23, %v10604_v54  ;;  %6666 = vmatpush3.bf16.msra.mxu0 %v7773_v45  ;;  %v6689_v2 = vpack.c.bf16 %v662_v60, %v655_v59  ;;  %v787_v3 = vsub.f32 %v7743_v26, %v10601_v55  ;;  %v452_v4 = vand.u32 4294901760, %v407_v56  ;;  %v428_v59 = vld [vmem:[%s10581_s3 + $0xd8] sm:$0xff] }
  0x45   : > { %v455_v5 = vand.u32 4294901760, %v408_v57  ;;  %v6687_v8 = vpack.c.bf16 %v774_v62, %v767_v58  ;;  %6668 = vmatprep.subr.bf16.mxu0 %v7803_v63  ;;  %v10600_v10 = vand.u32 4294901760, %v7747_v28  ;;  %v10599_v11 = vand.u32 4294901760, %v7749_v29  ;;  %v427_v58 = vld [vmem:[%s10581_s3 + $0xd0] sm:$0xff] }
  0x46   : > { %v781_v9 = vand.u32 4294901760, %v780_v1  ;;  %v788_v13 = vand.u32 4294901760, %v787_v3  ;;  %v7828_v17 = vsub.f32 %v407_v56, %v452_v4  ;;  %v506_v25 = vand.u32 4294901760, %v425_v6  ;;  %v411_v3 = vld [vmem:[%s10581_s3 + $0x50] sm:$0xff] }
  0x47   : > { %v7826_v16 = vpack.c.bf16 %v455_v5, %v452_v4  ;;  %v7830_v18 = vsub.f32 %v408_v57, %v455_v5  ;;  %6688 = vmatprep.subr.bf16.mxu1 %v6687_v8  ;;  %v668_v19 = vsub.f32 %v7747_v28, %v10600_v10  ;;  %v675_v24 = vsub.f32 %v7749_v29, %v10599_v11 }
  0x48   : > { %v509_v30 = vand.u32 4294901760, %v426_v7  ;;  %6690 = vmatpush3.bf16.msra.mxu1 %v6689_v2  ;;  %v6691_v34 = vpack.c.bf16 %v788_v13, %v781_v9  ;;  %v10596_v35 = vand.u32 4294901760, %v7764_v40  ;;  %v10595_v38 = vand.u32 4294901760, %v7766_v41 }
  0x49   : > { %11022 = vst [vmem:[#allocation12_spill] sm:$0xff] %v7826_v16  ;;  %6670 = vmatpush3.bf16.msra.mxu0 %v7826_v16  ;;  %v458_v43 = vand.u32 4294901760, %v409_v12  ;;  %v669_v48 = vand.u32 4294901760, %v668_v19  ;;  %v676_v49 = vand.u32 4294901760, %v675_v24  ;;  %v7846_v51 = vsub.f32 %v425_v6, %v506_v25  ;;  %v412_v19 = vld [vmem:[%s10581_s3 + $0x58] sm:$0xff] }
  0x4a   : > { %v7844_v50 = vpack.c.bf16 %v509_v30, %v506_v25  ;;  %6692 = vmatprep.subr.bf16.mxu1 %v6691_v34  ;;  %v7848_v52 = vsub.f32 %v426_v7, %v509_v30  ;;  %v794_v53 = vsub.f32 %v7764_v40, %v10596_v35  ;;  %v801_v56 = vsub.f32 %v7766_v41, %v10595_v38 }
  0x4b   : > { %v461_v57 = vand.u32 4294901760, %v410_v31  ;;  %v6693_v60 = vpack.c.bf16 %v676_v49, %v669_v48  ;;  %v7863_v62 = vsub.f32 %v409_v12, %v458_v43  ;;  %v10593_v1 = vand.u32 4294901760, %v7775_v46 }
  0x4c   : > { %11023 = vst [vmem:[#allocation13_spill] sm:$0xff] %v7844_v50  ;;  %6672 = vmatprep.subr.bf16.mxu0 %v7844_v50  ;;  %v10592_v2 = vand.u32 4294901760, %v7777_v47  ;;  %v795_v4 = vand.u32 4294901760, %v794_v53  ;;  %v802_v5 = vand.u32 4294901760, %v801_v56  ;;  %v512_v12 = vand.u32 4294901760, %v427_v58 }
  0x4d   : > { %v7871_v6 = vpack.c.bf16 %v461_v57, %v458_v43  ;;  %v7873_v7 = vsub.f32 %v410_v31, %v461_v57  ;;  %6694 = vmatpush3.bf16.msra.mxu1 %v6693_v60  ;;  %v682_v8 = vsub.f32 %v7775_v46, %v10593_v1  ;;  %v515_v13 = vand.u32 4294901760, %v428_v59 }
  0x4e   : > { %v689_v9 = vsub.f32 %v7777_v47, %v10592_v2  ;;  %v6695_v24 = vpack.c.bf16 %v802_v5, %v795_v4  ;;  %v10590_v25 = vand.u32 4294901760, %v7801_v61  ;;  %v10589_v30 = vand.u32 4294901760, %v7805_v0  ;;  %v429_v4 = vld [vmem:[%s10581_s3 + $0xe0] sm:$0xff] }
  0x4f   : > { %11024 = vst [vmem:[#allocation14_spill] sm:$0xff] %v7871_v6  ;;  %6674 = vmatpush3.bf16.msra.mxu0 %v7871_v6  ;;  %v464_v31 = vand.u32 4294901760, %v411_v3  ;;  %v683_v34 = vand.u32 4294901760, %v682_v8  ;;  %v7893_v48 = vpack.c.bf16 %v515_v13, %v512_v12  ;;  %v7895_v49 = vsub.f32 %v427_v58, %v512_v12  ;;  %v430_v58 = vld [vmem:[%s10581_s3 + $0xe8] sm:$0xff]  ;;  %v413_v12 = vld [vmem:[%s10581_s3 + $0x60] sm:$0xff] }
  0x50   : > { %v690_v43 = vand.u32 4294901760, %v689_v9  ;;  %6696 = vmatprep.subr.bf16.mxu1 %v6695_v24  ;;  %v7897_v53 = vsub.f32 %v428_v59, %v515_v13  ;;  %v808_v56 = vsub.f32 %v7801_v61, %v10590_v25  ;;  %v815_v57 = vsub.f32 %v7805_v0, %v10589_v30 }
  0x51   : > { %11026 = vst [vmem:[#allocation15_spill] sm:$0xff] %v7893_v48  ;;  %v467_v60 = vand.u32 4294901760, %v412_v19  ;;  %6676 = vmatprep.subr.bf16.mxu0 %v7893_v48  ;;  %v7912_v5 = vsub.f32 %v411_v3, %v464_v31  ;;  %v10591_v8 = vand.u32 4294901760, %v7828_v17  ;;  %v10594_v9 = vand.u32 4294901760, %v7830_v18 }
  0x52   : > { %v6697_v59 = vpack.c.bf16 %v690_v43, %v683_v34  ;;  %v809_v13 = vand.u32 4294901760, %v808_v56  ;;  %v816_v24 = vand.u32 4294901760, %v815_v57  ;;  %v518_v43 = vand.u32 4294901760, %v429_v4 }
  0x53   : > { %v7919_v30 = vpack.c.bf16 %v467_v60, %v464_v31  ;;  %v7921_v25 = vsub.f32 %v412_v19, %v467_v60  ;;  %v696_v3 = vsub.f32 %v7828_v17, %v10591_v8  ;;  %v703_v34 = vsub.f32 %v7830_v18, %v10594_v9  ;;  %v414_v19 = vld [vmem:[%s10581_s3 + $0x68] sm:$0xff] }
  0x54   : > { %6698 = vmatpush3.bf16.msra.mxu1 %v6697_v59  ;;  %v521_v56 = vand.u32 4294901760, %v430_v58  ;;  %v6699_v31 = vpack.c.bf16 %v816_v24, %v809_v13  ;;  %v10598_v57 = vand.u32 4294901760, %v7846_v51  ;;  %v10597_v60 = vand.u32 4294901760, %v7848_v52 }
  0x55   : > { %11027 = vst [vmem:[#allocation16_spill] sm:$0xff] %v7919_v30  ;;  %6678 = vmatpush3.bf16.msra.mxu0 %v7919_v30  ;;  %v470_v59 = vand.u32 4294901760, %v413_v12  ;;  %v697_v8 = vand.u32 4294901760, %v696_v3  ;;  %v704_v2 = vand.u32 4294901760, %v703_v34  ;;  %v7943_v9 = vsub.f32 %v429_v4, %v518_v43  ;;  %v431_v3 = vld [vmem:[%s10581_s3 + $0xf0] sm:$0xff]  ;;  %v432_v4 = vld [vmem:[%s10581_s3 + $0xf8] sm:$0xff] }
  0x56   : > { %v7941_v1 = vpack.c.bf16 %v521_v56, %v518_v43  ;;  %6700 = vmatprep.subr.bf16.mxu1 %v6699_v31  ;;  %v7945_v38 = vsub.f32 %v430_v58, %v521_v56  ;;  %v822_v13 = vsub.f32 %v7846_v51, %v10598_v57  ;;  %v829_v24 = vsub.f32 %v7848_v52, %v10597_v60  ;;  %v415_v31 = vld [vmem:[%s10581_s3 + $0x70] sm:$0xff] }
  0x57   : > { %v473_v35 = vand.u32 4294901760, %v414_v19  ;;  %v6701_v58 = vpack.c.bf16 %v704_v2, %v697_v8  ;;  %v7961_v34 = vsub.f32 %v413_v12, %v470_v59  ;;  %v10603_v43 = vand.u32 4294901760, %v7863_v62 }
  0x58   : > { %11028 = vst [vmem:[#allocation17_spill] sm:$0xff] %v7941_v1  ;;  %6680 = vmatprep.subr.bf16.mxu0 %v7941_v1  ;;  %v10602_v56 = vand.u32 4294901760, %v7873_v7  ;;  %v823_v60 = vand.u32 4294901760, %v822_v13  ;;  %v830_v57 = vand.u32 4294901760, %v829_v24  ;;  %v524_v12 = vand.u32 4294901760, %v431_v3  ;;  %v416_v13 = vld [vmem:[%s10581_s3 + $0x78] sm:$0xff] }
  0x59   : > { %v7968_v11 = vpack.c.bf16 %v473_v35, %v470_v59  ;;  %v7970_v10 = vsub.f32 %v414_v19, %v473_v35  ;;  %6702 = vmatpush3.bf16.msra.mxu1 %v6701_v58  ;;  %v710_v2 = vsub.f32 %v7863_v62, %v10603_v43  ;;  %v527_v55 = vand.u32 4294901760, %v432_v4 }
  0x5a   : > { %v717_v8 = vsub.f32 %v7873_v7, %v10602_v56  ;;  %v6703_v35 = vpack.c.bf16 %v830_v57, %v823_v60  ;;  %v10609_v19 = vand.u32 4294901760, %v7895_v49  ;;  %v10610_v59 = vand.u32 4294901760, %v7897_v53 }
  0x5b   : > { %11029 = vst [vmem:[#allocation18_spill] sm:$0xff] %v7968_v11  ;;  %6682 = vmatpush3.bf16.msra.mxu0 %v7968_v11  ;;  %v476_v24 = vand.u32 4294901760, %v415_v31  ;;  %v711_v58 = vand.u32 4294901760, %v710_v2  ;;  %v7991_v43 = vpack.c.bf16 %v527_v55, %v524_v12  ;;  %v7993_v54 = vsub.f32 %v431_v3, %v524_v12 }
  0x5c   : > { %v718_v56 = vand.u32 4294901760, %v717_v8  ;;  %6704 = vmatprep.subr.bf16.mxu1 %v6703_v35  ;;  %v7995_v37 = vsub.f32 %v432_v4, %v527_v55  ;;  %v836_v57 = vsub.f32 %v7895_v49, %v10609_v19  ;;  %v843_v60 = vsub.f32 %v7897_v53, %v10610_v59 }
  0x5d   : > { %11030 = vst [vmem:[#allocation19_spill] sm:$0xff] %v7991_v43  ;;  %v479_v36 = vand.u32 4294901760, %v416_v13  ;;  %6684 = vmatprep.subr.bf16.mxu0 %v7991_v43  ;;  %v8006_v8 = vsub.f32 %v415_v31, %v476_v24  ;;  %v10614_v3 = vand.u32 4294901760, %v7912_v5  ;;  %v10613_v55 = vand.u32 4294901760, %v7921_v25 }
  0x5e   : > { %v6705_v2 = vpack.c.bf16 %v718_v56, %v711_v58  ;;  %v837_v4 = vand.u32 4294901760, %v836_v57  ;;  %v844_v12 = vand.u32 4294901760, %v843_v60  ;;  %v8020_v31 = vand.u32 4294901760, %v354_v44 }
  0x5f   : > { %11031 = vst [vmem:[#allocation20_spill] sm:$0xff] %v8006_v8  ;;  %v8010_v35 = vpack.c.bf16 %v479_v36, %v476_v24  ;;  %v8012_v19 = vsub.f32 %v416_v13, %v479_v36  ;;  %v724_v59 = vsub.f32 %v7912_v5, %v10614_v3  ;;  %v731_v56 = vsub.f32 %v7921_v25, %v10613_v55  ;;  %v355_v3 = vld [vmem:[%s7986_s18 + $0x10] sm:$0xff] }
  0x60   : > { %6706 = vmatpush3.bf16.msra.mxu1 %v6705_v2  ;;  %11034 = vst [vmem:[#allocation23_spill] sm:$0xff] %v8020_v31  ;;  %v8022_v58 = vand.u32 4294901760, %v353_v42  ;;  %v6707_v43 = vpack.c.bf16 %v844_v12, %v837_v4  ;;  %v10617_v36 = vand.u32 4294901760, %v7943_v9  ;;  %v10622_v13 = vand.u32 4294901760, %v7945_v38  ;;  %875 = vmatprep.mubr.f32.mxu1 %v8020_v31 }
  0x61   : > { %11032 = vst [vmem:[#allocation21_spill] sm:$0xff] %v8010_v35  ;;  %11033 = vst [vmem:[#allocation22_spill] sm:$0xff] %v8012_v19  ;;  %6686 = vmatpush3.bf16.msra.mxu0 %v8010_v35  ;;  %v6719_v24 = vpack.c.bf16 %v7754_v33, %v7752_v32  ;;  %v725_v57 = vand.u32 4294901760, %v724_v59  ;;  %v732_v60 = vand.u32 4294901760, %v731_v56  ;;  %v8030_v2 = vsub.f32 %v354_v44, %v8020_v31  ;;  %v356_v56 = vld [vmem:[%s7986_s18 + $0x18] sm:$0xff] }
  0x62   : > { %11035 = vst [vmem:[#allocation24_spill] sm:$0xff] %v8022_v58  ;;  %v8033_v55 = vsub.f32 %v353_v42, %v8022_v58  ;;  %6708 = vmatprep.subr.bf16.mxu1 %v6707_v43  ;;  %v850_v4 = vsub.f32 %v7943_v9, %v10617_v36  ;;  %v857_v12 = vsub.f32 %v7945_v38, %v10622_v13  ;;  %v10629_v59 = vand.u32 4294901760, %v7961_v34 }
  0x63   : > { %11036 = vst [vmem:[#allocation25_spill] sm:$0xff] %v8030_v2  ;;  %6720 = vmatprep.subr.bf16.mxu0 %v6719_v24  ;;  %v10632_v44 = vand.u32 4294901760, %v7970_v10  ;;  %v6709_v42 = vpack.c.bf16 %v732_v60, %v725_v57  ;;  %v8047_v35 = vand.u32 4294901760, %v8030_v2  ;;  %v6721_v36 = vpack.c.bf16 %v7730_v21, %v7720_v15 }
  0x64   : > { %11037 = vst [vmem:[#allocation26_spill] sm:$0xff] %v8033_v55  ;;  %v8050_v43 = vand.u32 4294901760, %v8033_v55  ;;  %v851_v31 = vand.u32 4294901760, %v850_v4  ;;  %v858_v11 = vand.u32 4294901760, %v857_v12  ;;  %v738_v24 = vsub.f32 %v7961_v34, %v10629_v59 }
  0x65   : > { %11038 = vst [vmem:[#allocation27_spill] sm:$0xff] %v8047_v35  ;;  %v745_v57 = vsub.f32 %v7970_v10, %v10632_v44  ;;  %6710 = vmatpush3.bf16.msra.mxu1 %v6709_v42  ;;  %v532_v60 = vsub.f32 %v8030_v2, %v8047_v35  ;;  %v8064_v1 = vand.u32 4294901760, %v356_v56  ;;  %v8066_v4 = vand.u32 4294901760, %v355_v3 }
  0x66   : > { %11039 = vst [vmem:[#allocation28_spill] sm:$0xff] %v8050_v43  ;;  %v538_v13 = vsub.f32 %v8033_v55, %v8050_v43  ;;  %v6711_v12 = vpack.c.bf16 %v858_v11, %v851_v31  ;;  %v739_v30 = vand.u32 4294901760, %v738_v24  ;;  %v10639_v59 = vand.u32 4294901760, %v7993_v54  ;;  %v358_v43 = vld [vmem:[%s7986_s18 + $0x28] sm:$0xff] }
  0x67   : > { %11040 = vst [vmem:[#allocation29_spill] sm:$0xff] %v8064_v1  ;;  %11041 = vst [vmem:[#allocation30_spill] sm:$0xff] %v8066_v4  ;;  %v746_v48 = vand.u32 4294901760, %v745_v57  ;;  %v8069_v6 = vand.u32 4294901760, %v532_v60  ;;  %v8074_v42 = vsub.f32 %v356_v56, %v8064_v1  ;;  %v8077_v35 = vsub.f32 %v355_v3, %v8066_v4 }
  0x68   : > { %v8071_v44 = vand.u32 4294901760, %v538_v13  ;;  %6712 = vmatprep.subr.bf16.mxu1 %v6711_v12  ;;  %v864_v11 = vsub.f32 %v7993_v54, %v10639_v59  ;;  %v10641_v31 = vand.u32 4294901760, %v7995_v37  ;;  %v6723_v24 = vpack.c.bf16 %v7743_v26, %v7734_v23 }
  0x69   : > { %11042 = vst [vmem:[#allocation31_spill] sm:$0xff] %v8069_v6  ;;  %11044 = vst [vmem:[#allocation33_spill] sm:$0xff] %v8074_v42  ;;  %v6713_v55 = vpack.c.bf16 %v746_v48, %v739_v30  ;;  %534 = vmatprep.mubr.f32.mxu0 %v8069_v6  ;;  %v8088_v13 = vand.u32 4294901760, %v8074_v42  ;;  %v8091_v3 = vand.u32 4294901760, %v8077_v35  ;;  %v357_v48 = vld [vmem:[%s7986_s18 + $0x20] sm:$0xff]  ;;  %v6725_v12 = vpack.c.bf16 %v7749_v29, %v7747_v28 }
  0x6a   : > { %11043 = vst [vmem:[#allocation32_spill] sm:$0xff] %v8071_v44  ;;  %11045 = vst [vmem:[#allocation34_spill] sm:$0xff] %v8077_v35  ;;  %540 = vmatmul.mubr.f32.vlgmr.msra.gmra.mrb[0].mxu0 %v8071_v44  ;;  %v865_v57 = vand.u32 4294901760, %v864_v11  ;;  %v871_v60 = vsub.f32 %v7995_v37, %v10641_v31  ;;  %v8102_v59 = vand.u32 4294901760, %v358_v43  ;;  %v11050_v44 = vand.u32 4294901760, %v8012_v19 }
  0x6b   : > { %11046 = vst [vmem:[#allocation35_spill] sm:$0xff] %v8088_v13  ;;  %11047 = vst [vmem:[#allocation36_spill] sm:$0xff] %v8091_v3  ;;  %6714 = vmatpush3.bf16.msra.mxu1 %v6713_v55  ;;  %6722 = vmatpush3.bf16.msra.mxu0 %v6721_v36  ;;  %v547_v30 = vsub.f32 %v8074_v42, %v8088_v13  ;;  %v553_v56 = vsub.f32 %v8077_v35, %v8091_v3  ;;  %v11049_v55 = vand.u32 4294901760, %v8006_v8  ;;  %v360_v3 = vld [vmem:[%s7986_s18 + $0x38] sm:$0xff]  ;;  %v359_v35 = vld [vmem:[%s7986_s18 + $0x30] sm:$0xff] }
  0x6c   : > { %11048 = vst [vmem:[#allocation37_spill] sm:$0xff] %v8102_v59  ;;  %v759_v31 = vsub.f32 %v8012_v19, %v11050_v44  ;;  %v872_v6 = vand.u32 4294901760, %v871_v60  ;;  %6724 = vmatprep.subr.bf16.mxu0 %v6723_v24  ;;  %v8115_v36 = vsub.f32 %v358_v43, %v8102_v59  ;;  %v8117_v2 = vand.u32 4294901760, %v357_v48  ;;  %v362_v44 = vld [vmem:[%s7986_s18 + $0x48] sm:$0xff]  ;;  %v361_v19 = vld [vmem:[%s7986_s18 + $0x40] sm:$0xff] }
  0x6d   : > { %v752_v11 = vsub.f32 %v8006_v8, %v11049_v55  ;;  %v6727_v13 = vpack.c.bf16 %v7766_v41, %v7764_v40  ;;  %v8123_v42 = vand.u32 4294901760, %v547_v30  ;;  %v8125_v55 = vand.u32 4294901760, %v553_v56 }
  0x6e   : > { %11051 = vst [vmem:[#allocation38_spill] sm:$0xff] %v8115_v36  ;;  %11052 = vst [vmem:[#allocation39_spill] sm:$0xff] %v8117_v2  ;;  %v760_v50 = vand.u32 4294901760, %v759_v31  ;;  %v6715_v60 = vpack.c.bf16 %v872_v6, %v865_v57  ;;  %v8129_v24 = vand.u32 4294901760, %v8115_v36  ;;  %v8132_v43 = vsub.f32 %v357_v48, %v8117_v2 }
  0x6f   : > { %11053 = vst [vmem:[#allocation40_spill] sm:$0xff] %v8123_v42  ;;  %11054 = vst [vmem:[#allocation41_spill] sm:$0xff] %v8125_v55  ;;  %v753_v8 = vand.u32 4294901760, %v752_v11  ;;  %549 = vmatprep.mubr.f32.mxu0 %v8123_v42  ;;  %6726 = vmatpush3.bf16.msra.mxu0 %v6725_v12  ;;  %v6729_v56 = vpack.c.bf16 %v7777_v47, %v7775_v46  ;;  %v8138_v30 = vand.u32 4294901760, %v360_v3  ;;  %v8140_v31 = vand.u32 4294901760, %v359_v35 }
  0x70   : > { %11055 = vst [vmem:[#allocation42_spill] sm:$0xff] %v8129_v24  ;;  %11056 = vst [vmem:[#allocation43_spill] sm:$0xff] %v8132_v43  ;;  %555 = vmatmul.mubr.f32.gmra.mrb[2].mxu0 %v8125_v55  ;;  %6716 = vmatprep.subr.bf16.mxu1 %v6715_v60  ;;  %v562_v6 = vsub.f32 %v8115_v36, %v8129_v24  ;;  %v8146_v48 = vand.u32 4294901760, %v8132_v43  ;;  %v8148_v57 = vand.u32 4294901760, %v362_v44  ;;  %v8159_v60 = vand.u32 4294901760, %v361_v19  ;;  %v363_v55 = vld [vmem:[%s7986_s18 + $0x50] sm:$0xff] }
  0x71   : > { %v6717_v16 = vpack.c.bf16 %v760_v50, %v753_v8  ;;  %11057 = vst [vmem:[#allocation44_spill] sm:$0xff] %v8138_v30  ;;  %11058 = vst [vmem:[#allocation45_spill] sm:$0xff] %v8140_v31  ;;  %v364_v50 = vld [vmem:[%s7986_s18 + $0x58] sm:$0xff]  ;;  %6728 = vmatprep.subr.bf16.mxu0 %v6727_v13  ;;  %v8152_v8 = vsub.f32 %v360_v3, %v8138_v30  ;;  %v8155_v12 = vsub.f32 %v359_v35, %v8140_v31 }
  0x72   : > { %11059 = vst [vmem:[#allocation46_spill] sm:$0xff] %v8146_v48  ;;  %11060 = vst [vmem:[#allocation47_spill] sm:$0xff] %v8148_v57  ;;  %v6731_v11 = vpack.c.bf16 %v7805_v0, %v7801_v61  ;;  %v8162_v42 = vand.u32 4294901760, %v562_v6  ;;  %v568_v24 = vsub.f32 %v8132_v43, %v8146_v48  ;;  %v8170_v13 = vsub.f32 %v362_v44, %v8148_v57  ;;  %v366_v43 = vld [vmem:[%s7986_s18 + $0x68] sm:$0xff] }
  0x73   : > { %6718 = vmatpush3.bf16.msra.mxu1 %v6717_v16  ;;  %11061 = vst [vmem:[#allocation48_spill] sm:$0xff] %v8152_v8  ;;  %11062 = vst [vmem:[#allocation49_spill] sm:$0xff] %v8155_v12  ;;  %v6733_v16 = vpack.c.bf16 %v7830_v18, %v7828_v17  ;;  %6730 = vmatpush3.bf16.msra.mxu0 %v6729_v56  ;;  %v8173_v35 = vand.u32 4294901760, %v8152_v8  ;;  %v8176_v3 = vand.u32 4294901760, %v8155_v12  ;;  %v8181_v48 = vand.u32 4294901760, %v364_v50 }
  0x74   : > { %11063 = vst [vmem:[#allocation50_spill] sm:$0xff] %v8159_v60  ;;  %11064 = vst [vmem:[#allocation51_spill] sm:$0xff] %v8162_v42  ;;  %6752 = vmatprep.subr.bf16.mxu1 %v7718_v14  ;;  %v8179_v6 = vsub.f32 %v361_v19, %v8159_v60  ;;  %564 = vmatprep.mubr.f32.mxu0 %v8162_v42  ;;  %v8185_v36 = vand.u32 4294901760, %v568_v24  ;;  %v8189_v44 = vand.u32 4294901760, %v8170_v13  ;;  %v8193_v14 = vand.u32 4294901760, %v363_v55  ;;  %v365_v60 = vld [vmem:[%s7986_s18 + $0x60] sm:$0xff] }
  0x75   : > { %11065 = vst [vmem:[#allocation52_spill] sm:$0xff] %v8170_v13  ;;  %11066 = vst [vmem:[#allocation53_spill] sm:$0xff] %v8173_v35  ;;  %v6735_v56 = vpack.c.bf16 %v7848_v52, %v7846_v51  ;;  %v577_v19 = vsub.f32 %v8152_v8, %v8173_v35  ;;  %v583_v24 = vsub.f32 %v8155_v12, %v8176_v3  ;;  %6732 = vmatprep.subr.bf16.mxu0 %v6731_v11 }
  0x76   : > { %11067 = vst [vmem:[#allocation54_spill] sm:$0xff] %v8176_v3  ;;  %11068 = vst [vmem:[#allocation55_spill] sm:$0xff] %v8179_v6  ;;  %877 = vmatmul.mubr.f32.vlgmr.msra.gmra.mrb[0].mxu1 %v8022_v58  ;;  %v8202_v42 = vand.u32 4294901760, %v8179_v6  ;;  %v8205_v58 = vsub.f32 %v364_v50, %v8181_v48  ;;  %570 = vmatmul.mubr.f32.gmra.mrb[4].mxu0 %v8185_v36  ;;  %v8214_v3 = vsub.f32 %v363_v55, %v8193_v14 }
  0x77   : > { %11069 = vst [vmem:[#allocation56_spill] sm:$0xff] %v8181_v48  ;;  %11070 = vst [vmem:[#allocation57_spill] sm:$0xff] %v8185_v36  ;;  %6754 = vmatpush3.bf16.msra.mxu1 %v7728_v20  ;;  %882 = vmatprep.mubr.f32.mxu1 %v8064_v1  ;;  %v592_v20 = vsub.f32 %v8170_v13, %v8189_v44  ;;  %v6737_v1 = vpack.c.bf16 %v7873_v7, %v7863_v62  ;;  %v8216_v35 = vand.u32 4294901760, %v366_v43 }
  0x78   : > { %11071 = vst [vmem:[#allocation58_spill] sm:$0xff] %v8189_v44  ;;  %11072 = vst [vmem:[#allocation59_spill] sm:$0xff] %v8193_v14  ;;  %v8218_v12 = vand.u32 4294901760, %v577_v19  ;;  %v8220_v50 = vand.u32 4294901760, %v583_v24  ;;  %6756 = vmatprep.subr.bf16.mxu1 %v7732_v22  ;;  %6734 = vmatpush3.bf16.msra.mxu0 %v6733_v16  ;;  %v598_v11 = vsub.f32 %v8179_v6, %v8202_v42  ;;  %v8226_v36 = vand.u32 4294901760, %v8205_v58  ;;  %v368_v44 = vld [vmem:[%s7986_s18 + $0x78] sm:$0xff] }
  0x79   : > { %11073 = vst [vmem:[#allocation60_spill] sm:$0xff] %v8202_v42  ;;  %11074 = vst [vmem:[#allocation61_spill] sm:$0xff] %v8205_v58  ;;  %v8230_v55 = vand.u32 4294901760, %v592_v20  ;;  %6736 = vmatprep.subr.bf16.mxu0 %v6735_v56  ;;  %v8233_v19 = vand.u32 4294901760, %v8214_v3  ;;  %v8236_v24 = vsub.f32 %v366_v43, %v8216_v35  ;;  %v8238_v13 = vand.u32 4294901760, %v365_v60  ;;  %v367_v16 = vld [vmem:[%s7986_s18 + $0x70] sm:$0xff] }
  0x7a   : > { %11075 = vst [vmem:[#allocation62_spill] sm:$0xff] %v8214_v3  ;;  %11076 = vst [vmem:[#allocation63_spill] sm:$0xff] %v8216_v35  ;;  %884 = vmatmul.mubr.f32.gmra.mrb[2].mxu1 %v8066_v4  ;;  %579 = vmatprep.mubr.f32.mxu0 %v8218_v12  ;;  %v8243_v42 = vand.u32 4294901760, %v598_v11  ;;  %v607_v20 = vsub.f32 %v8205_v58, %v8226_v36  ;;  %v6739_v56 = vpack.c.bf16 %v7897_v53, %v7895_v49  ;;  %s5249_s18 = sshll.u32 %s10506_s17, 4  ;;  %s10527_s18 = int_to_ptr.vmem [resolvable:$true] %s5249_s18 }
  0x7b   : > { %11077 = vst [vmem:[#allocation64_spill] sm:$0xff] %v8218_v12  ;;  %11078 = vst [vmem:[#allocation65_spill] sm:$0xff] %v8220_v50  ;;  %6758 = vmatpush3.bf16.msra.mxu1 %v7745_v27  ;;  %v6741_v4 = vpack.c.bf16 %v7921_v25, %v7912_v5  ;;  %585 = vmatmul.mubr.f32.gmra.mrb[6].mxu0 %v8220_v50  ;;  %v613_v43 = vsub.f32 %v8214_v3, %v8233_v19  ;;  %v8256_v12 = vand.u32 4294901760, %v8236_v24  ;;  %s7497_s13 = scalar_lea.vmem %s10527_s18, 1024  ;;  %p7504_p2 = scmp.lt.s32.totalorder %s10527_s18, %s7502_s23 }
  0x7c   : > { %11079 = vst [vmem:[#allocation66_spill] sm:$0xff] %v8226_v36  ;;  %11080 = vst [vmem:[#allocation67_spill] sm:$0xff] %v8230_v55  ;;  %889 = vmatprep.mubr.f32.mxu1 %v8102_v59  ;;  %v8259_v11 = vsub.f32 %v365_v60, %v8238_v13  ;;  %v8261_v36 = vand.u32 4294901760, %v368_v44  ;;  %594 = vmatprep.mubr.f32.mxu0 %v8230_v55  ;;  %v8265_v58 = vand.u32 4294901760, %v607_v20  ;;  %p7498_p6 = scmp.ne.s32.totalorder %s10527_s18, %s7497_s13  ;;  %p7505_p3 = scmp.lt.s32.totalorder %s7503_s29, %s7497_s13 }
  0x7d   : > { %11081 = vst [vmem:[#allocation68_spill] sm:$0xff] %v8233_v19  ;;  %11082 = vst [vmem:[#allocation69_spill] sm:$0xff] %v8236_v24  ;;  %6760 = vmatprep.subr.bf16.mxu1 %v7762_v39  ;;  %v6743_v50 = vpack.c.bf16 %v7945_v38, %v7943_v9  ;;  %v6745_v59 = vpack.c.bf16 %v7970_v10, %v7961_v34  ;;  %v8271_v19 = vand.u32 4294901760, %v367_v16  ;;  %6738 = vmatpush3.bf16.msra.mxu0 %v6737_v1 }
  0x7e   : > { %11083 = vst [vmem:[#allocation70_spill] sm:$0xff] %v8238_v13  ;;  %11084 = vst [vmem:[#allocation71_spill] sm:$0xff] %v8243_v42  ;;  %891 = vmatmul.mubr.f32.gmra.mrb[4].mxu1 %v8117_v2  ;;  %v622_v60 = vsub.f32 %v8236_v24, %v8256_v12  ;;  %v8277_v55 = vand.u32 4294901760, %v8259_v11  ;;  %v8280_v20 = vsub.f32 %v368_v44, %v8261_v36  ;;  %v8286_v6 = vand.u32 4294901760, %v613_v43  ;;  %p7499_p10 = pnand %p7498_p6, %p11639_p9  ;;  %p7506_p4 = por %p7505_p3, %p7504_p2 }
  0x7f   : > { %11085 = vst [vmem:[#allocation72_spill] sm:$0xff] %v8256_v12  ;;  %11086 = vst [vmem:[#allocation73_spill] sm:$0xff] %v8259_v11  ;;  %v6747_v3 = vpack.c.bf16 %v7995_v37, %v7993_v54  ;;  %6762 = vmatpush3.bf16.msra.mxu1 %v7773_v45  ;;  %896 = vmatprep.mubr.f32.mxu1 %v8138_v30  ;;  %v8289_v1 = vsub.f32 %v367_v16, %v8271_v19  ;;  %v11094_v2 = vand.u32 4294901760, %v7752_v32 }
  0x80   : > { %11087 = vst [vmem:[#allocation74_spill] sm:$0xff] %v8261_v36  ;;  %11088 = vst [vmem:[#allocation75_spill] sm:$0xff] %v8265_v58  ;;  %v11095_v12 = vand.u32 4294901760, %v7754_v33  ;;  %v11096_v44 = vand.u32 4294901760, %v7720_v15  ;;  %v11097_v39 = vand.u32 4294901760, %v7730_v21  ;;  %600 = vmatmul.mubr.f32.gmra.mrb[8].mxu0 %v8243_v42  ;;  %6740 = vmatprep.subr.bf16.mxu0 %v6739_v56  ;;  %v8302_v30 = vand.u32 4294901760, %v622_v60  ;;  %p7500_p12 = pneg %p7499_p10 }
  0x81   : > { %11089 = vst [vmem:[#allocation76_spill] sm:$0xff] %v8271_v19  ;;  %11090 = vst [vmem:[#allocation77_spill] sm:$0xff] %v8277_v55  ;;  %v628_v16 = vsub.f32 %v8259_v11, %v8277_v55  ;;  %v8307_v43 = vand.u32 4294901760, %v8280_v20  ;;  %v11100_v32 = vand.u32 4294901760, %v7734_v23  ;;  %v11101_v33 = vand.u32 4294901760, %v7743_v26  ;;  %609 = vmatprep.mubr.f32.mxu0 %v8265_v58  ;;  %6764 = vmatprep.subr.bf16.mxu1 %v7803_v63 }
  0x82   : > { %11091 = vst [vmem:[#allocation78_spill] sm:$0xff] %v8280_v20  ;;  %11092 = vst [vmem:[#allocation79_spill] sm:$0xff] %v8286_v6  ;;  %v6783_v24 = vpack.c.bf16 %v11095_v12, %v11094_v2  ;;  %v8299_v27 = vpack.c.bf16 %v11097_v39, %v11096_v44  ;;  %v8318_v21 = vand.u32 4294901760, %v8289_v1  ;;  %v11103_v39 = vand.u32 4294901760, %v7747_v28  ;;  %898 = vmatmul.mubr.f32.gmra.mrb[6].mxu1 %v8140_v31  ;;  %p7507_p7 = pnand %p7506_p4, %p7500_p12 }
  0x83   : > { %11093 = vst [vmem:[#allocation80_spill] sm:$0xff] %v8289_v1  ;;  %11098 = vst [vmem:[#allocation81_spill] sm:$0xff] %v8302_v30  ;;  %v8313_v15 = vpack.c.bf16 %v11101_v33, %v11100_v32  ;;  %v11104_v2 = vand.u32 4294901760, %v7749_v29  ;;  %v11105_v56 = vand.u32 4294901760, %v7764_v40  ;;  %v11106_v23 = vand.u32 4294901760, %v7766_v41  ;;  %6742 = vmatpush3.bf16.msra.mxu0 %v6741_v4  ;;  %903 = vmatprep.mubr.f32.mxu1 %v8148_v57 }
  0x84   : > { %11099 = vst [vmem:[#allocation82_spill] sm:$0xff] %v8307_v43  ;;  %11102 = vst [vmem:[#allocation83_spill] sm:$0xff] %v8318_v21  ;;  %v11107_v60 = vand.u32 4294901760, %v7775_v46  ;;  %v11108_v44 = vand.u32 4294901760, %v7777_v47  ;;  %v637_v28 = vsub.f32 %v8280_v20, %v8307_v43  ;;  %v11109_v29 = vand.u32 4294901760, %v7801_v61  ;;  %v11113_v47 = vld [vmem:[#allocation12_spill] sm:$0xff]  ;;  %615 = vmatmul.mubr.f32.gmra.mrb[10].mxu0 %v8286_v6  ;;  %6744 = vmatprep.subr.bf16.mxu0 %v6743_v50 }
  0x85   : > { %v8324_v12 = vpack.c.bf16 %v11104_v2, %v11103_v39  ;;  %v8330_v26 = vpack.c.bf16 %v11106_v23, %v11105_v56  ;;  %v11110_v40 = vand.u32 4294901760, %v7805_v0  ;;  %v11111_v41 = vand.u32 4294901760, %v7828_v17  ;;  %6766 = vmatpush3.bf16.msra.mxu1 %v11113_v47  ;;  %624 = vmatprep.mubr.f32.mxu0 %v8302_v30  ;;  %v11125_v50 = vld [vmem:[#allocation13_spill] sm:$0xff]  ;;  %v11145_v6 = vld [vmem:[#allocation27_spill] sm:$0xff] }
  0x86   : > { %v8336_v32 = vpack.c.bf16 %v11108_v44, %v11107_v60  ;;  %v11112_v46 = vand.u32 4294901760, %v7830_v18  ;;  %v643_v4 = vsub.f32 %v8289_v1, %v8318_v21  ;;  %v11114_v2 = vand.u32 4294901760, %v7846_v51  ;;  %6768 = vmatprep.subr.bf16.mxu1 %v11125_v50  ;;  %v11144_v30 = vld [vmem:[#allocation21_spill] sm:$0xff] }
  0x87   : > { %v8345_v33 = vpack.c.bf16 %v11110_v40, %v11109_v29  ;;  %v11115_v61 = vand.u32 4294901760, %v7848_v52  ;;  %v11116_v56 = vand.u32 4294901760, %v7863_v62  ;;  %v11117_v17 = vand.u32 4294901760, %v7873_v7  ;;  %6746 = vmatpush3.bf16.msra.mxu0 %v6745_v59  ;;  %v386_v59 = vld [vmem:[%s10580_s2 + $0x88] sm:$0xff] }
  0x88   : > { %v8351_v39 = vpack.c.bf16 %v11112_v46, %v11111_v41  ;;  %v8370_v23 = vand.u32 4294901760, %v628_v16  ;;  %v11119_v60 = vand.u32 4294901760, %v7895_v49  ;;  %v11120_v44 = vand.u32 4294901760, %v7897_v53  ;;  %v11131_v46 = vld [vmem:[#allocation22_spill] sm:$0xff]  ;;  %6748 = vmatprep.subr.bf16.mxu0 %v6747_v3  ;;  %v11136_v3 = vld [vmem:[#allocation17_spill] sm:$0xff] }
  0x89   : > { %v8361_v0 = vpack.c.bf16 %v11115_v61, %v11114_v2  ;;  %v8367_v18 = vpack.c.bf16 %v11117_v17, %v11116_v56  ;;  %v11121_v52 = vand.u32 4294901760, %v7912_v5  ;;  %v11122_v29 = vand.u32 4294901760, %v7921_v25  ;;  %v11129_v25 = vld [vmem:[#allocation50_spill] sm:$0xff]  ;;  %v11135_v61 = vld [vmem:[#allocation16_spill] sm:$0xff]  ;;  %v370_v56 = vld [vmem:[%s10580_s2 + $0x8] sm:$0xff] }
  0x8a   : > { %11118 = vst [vmem:[#allocation12_spill] sm:$0xff] %v8370_v23  ;;  %v8376_v51 = vpack.c.bf16 %v11120_v44, %v11119_v60  ;;  %v11123_v7 = vand.u32 4294901760, %v7943_v9  ;;  %v11124_v40 = vand.u32 4294901760, %v7945_v38  ;;  %v8392_v49 = vand.u32 4294901760, %v637_v28  ;;  %905 = vmatmul.mubr.f32.gmra.mrb[8].mxu1 %v11129_v25  ;;  %v11130_v9 = vld [vmem:[#allocation20_spill] sm:$0xff]  ;;  %v11132_v2 = vld [vmem:[#allocation14_spill] sm:$0xff]  ;;  %630 = vmatmul.mubr.f32.gmra.mrb[12].mxu0 %v8370_v23 }
  0x8b   : > { %v8382_v62 = vpack.c.bf16 %v11122_v29, %v11121_v52  ;;  %v11127_v53 = vand.u32 4294901760, %v7961_v34  ;;  %v11128_v5 = vand.u32 4294901760, %v7970_v10  ;;  %v6749_v38 = vpack.c.bf16 %v11131_v46, %v11130_v9  ;;  %6770 = vmatpush3.bf16.msra.mxu1 %v11132_v2  ;;  %910 = vmatprep.mubr.f32.mxu1 %v8181_v48  ;;  %v11134_v10 = vld [vmem:[#allocation15_spill] sm:$0xff]  ;;  %v385_v34 = vld [vmem:[%s10580_s2 + $0x80] sm:$0xff]  ;;  %v11137_v17 = vld [vmem:[#allocation25_spill] sm:$0xff] }
  0x8c   : > { %v8388_v41 = vpack.c.bf16 %v11124_v40, %v11123_v7  ;;  %11126 = vst [vmem:[#allocation13_spill] sm:$0xff] %v8392_v49  ;;  %v8406_v28 = vand.u32 4294901760, %v643_v4  ;;  %639 = vmatprep.mubr.f32.mxu0 %v8392_v49  ;;  %6772 = vmatprep.subr.bf16.mxu1 %v11134_v10  ;;  %v369_v4 = vld [vmem:[%s10580_s2] sm:$0xff]  ;;  %v1736_v60 = vand.u32 4294901760, %v385_v34  ;;  %v1739_v44 = vand.u32 4294901760, %v386_v59  ;;  %v11138_v52 = vld [vmem:[#allocation18_spill] sm:$0xff] }
  0x8d   : > { %v8398_v16 = vpack.c.bf16 %v11128_v5, %v11127_v53  ;;  %6750 = vmatpush3.bf16.msra.mxu0 %v6749_v38  ;;  %v1688_v29 = vand.u32 4294901760, %v369_v4  ;;  %v1691_v7 = vand.u32 4294901760, %v370_v56  ;;  %v387_v40 = vld [vmem:[%s10580_s2 + $0x90] sm:$0xff]  ;;  %v388_v53 = vld [vmem:[%s10580_s2 + $0x98] sm:$0xff]  ;;  %v11141_v38 = vld [vmem:[#allocation33_spill] sm:$0xff]  ;;  %v11156_v42 = vand.u32 4294901760, %v11130_v9 }
  0x8e   : > { %11133 = vst [vmem:[#allocation20_spill] sm:$0xff] %v8406_v28  ;;  %912 = vmatmul.mubr.f32.gmra.mrb[10].mxu1 %v8193_v14  ;;  %645 = vmatmul.mubr.f32.gmra.mrb[14].mxu0 %v8406_v28  ;;  %v11139_v5 = vld [vmem:[#allocation26_spill] sm:$0xff]  ;;  %v8443_v28 = vsub.f32 %v386_v59, %v1739_v44  ;;  %v1742_v49 = vand.u32 4294901760, %v387_v40  ;;  %v1745_v23 = vand.u32 4294901760, %v388_v53  ;;  %v11158_v48 = vld [vmem:[#allocation43_spill] sm:$0xff] }
  0x8f   : > { %6774 = vmatpush3.bf16.msra.mxu1 %v11135_v61  ;;  %917 = vmatprep.mubr.f32.mxu1 %v8216_v35  ;;  %v8451_v58 = vsub.f32 %v370_v56, %v1691_v7  ;;  %v11148_v59 = vld [vmem:[#allocation34_spill] sm:$0xff]  ;;  %v390_v56 = vld [vmem:[%s10580_s2 + $0xa8] sm:$0xff]  ;;  %v11154_v35 = vand.u32 4294901760, %v7993_v54  ;;  %v8497_v54 = vpack.c.bf16 %v1691_v7, %v1688_v29  ;;  %v11162_v7 = vld [vmem:[#allocation36_spill] sm:$0xff] }
  0x90   : > { %6776 = vmatprep.subr.bf16.mxu1 %v11136_v3  ;;  %1061 = vmatprep.mubr.f32.mxu0 %v11137_v17  ;;  %v8441_v17 = vsub.f32 %v385_v34, %v1736_v60  ;;  %11143 = vst [vmem:[#allocation14_spill] sm:$0xff] %v8443_v28  ;;  %v372_v34 = vld [vmem:[%s10580_s2 + $0x18] sm:$0xff]  ;;  %v8507_v9 = vpack.c.bf16 %v1745_v23, %v1742_v49 }
  0x91   : > { %6784 = vmatprep.subr.bf16.mxu0 %v6783_v24  ;;  %v11140_v24 = vld [vmem:[#allocation19_spill] sm:$0xff]  ;;  %11147 = vst [vmem:[#allocation16_spill] sm:$0xff] %v8451_v58 }
  0x92   : > { %919 = vmatmul.mubr.f32.gmra.mrb[12].mxu1 %v8238_v13  ;;  %1064 = vmatmul.mubr.f32.vlgmr.msra.gmra.mrb[16].mxu0 %v11139_v5  ;;  %11142 = vst [vmem:[#allocation22_spill] sm:$0xff] %v8441_v17  ;;  %v8449_v5 = vsub.f32 %v369_v4, %v1688_v29  ;;  %v389_v4 = vld [vmem:[%s10580_s2 + $0xa0] sm:$0xff]  ;;  %v11153_v13 = vld [vmem:[#allocation35_spill] sm:$0xff]  ;;  %11159 = vst [vmem:[#allocation17_spill] sm:$0xff] %v8507_v9 }
  0x93   : > { %6778 = vmatpush3.bf16.msra.mxu1 %v11138_v52  ;;  %924 = vmatprep.mubr.f32.mxu1 %v8261_v36  ;;  %v11152_v36 = vld [vmem:[#allocation9_spill] sm:$0xff]  ;;  %v391_v29 = vld [vmem:[%s10580_s2 + $0xb0] sm:$0xff] }
  0x94   : > { %6780 = vmatprep.subr.bf16.mxu1 %v11140_v24  ;;  %6786 = vmatpush3.bf16.msra.mxu0 %v8299_v27  ;;  %11146 = vst [vmem:[#allocation15_spill] sm:$0xff] %v8449_v5  ;;  %v371_v27 = vld [vmem:[%s10580_s2 + $0x10] sm:$0xff] }
  0x95   : > { %1070 = vmatprep.mubr.f32.mxu0 %v11141_v38  ;;  %6788 = vmatprep.subr.bf16.mxu0 %v8313_v15  ;;  %v11149_v15 = vld [vmem:[#allocation8_spill] sm:$0xff]  ;;  %v11150_v38 = vld [vmem:[#allocation38_spill] sm:$0xff] }
  0x96   : > { %926 = vmatmul.mubr.f32.gmra.mrb[14].mxu1 %v8271_v19  ;;  %1073 = vmatmul.mubr.f32.gmra.mrb[18].mxu0 %v11148_v59  ;;  %v11151_v19 = vld [vmem:[#allocation28_spill] sm:$0xff]  ;;  %v1697_v59 = vand.u32 4294901760, %v372_v34 }
  0x97   : > { %6782 = vmatpush3.bf16.msra.mxu1 %v11144_v30  ;;  %1231 = vmatprep.mubr.f32.mxu1 %v11145_v6  ;;  %v11155_v6 = vand.u32 4294901760, %v7995_v37  ;;  %v1748_v37 = vand.u32 4294901760, %v389_v4 }
  0x98   : > { %6816 = vmatprep.subr.bf16.mxu1 %v11149_v15  ;;  %6790 = vmatpush3.bf16.msra.mxu0 %v8324_v12  ;;  %v8473_v15 = vsub.f32 %v387_v40, %v1742_v49  ;;  %v8475_v12 = vsub.f32 %v388_v53, %v1745_v23  ;;  %v8522_v23 = vsub.f32 %v372_v34, %v1697_v59  ;;  %v392_v49 = vld [vmem:[%s10580_s2 + $0xb8] sm:$0xff]  ;;  %v11166_v34 = vand.u32 4294901760, %v8451_v58 }
  0x99   : > { %1079 = vmatprep.mubr.f32.mxu0 %v11150_v38  ;;  %6792 = vmatprep.subr.bf16.mxu0 %v8330_v26  ;;  %v1694_v38 = vand.u32 4294901760, %v371_v27  ;;  %v8483_v14 = vpack.c.bf16 %v11155_v6, %v11154_v35  ;;  %v11157_v26 = vand.u32 4294901760, %v11131_v46  ;;  %v1751_v35 = vand.u32 4294901760, %v390_v56  ;;  %v373_v6 = vld [vmem:[%s10580_s2 + $0x20] sm:$0xff] }
  0x9a   : > { %1235 = vmatmul.mubr.f32.vlgmr.msra.gmra.mrb[16].mxu1 %v11151_v19  ;;  %1082 = vmatmul.mubr.f32.gmra.mrb[20].mxu0 %v11158_v48  ;;  %v11164_v19 = vld [vmem:[#allocation42_spill] sm:$0xff]  ;;  %v1700_v53 = vand.u32 4294901760, %v373_v6  ;;  %v11168_v48 = vld [vmem:[#allocation11_spill] sm:$0xff] }
  0x9b   : > { %6818 = vmatpush3.bf16.msra.mxu1 %v11152_v36  ;;  %1242 = vmatprep.mubr.f32.mxu1 %v11153_v13  ;;  %v8489_v40 = vpack.c.bf16 %v11157_v26, %v11156_v42  ;;  %v8495_v36 = vpack.c.bf16 %v1739_v44, %v1736_v60  ;;  %v374_v42 = vld [vmem:[%s10580_s2 + $0x28] sm:$0xff]  ;;  %v11161_v60 = vand.u32 4294901760, %v8443_v28  ;;  %v1915_v13 = vsub.f32 %v8451_v58, %v11166_v34  ;;  %v11172_v58 = vld [vmem:[#allocation46_spill] sm:$0xff] }
  0x9c   : > { %6820 = vmatprep.subr.bf16.mxu1 %v7732_v22  ;;  %6794 = vmatpush3.bf16.msra.mxu0 %v8336_v32  ;;  %v11160_v22 = vand.u32 4294901760, %v8441_v17  ;;  %v8520_v32 = vsub.f32 %v371_v27, %v1694_v38  ;;  %v8539_v26 = vpack.c.bf16 %v1697_v59, %v1694_v38  ;;  %v1757_v34 = vand.u32 4294901760, %v392_v49 }
  0x9d   : > { %1088 = vmatprep.mubr.f32.mxu0 %v8152_v8  ;;  %v2027_v44 = vsub.f32 %v8443_v28, %v11161_v60  ;;  %6796 = vmatprep.subr.bf16.mxu0 %v8345_v33  ;;  %v11163_v60 = vld [vmem:[#allocation10_spill] sm:$0xff]  ;;  %v11165_v33 = vand.u32 4294901760, %v8449_v5  ;;  %v11167_v8 = vld [vmem:[#allocation49_spill] sm:$0xff]  ;;  %v11171_v28 = vld [vmem:[#allocation52_spill] sm:$0xff]  ;;  %v11174_v59 = vand.u32 4294901760, %v8475_v12 }
  0x9e   : > { %v2020_v46 = vsub.f32 %v8441_v17, %v11160_v22  ;;  %1246 = vmatmul.mubr.f32.gmra.mrb[18].mxu1 %v11162_v7  ;;  %v1703_v7 = vand.u32 4294901760, %v374_v42  ;;  %1091 = vmatmul.mubr.f32.gmra.mrb[22].mxu0 %v11167_v8  ;;  %v8541_v22 = vsub.f32 %v389_v4, %v1748_v37 }
  0x9f   : > { %6822 = vmatpush3.bf16.msra.mxu1 %v11163_v60  ;;  %1253 = vmatprep.mubr.f32.mxu1 %v11164_v19  ;;  %v1908_v27 = vsub.f32 %v8449_v5, %v11165_v33  ;;  %v8543_v60 = vsub.f32 %v390_v56, %v1751_v35  ;;  %v1754_v19 = vand.u32 4294901760, %v391_v29  ;;  %v8547_v33 = vpack.c.bf16 %v1751_v35, %v1748_v37  ;;  %v376_v56 = vld [vmem:[%s10580_s2 + $0x38] sm:$0xff]  ;;  %v11175_v35 = vld [vmem:[#allocation53_spill] sm:$0xff] }
  0xa0   : > { %6824 = vmatprep.subr.bf16.mxu1 %v11168_v48  ;;  %11169 = vst [vmem:[#allocation18_spill] sm:$0xff] %v8541_v22  ;;  %6798 = vmatpush3.bf16.msra.mxu0 %v8351_v39  ;;  %v2021_v5 = vand.u32 4294901760, %v2020_v46  ;;  %v2028_v17 = vand.u32 4294901760, %v2027_v44  ;;  %v11173_v48 = vand.u32 4294901760, %v8473_v15  ;;  %v2041_v4 = vsub.f32 %v8475_v12, %v11174_v59  ;;  %v375_v39 = vld [vmem:[%s10580_s2 + $0x30] sm:$0xff] }
  0xa1   : > { %11170 = vst [vmem:[#allocation19_spill] sm:$0xff] %v8543_v60  ;;  %1097 = vmatprep.mubr.f32.mxu0 %v11171_v28  ;;  %6800 = vmatprep.subr.bf16.mxu0 %v8361_v0  ;;  %v8567_v46 = vpack.c.bf16 %v1703_v7, %v1700_v53  ;;  %v8569_v44 = vsub.f32 %v373_v6, %v1700_v53  ;;  %v1916_v59 = vand.u32 4294901760, %v1915_v13  ;;  %v394_v0 = vld [vmem:[%s10580_s2 + $0xc8] sm:$0xff]  ;;  %v11181_v53 = vand.u32 4294901760, %v8520_v32 }
  0xa2   : > { %1257 = vmatmul.mubr.f32.gmra.mrb[20].mxu1 %v11172_v58  ;;  %v2034_v38 = vsub.f32 %v8473_v15, %v11173_v48  ;;  %v1909_v48 = vand.u32 4294901760, %v1908_v27  ;;  %v11177_v58 = vld [vmem:[#allocation55_spill] sm:$0xff]  ;;  %v8573_v28 = vsub.f32 %v374_v42, %v1703_v7  ;;  %v8575_v8 = vsub.f32 %v391_v29, %v1754_v19  ;;  %v11178_v6 = vld [vmem:[#allocation61_spill] sm:$0xff]  ;;  %v11180_v27 = vld [vmem:[#allocation54_spill] sm:$0xff] }
  0xa3   : > { %6826 = vmatpush3.bf16.msra.mxu1 %v7773_v45  ;;  %1264 = vmatprep.mubr.f32.mxu1 %v11175_v35  ;;  %11176 = vst [vmem:[#allocation21_spill] sm:$0xff] %v8567_v46  ;;  %v393_v45 = vld [vmem:[%s10580_s2 + $0xc0] sm:$0xff]  ;;  %v8589_v42 = vpack.c.bf16 %v1757_v34, %v1754_v19  ;;  %v1706_v29 = vand.u32 4294901760, %v375_v39  ;;  %v1709_v7 = vand.u32 4294901760, %v376_v56  ;;  %v2042_v35 = vand.u32 4294901760, %v2041_v4  ;;  %v11183_v19 = vld [vmem:[#allocation58_spill] sm:$0xff] }
  0xa4   : > { %1100 = vmatmul.mubr.f32.gmra.mrb[24].mxu0 %v11177_v58  ;;  %6828 = vmatprep.subr.bf16.mxu1 %v7803_v63  ;;  %v8587_v63 = vpack.c.bf16 %v2028_v17, %v2021_v5  ;;  %v2035_v37 = vand.u32 4294901760, %v2034_v38  ;;  %v1922_v13 = vsub.f32 %v8520_v32, %v11181_v53  ;;  %v8601_v17 = vpack.c.bf16 %v1916_v59, %v1909_v48  ;;  %v377_v38 = vld [vmem:[%s10580_s2 + $0x40] sm:$0xff]  ;;  %v11184_v4 = vld [vmem:[#allocation62_spill] sm:$0xff] }
  0xa5   : > { %6802 = vmatpush3.bf16.msra.mxu0 %v8367_v18  ;;  %1106 = vmatprep.mubr.f32.mxu0 %v11178_v6  ;;  %11179 = vst [vmem:[#allocation8_spill] sm:$0xff] %v8589_v42  ;;  %v11182_v18 = vand.u32 4294901760, %v8522_v23  ;;  %v8603_v5 = vsub.f32 %v392_v49, %v1757_v34  ;;  %v11185_v53 = vand.u32 4294901760, %v8541_v22  ;;  %v378_v49 = vld [vmem:[%s10580_s2 + $0x48] sm:$0xff]  ;;  %v11189_v58 = vld [vmem:[#allocation60_spill] sm:$0xff] }
  0xa6   : > { %1268 = vmatmul.mubr.f32.gmra.mrb[22].mxu1 %v11180_v27  ;;  %6804 = vmatprep.subr.bf16.mxu0 %v8376_v51  ;;  %v1760_v27 = vand.u32 4294901760, %v393_v45  ;;  %v1763_v51 = vand.u32 4294901760, %v394_v0 }
  0xa7   : > { %v1929_v6 = vsub.f32 %v8522_v23, %v11182_v18  ;;  %6830 = vmatpush3.bf16.msra.mxu1 %v11113_v47  ;;  %1275 = vmatprep.mubr.f32.mxu1 %v11183_v19  ;;  %v2048_v47 = vsub.f32 %v8541_v22, %v11185_v53  ;;  %v11186_v18 = vand.u32 4294901760, %v8543_v60  ;;  %v11187_v19 = vld [vmem:[#allocation69_spill] sm:$0xff]  ;;  %v8627_v53 = vsub.f32 %v376_v56, %v1709_v7 }
  0xa8   : > { %1109 = vmatmul.mubr.f32.gmra.mrb[26].mxu0 %v11184_v4  ;;  %6832 = vmatprep.subr.bf16.mxu1 %v11125_v50  ;;  %v8623_v50 = vpack.c.bf16 %v1709_v7, %v1706_v29  ;;  %v8625_v4 = vsub.f32 %v375_v39, %v1706_v29  ;;  %v1712_v22 = vand.u32 4294901760, %v377_v38  ;;  %v8635_v59 = vpack.c.bf16 %v1763_v51, %v1760_v27  ;;  %v395_v39 = vld [vmem:[%s10580_s2 + $0xd0] sm:$0xff] }
  0xa9   : > { %v2055_v48 = vsub.f32 %v8543_v60, %v11186_v18  ;;  %6806 = vmatpush3.bf16.msra.mxu0 %v8382_v62  ;;  %1115 = vmatprep.mubr.f32.mxu0 %v11187_v19  ;;  %v8631_v18 = vpack.c.bf16 %v2042_v35, %v2035_v37  ;;  %v1923_v60 = vand.u32 4294901760, %v1922_v13  ;;  %v1930_v34 = vand.u32 4294901760, %v1929_v6  ;;  %v11190_v62 = vld [vmem:[#allocation66_spill] sm:$0xff] }
  0xaa   : > { %11188 = vst [vmem:[#allocation9_spill] sm:$0xff] %v8623_v50  ;;  %1279 = vmatmul.mubr.f32.gmra.mrb[24].mxu1 %v11189_v58  ;;  %6808 = vmatprep.subr.bf16.mxu0 %v8388_v41  ;;  %11191 = vst [vmem:[#allocation10_spill] sm:$0xff] %v8635_v59  ;;  %v1715_v19 = vand.u32 4294901760, %v378_v49  ;;  %v396_v41 = vld [vmem:[%s10580_s2 + $0xd8] sm:$0xff]  ;;  %v11192_v13 = vand.u32 4294901760, %v8569_v44  ;;  %v11193_v29 = vand.u32 4294901760, %v8573_v28  ;;  %v8655_v56 = vsub.f32 %v393_v45, %v1760_v27 }
  0xab   : > { %6834 = vmatpush3.bf16.msra.mxu1 %v11132_v2  ;;  %1286 = vmatprep.mubr.f32.mxu1 %v11190_v62  ;;  %v2049_v2 = vand.u32 4294901760, %v2048_v47  ;;  %v2056_v35 = vand.u32 4294901760, %v2055_v48  ;;  %v8657_v37 = vsub.f32 %v394_v0, %v1763_v51  ;;  %v11196_v48 = vld [vmem:[#allocation68_spill] sm:$0xff]  ;;  %v8665_v62 = vsub.f32 %v377_v38, %v1712_v22  ;;  %v379_v45 = vld [vmem:[%s10580_s2 + $0x50] sm:$0xff]  ;;  %v380_v0 = vld [vmem:[%s10580_s2 + $0x58] sm:$0xff] }
  0xac   : > { %1118 = vmatmul.mubr.f32.gmra.mrb[28].mxu0 %v8259_v11  ;;  %6836 = vmatprep.subr.bf16.mxu1 %v11134_v10  ;;  %v1936_v6 = vsub.f32 %v8569_v44, %v11192_v13  ;;  %v1943_v7 = vsub.f32 %v8573_v28, %v11193_v29  ;;  %11194 = vst [vmem:[#allocation11_spill] sm:$0xff] %v8655_v56  ;;  %v1766_v29 = vand.u32 4294901760, %v395_v39  ;;  %v11198_v27 = vld [vmem:[#allocation72_spill] sm:$0xff]  ;;  %v11201_v38 = vand.u32 4294901760, %v8603_v5  ;;  %v11210_v58 = vld [vmem:[#allocation29_spill] sm:$0xff] }
  0xad   : > { %6810 = vmatpush3.bf16.msra.mxu0 %v8398_v16  ;;  %1124 = vmatprep.mubr.f32.mxu0 %v8280_v20  ;;  %11195 = vst [vmem:[#allocation84_spill] sm:$0xff] %v8657_v37  ;;  %v8663_v13 = vpack.c.bf16 %v1930_v34, %v1923_v60  ;;  %11197 = vst [vmem:[#allocation85_spill] sm:$0xff] %v8665_v62  ;;  %v1769_v16 = vand.u32 4294901760, %v396_v41  ;;  %v8675_v51 = vpack.c.bf16 %v1715_v19, %v1712_v22  ;;  %v397_v22 = vld [vmem:[%s10580_s2 + $0xe0] sm:$0xff] }
  0xae   : > { %1290 = vmatmul.mubr.f32.gmra.mrb[26].mxu1 %v11196_v48  ;;  %6812 = vmatprep.subr.bf16.mxu0 %v8483_v14  ;;  %v11200_v14 = vand.u32 4294901760, %v8575_v8  ;;  %v2069_v34 = vsub.f32 %v8603_v5, %v11201_v38  ;;  %v8685_v47 = vpack.c.bf16 %v2056_v35, %v2049_v2  ;;  %v8687_v10 = vsub.f32 %v378_v49, %v1715_v19  ;;  %v11203_v38 = vld [vmem:[#allocation23_spill] sm:$0xff]  ;;  %v11208_v11 = vld [vmem:[#allocation24_spill] sm:$0xff] }
  0xaf   : > { %6838 = vmatpush3.bf16.msra.mxu1 %v11135_v61  ;;  %1297 = vmatprep.mubr.f32.mxu1 %v11198_v27  ;;  %11199 = vst [vmem:[#allocation86_spill] sm:$0xff] %v8675_v51  ;;  %v1937_v61 = vand.u32 4294901760, %v1936_v6  ;;  %v1944_v27 = vand.u32 4294901760, %v1943_v7  ;;  %v1718_v48 = vand.u32 4294901760, %v379_v45  ;;  %v11204_v2 = vand.u32 4294901760, %v8625_v4 }
  0xb0   : > { %v2062_v60 = vsub.f32 %v8575_v8, %v11200_v14  ;;  %1127 = vmatmul.mubr.f32.gmra.mrb[30].mxu0 %v8289_v1  ;;  %6840 = vmatprep.subr.bf16.mxu1 %v11136_v3  ;;  %11202 = vst [vmem:[#allocation87_spill] sm:$0xff] %v8687_v10  ;;  %v398_v14 = vld [vmem:[%s10580_s2 + $0xe8] sm:$0xff]  ;;  %v1721_v3 = vand.u32 4294901760, %v380_v0  ;;  %v11205_v49 = vand.u32 4294901760, %v8627_v53  ;;  %v8705_v6 = vpack.c.bf16 %v1769_v16, %v1766_v29 }
  0xb1   : > { %6814 = vmatpush3.bf16.msra.mxu0 %v8489_v40  ;;  %1478 = vmatprep.mubr.f32.mxu0 %v11203_v38  ;;  %v1950_v19 = vsub.f32 %v8625_v4, %v11204_v2  ;;  %v8707_v7 = vsub.f32 %v395_v39, %v1766_v29  ;;  %v10757_v40 = vand.u32 4294901760, %v8655_v56  ;;  %v2070_v1 = vand.u32 4294901760, %v2069_v34  ;;  %v381_v29 = vld [vmem:[%s10580_s2 + $0x60] sm:$0xff] }
  0xb2   : > { %v1957_v35 = vsub.f32 %v8627_v53, %v11205_v49  ;;  %1301 = vmatmul.mubr.f32.gmra.mrb[28].mxu1 %v8277_v55  ;;  %6848 = vmatprep.subr.bf16.mxu0 %v8495_v36  ;;  %11206 = vst [vmem:[#allocation88_spill] sm:$0xff] %v8705_v6  ;;  %v2063_v2 = vand.u32 4294901760, %v2062_v60  ;;  %v1772_v20 = vand.u32 4294901760, %v397_v22  ;;  %v1775_v49 = vand.u32 4294901760, %v398_v14 }
  0xb3   : > { %11207 = vst [vmem:[#allocation89_spill] sm:$0xff] %v8707_v7  ;;  %6842 = vmatpush3.bf16.msra.mxu1 %v11138_v52  ;;  %1308 = vmatprep.mubr.f32.mxu1 %v8307_v43  ;;  %v8715_v55 = vpack.c.bf16 %v1944_v27, %v1937_v61  ;;  %v8717_v39 = vsub.f32 %v396_v41, %v1769_v16  ;;  %v382_v52 = vld [vmem:[%s10580_s2 + $0x68] sm:$0xff]  ;;  %v1951_v16 = vand.u32 4294901760, %v1950_v19  ;;  %v11212_v60 = vand.u32 4294901760, %v8657_v37 }
  0xb4   : > { %1480 = vmatmul.mubr.f32.vlgmr.msra.gmra.mrb[32].mxu0 %v11208_v11  ;;  %6844 = vmatprep.subr.bf16.mxu1 %v11140_v24  ;;  %v8729_v24 = vpack.c.bf16 %v1721_v3, %v1718_v48  ;;  %v8731_v41 = vsub.f32 %v379_v45, %v1718_v48  ;;  %v1958_v27 = vand.u32 4294901760, %v1957_v35  ;;  %v8735_v61 = vsub.f32 %v380_v0, %v1721_v3  ;;  %v399_v0 = vld [vmem:[%s10580_s2 + $0xf0] sm:$0xff]  ;;  %v400_v3 = vld [vmem:[%s10580_s2 + $0xf8] sm:$0xff] }
  0xb5   : > { %11209 = vst [vmem:[#allocation90_spill] sm:$0xff] %v8717_v39  ;;  %6850 = vmatpush3.bf16.msra.mxu0 %v8497_v54  ;;  %1485 = vmatprep.mubr.f32.mxu0 %v11210_v58  ;;  %v2076_v34 = vsub.f32 %v8655_v56, %v10757_v40  ;;  %v2083_v43 = vsub.f32 %v8657_v37, %v11212_v60  ;;  %v1724_v19 = vand.u32 4294901760, %v381_v29  ;;  %v1727_v35 = vand.u32 4294901760, %v382_v52  ;;  %v11217_v37 = vld [vmem:[#allocation37_spill] sm:$0xff] }
  0xb6   : > { %11211 = vst [vmem:[#allocation91_spill] sm:$0xff] %v8729_v24  ;;  %1312 = vmatmul.mubr.f32.gmra.mrb[30].mxu1 %v8318_v21  ;;  %6852 = vmatprep.subr.bf16.mxu0 %v8507_v9  ;;  %v8745_v48 = vpack.c.bf16 %v2070_v1, %v2063_v2  ;;  %v8747_v45 = vpack.c.bf16 %v1775_v49, %v1772_v20  ;;  %v11215_v1 = vand.u32 4294901760, %v8665_v62  ;;  %v11216_v60 = vand.u32 4294901760, %v8687_v10 }
  0xb7   : > { %6846 = vmatpush3.bf16.msra.mxu1 %v11144_v30  ;;  %1631 = vmatprep.mubr.f32.mxu1 %v11203_v38  ;;  %v11214_v30 = vld [vmem:[#allocation30_spill] sm:$0xff]  ;;  %v8774_v56 = vpack.c.bf16 %v1958_v27, %v1951_v16  ;;  %v8778_v9 = vsub.f32 %v398_v14, %v1775_v49  ;;  %v2084_v38 = vand.u32 4294901760, %v2083_v43  ;;  %v1778_v21 = vand.u32 4294901760, %v399_v0  ;;  %v337_v16 = vld [vmem:[%s8760_s21] sm:$0xff]  ;;  %v11220_v27 = vld [vmem:[#allocation39_spill] sm:$0xff] }
  0xb8   : > { %11213 = vst [vmem:[#allocation92_spill] sm:$0xff] %v8747_v45  ;;  %1487 = vmatmul.mubr.f32.gmra.mrb[34].mxu0 %v11214_v30  ;;  %6880 = vmatprep.subr.bf16.mxu1 %v8587_v63  ;;  %v1964_v2 = vsub.f32 %v8665_v62, %v11215_v1  ;;  %v1971_v40 = vsub.f32 %v8687_v10, %v11216_v60  ;;  %v8783_v1 = vld [vmem:[%s10580_s2 + $0x70] sm:$0xff]  ;;  %v2077_v60 = vand.u32 4294901760, %v2076_v34  ;;  %v1781_v10 = vand.u32 4294901760, %v400_v3  ;;  %v338_v62 = vld [vmem:[%s8760_s21 + $0x8] sm:$0xff]  ;;  %v11223_v49 = vld [vmem:[#allocation44_spill] sm:$0xff] }
  0xb9   : > { %6854 = vmatpush3.bf16.msra.mxu0 %v8539_v26  ;;  %1492 = vmatprep.mubr.f32.mxu0 %v11217_v37  ;;  %v8776_v63 = vsub.f32 %v397_v22, %v1772_v20  ;;  %v8791_v20 = vpack.c.bf16 %v1727_v35, %v1724_v19  ;;  %v8793_v22 = vsub.f32 %v381_v29, %v1724_v19  ;;  %v384_v19 = vld [vmem:[%s10580_s2 + $0x78] sm:$0xff]  ;;  %v8815_v14 = vand.u32 4294901760, %v337_v16 }
  0xba   : > { %1633 = vmatmul.mubr.f32.vlgmr.msra.gmra.mrb[32].mxu1 %v11208_v11  ;;  %6856 = vmatprep.subr.bf16.mxu0 %v8547_v33  ;;  %v1965_v43 = vand.u32 4294901760, %v1964_v2  ;;  %v1972_v34 = vand.u32 4294901760, %v1971_v40  ;;  %v11221_v11 = vand.u32 4294901760, %v8707_v7  ;;  %v1730_v40 = vand.u32 4294901760, %v8783_v1 }
  0xbb   : > { %6882 = vmatpush3.bf16.msra.mxu1 %v8601_v17  ;;  %1638 = vmatprep.mubr.f32.mxu1 %v11210_v58  ;;  %11218 = vst [vmem:[#allocation93_spill] sm:$0xff] %v8791_v20  ;;  %11219 = vst [vmem:[#allocation94_spill] sm:$0xff] %v8793_v22  ;;  %v11222_v58 = vand.u32 4294901760, %v8717_v39  ;;  %v8813_v2 = vand.u32 4294901760, %v338_v62 }
  0xbc   : > { %1494 = vmatmul.mubr.f32.gmra.mrb[36].mxu0 %v11220_v27  ;;  %6884 = vmatprep.subr.bf16.mxu1 %v8631_v18  ;;  %v2090_v17 = vsub.f32 %v8707_v7, %v11221_v11  ;;  %v8810_v18 = vsub.f32 %v382_v52, %v1727_v35  ;;  %11226 = vst [vmem:[#allocation97_spill] sm:$0xff] %v8815_v14  ;;  %v340_v52 = vld [vmem:[%s8760_s21 + $0x18] sm:$0xff]  ;;  %v1733_v7 = vand.u32 4294901760, %v384_v19 }
  0xbd   : > { %v2097_v29 = vsub.f32 %v8717_v39, %v11222_v58  ;;  %6858 = vmatpush3.bf16.msra.mxu0 %v8567_v46  ;;  %1499 = vmatprep.mubr.f32.mxu0 %v11223_v49  ;;  %11225 = vst [vmem:[#allocation96_spill] sm:$0xff] %v8813_v2  ;;  %v8819_v58 = vpack.c.bf16 %v2084_v38, %v2077_v60  ;;  %v11230_v60 = vand.u32 4294901760, %v8735_v61 }
  0xbe   : > { %11224 = vst [vmem:[#allocation95_spill] sm:$0xff] %v8810_v18  ;;  %1640 = vmatmul.mubr.f32.gmra.mrb[34].mxu1 %v11214_v30  ;;  %6860 = vmatprep.subr.bf16.mxu0 %v8589_v42  ;;  %v8821_v11 = vpack.c.bf16 %v1781_v10, %v1778_v21  ;;  %v8828_v35 = vsub.f32 %v399_v0, %v1778_v21  ;;  %v11229_v30 = vand.u32 4294901760, %v8731_v41  ;;  %v2091_v21 = vand.u32 4294901760, %v2090_v17  ;;  %v342_v17 = vld [vmem:[%s8760_s21 + $0x28] sm:$0xff] }
  0xbf   : > { %6886 = vmatpush3.bf16.msra.mxu1 %v8663_v13  ;;  %1645 = vmatprep.mubr.f32.mxu1 %v11217_v37  ;;  %v1985_v42 = vsub.f32 %v8735_v61, %v11230_v60  ;;  %v8838_v39 = vpack.c.bf16 %v1972_v34, %v1965_v43  ;;  %v8840_v13 = vsub.f32 %v400_v3, %v1781_v10  ;;  %v2098_v0 = vand.u32 4294901760, %v2097_v29  ;;  %v339_v10 = vld [vmem:[%s8760_s21 + $0x10] sm:$0xff] }
  0xc0   : > { %11227 = vst [vmem:[#allocation98_spill] sm:$0xff] %v8821_v11  ;;  %11228 = vst [vmem:[#allocation99_spill] sm:$0xff] %v8828_v35  ;;  %v1978_v38 = vsub.f32 %v8731_v41, %v11229_v30  ;;  %1501 = vmatmul.mubr.f32.gmra.mrb[38].mxu0 %v8140_v31  ;;  %6888 = vmatprep.subr.bf16.mxu1 %v8685_v47  ;;  %v8845_v30 = vsub.f32 %v8783_v1, %v1730_v40  ;;  %v8853_v47 = vand.u32 4294901760, %v340_v52 }
  0xc1   : > { %11231 = vst [vmem:[#allocation100_spill] sm:$0xff] %v8840_v13  ;;  %6862 = vmatpush3.bf16.msra.mxu0 %v8623_v50  ;;  %1506 = vmatprep.mubr.f32.mxu0 %v8148_v57  ;;  %v8848_v60 = vsub.f32 %v338_v62, %v8813_v2  ;;  %v8851_v46 = vsub.f32 %v337_v16, %v8815_v14  ;;  %v11236_v3 = vand.u32 4294901760, %v8776_v63  ;;  %v11237_v1 = vand.u32 4294901760, %v8778_v9  ;;  %v341_v62 = vld [vmem:[%s8760_s21 + $0x20] sm:$0xff]  ;;  %v344_v16 = vld [vmem:[%s8760_s21 + $0x38] sm:$0xff] }
  0xc2   : > { %11232 = vst [vmem:[#allocation101_spill] sm:$0xff] %v8845_v30  ;;  %11235 = vst [vmem:[#allocation104_spill] sm:$0xff] %v8853_v47  ;;  %1647 = vmatmul.mubr.f32.gmra.mrb[36].mxu1 %v11220_v27  ;;  %6864 = vmatprep.subr.bf16.mxu0 %v8635_v59  ;;  %v8869_v29 = vpack.c.bf16 %v1733_v7, %v1730_v40  ;;  %v8871_v27 = vsub.f32 %v384_v19, %v1733_v7  ;;  %v1979_v37 = vand.u32 4294901760, %v1978_v38  ;;  %v11240_v40 = vld [vmem:[#allocation56_spill] sm:$0xff]  ;;  %v348_v50 = vld [vmem:[%s8760_s21 + $0x58] sm:$0xff] }
  0xc3   : > { %11233 = vst [vmem:[#allocation102_spill] sm:$0xff] %v8848_v60  ;;  %11234 = vst [vmem:[#allocation103_spill] sm:$0xff] %v8851_v46  ;;  %v2104_v43 = vsub.f32 %v8776_v63, %v11236_v3  ;;  %v2111_v34 = vsub.f32 %v8778_v9, %v11237_v1  ;;  %6890 = vmatpush3.bf16.msra.mxu1 %v8715_v55  ;;  %1652 = vmatprep.mubr.f32.mxu1 %v11223_v49  ;;  %v1986_v3 = vand.u32 4294901760, %v1985_v42  ;;  %v11246_v49 = vld [vmem:[#allocation59_spill] sm:$0xff] }
  0xc4   : > { %11238 = vst [vmem:[#allocation105_spill] sm:$0xff] %v8871_v27  ;;  %1508 = vmatmul.mubr.f32.gmra.mrb[40].mxu0 %v11129_v25  ;;  %6892 = vmatprep.subr.bf16.mxu1 %v8745_v48  ;;  %v6899_v1 = vpack.c.bf16 %v2098_v0, %v2091_v21  ;;  %v8875_v59 = vand.u32 4294901760, %v339_v10  ;;  %v8885_v19 = vsub.f32 %v340_v52, %v8853_v47  ;;  %v8887_v48 = vand.u32 4294901760, %v342_v17 }
  0xc5   : > { %6866 = vmatpush3.bf16.msra.mxu0 %v8675_v51  ;;  %1513 = vmatprep.mubr.f32.mxu0 %v11240_v40  ;;  %v2105_v38 = vand.u32 4294901760, %v2104_v43  ;;  %v2112_v21 = vand.u32 4294901760, %v2111_v34  ;;  %v11243_v0 = vand.u32 4294901760, %v8793_v22  ;;  %v11244_v7 = vand.u32 4294901760, %v8810_v18  ;;  %v11249_v43 = vld [vmem:[#allocation63_spill] sm:$0xff] }
  0xc6   : > { %11239 = vst [vmem:[#allocation106_spill] sm:$0xff] %v8875_v59  ;;  %11241 = vst [vmem:[#allocation107_spill] sm:$0xff] %v8885_v19  ;;  %1654 = vmatmul.mubr.f32.gmra.mrb[38].mxu1 %v8140_v31  ;;  %6868 = vmatprep.subr.bf16.mxu0 %v8705_v6  ;;  %v6901_v52 = vpack.c.bf16 %v1986_v3, %v1979_v37  ;;  %v8902_v34 = vand.u32 4294901760, %v341_v62  ;;  %v11248_v37 = vand.u32 4294901760, %v8840_v13  ;;  %v343_v31 = vld [vmem:[%s8760_s21 + $0x30] sm:$0xff]  ;;  %v8925_v51 = vand.u32 4294901760, %v344_v16 }
  0xc7   : > { %11242 = vst [vmem:[#allocation108_spill] sm:$0xff] %v8887_v48  ;;  %v1992_v55 = vsub.f32 %v8793_v22, %v11243_v0  ;;  %v1999_v42 = vsub.f32 %v8810_v18, %v11244_v7  ;;  %6894 = vmatpush3.bf16.msra.mxu1 %v8774_v56  ;;  %1659 = vmatprep.mubr.f32.mxu1 %v8148_v57  ;;  %v11247_v7 = vand.u32 4294901760, %v8828_v35  ;;  %v11250_v57 = vand.u32 4294901760, %v8848_v60 }
  0xc8   : > { %11245 = vst [vmem:[#allocation109_spill] sm:$0xff] %v8902_v34  ;;  %1515 = vmatmul.mubr.f32.gmra.mrb[42].mxu0 %v11246_v49  ;;  %6896 = vmatprep.subr.bf16.mxu1 %v8819_v58  ;;  %v8907_v0 = vsub.f32 %v339_v10, %v8875_v59  ;;  %v2125_v3 = vsub.f32 %v8840_v13, %v11248_v37  ;;  %11251 = vst [vmem:[#allocation110_spill] sm:$0xff] %v8925_v51  ;;  %v11252_v37 = vand.u32 4294901760, %v8851_v46 }
  0xc9   : > { %v2118_v56 = vsub.f32 %v8828_v35, %v11247_v7  ;;  %6870 = vmatpush3.bf16.msra.mxu0 %v8729_v24  ;;  %1520 = vmatprep.mubr.f32.mxu0 %v11249_v43  ;;  %v1786_v58 = vsub.f32 %v8848_v60, %v11250_v57  ;;  %v8923_v6 = vsub.f32 %v342_v17, %v8887_v48  ;;  %v346_v7 = vld [vmem:[%s8760_s21 + $0x48] sm:$0xff]  ;;  %v1993_v35 = vand.u32 4294901760, %v1992_v55  ;;  %v11256_v55 = vld [vmem:[#allocation70_spill] sm:$0xff] }
  0xca   : > { %1661 = vmatmul.mubr.f32.gmra.mrb[40].mxu1 %v11129_v25  ;;  %6872 = vmatprep.subr.bf16.mxu0 %v8747_v45  ;;  %v1792_v24 = vsub.f32 %v8851_v46, %v11252_v37  ;;  %v6903_v13 = vpack.c.bf16 %v2112_v21, %v2105_v38  ;;  %v2000_v18 = vand.u32 4294901760, %v1999_v42  ;;  %v11253_v57 = vand.u32 4294901760, %v8845_v30 }
  0xcb   : > { %6898 = vmatpush3.bf16.msra.mxu1 %v8838_v39  ;;  %1666 = vmatprep.mubr.f32.mxu1 %v11240_v40  ;;  %v11254_v10 = vand.u32 4294901760, %v8871_v27  ;;  %v8942_v60 = vsub.f32 %v341_v62, %v8902_v34  ;;  %v8944_v37 = vand.u32 4294901760, %v343_v31  ;;  %v2119_v42 = vand.u32 4294901760, %v2118_v56  ;;  %v345_v39 = vld [vmem:[%s8760_s21 + $0x40] sm:$0xff] }
  0xcc   : > { %v2006_v17 = vsub.f32 %v8845_v30, %v11253_v57  ;;  %1522 = vmatmul.mubr.f32.gmra.mrb[44].mxu0 %v11256_v55  ;;  %6900 = vmatprep.subr.bf16.mxu1 %v6899_v1  ;;  %v2126_v38 = vand.u32 4294901760, %v2125_v3  ;;  %v8948_v21 = vand.u32 4294901760, %v346_v7  ;;  %v11258_v57 = vld [vmem:[#allocation74_spill] sm:$0xff]  ;;  %v11259_v62 = vand.u32 4294901760, %v8885_v19  ;;  %v11264_v30 = vld [vmem:[#allocation16_spill] sm:$0xff] }
  0xcd   : > { %v2013_v25 = vsub.f32 %v8871_v27, %v11254_v10  ;;  %11255 = vst [vmem:[#allocation111_spill] sm:$0xff] %v8944_v37  ;;  %6874 = vmatpush3.bf16.msra.mxu0 %v8791_v20  ;;  %1527 = vmatprep.mubr.f32.mxu0 %v11258_v57  ;;  %v1787_v10 = vand.u32 4294901760, %v1786_v58  ;;  %v8957_v1 = vsub.f32 %v344_v16, %v8925_v51  ;;  %v1793_v56 = vand.u32 4294901760, %v1792_v24  ;;  %v11261_v3 = vld [vmem:[#allocation22_spill] sm:$0xff]  ;;  %v11263_v58 = vld [vmem:[#allocation15_spill] sm:$0xff]  ;;  %v11266_v24 = vld [vmem:[#allocation76_spill] sm:$0xff] }
  0xce   : > { %11257 = vst [vmem:[#allocation112_spill] sm:$0xff] %v8948_v21  ;;  %v1801_v40 = vsub.f32 %v8885_v19, %v11259_v62  ;;  %1668 = vmatmul.mubr.f32.gmra.mrb[42].mxu1 %v11246_v49  ;;  %6876 = vmatprep.subr.bf16.mxu0 %v8821_v11  ;;  %v11262_v20 = vld [vmem:[#allocation14_spill] sm:$0xff]  ;;  %v6905_v27 = vpack.c.bf16 %v2000_v18, %v1993_v35  ;;  %v2007_v62 = vand.u32 4294901760, %v2006_v17  ;;  %v11267_v18 = vand.u32 4294901760, %v8907_v0 }
  0xcf   : > { %11260 = vst [vmem:[#allocation113_spill] sm:$0xff] %v8957_v1  ;;  %v6911_v45 = vpack.c.bf16 %v11262_v20, %v11261_v3  ;;  %v6913_v22 = vpack.c.bf16 %v11264_v30, %v11263_v58  ;;  %6902 = vmatpush3.bf16.msra.mxu1 %v6901_v52  ;;  %1673 = vmatprep.mubr.f32.mxu1 %v11249_v43  ;;  %v2014_v16 = vand.u32 4294901760, %v2013_v25  ;;  %v8979_v17 = vand.u32 4294901760, %v345_v39  ;;  %v347_v11 = vld [vmem:[%s8760_s21 + $0x50] sm:$0xff] }
  0xd0   : > { %v8970_v49 = vsub.f32 %v343_v31, %v8944_v37  ;;  %1529 = vmatmul.mubr.f32.gmra.mrb[46].mxu0 %v11266_v24  ;;  %6904 = vmatprep.subr.bf16.mxu1 %v6903_v13  ;;  %v1807_v35 = vsub.f32 %v8907_v0, %v11267_v18  ;;  %v6907_v19 = vpack.c.bf16 %v2126_v38, %v2119_v42  ;;  %v1802_v25 = vand.u32 4294901760, %v1801_v40  ;;  %v350_v42 = vld [vmem:[%s8760_s21 + $0x68] sm:$0xff] }
  0xd1   : > { %v8977_v52 = vsub.f32 %v346_v7, %v8948_v21  ;;  %11269 = vst [vmem:[#allocation15_spill] sm:$0xff] %v8979_v17  ;;  %6878 = vmatpush3.bf16.msra.mxu0 %v8869_v29  ;;  %1788 = vmatprep.mubr.f32.mxu0 %v1787_v10  ;;  %v11270_v31 = vand.u32 4294901760, %v8923_v6  ;;  %v8986_v43 = vand.u32 4294901760, %v348_v50  ;;  %v6915_v7 = vpack.c.bf16 %v8475_v12, %v8473_v15 }
  0xd2   : > { %11265 = vst [vmem:[#allocation22_spill] sm:$0xff] %v8970_v49  ;;  %1675 = vmatmul.mubr.f32.gmra.mrb[44].mxu1 %v11256_v55  ;;  %6912 = vmatprep.subr.bf16.mxu0 %v6911_v45  ;;  %v6909_v40 = vpack.c.bf16 %v2014_v16, %v2007_v62  ;;  %v6917_v38 = vpack.c.bf16 %v8522_v23, %v8520_v32  ;;  %v11271_v10 = vand.u32 4294901760, %v8942_v60  ;;  %v1808_v45 = vand.u32 4294901760, %v1807_v35  ;;  %v11275_v35 = vld [vmem:[#allocation19_spill] sm:$0xff] }
  0xd3   : > { %11268 = vst [vmem:[#allocation14_spill] sm:$0xff] %v8977_v52  ;;  %v1816_v46 = vsub.f32 %v8923_v6, %v11270_v31  ;;  %6906 = vmatpush3.bf16.msra.mxu1 %v6905_v27  ;;  %1680 = vmatprep.mubr.f32.mxu1 %v11258_v57  ;;  %v9002_v27 = vsub.f32 %v345_v39, %v8979_v17  ;;  %v9004_v62 = vand.u32 4294901760, %v347_v11  ;;  %v11272_v57 = vand.u32 4294901760, %v8957_v1  ;;  %v11274_v39 = vld [vmem:[#allocation18_spill] sm:$0xff]  ;;  %v352_v55 = vld [vmem:[%s8760_s21 + $0x78] sm:$0xff] }
  0xd4   : > { %v1822_v18 = vsub.f32 %v8942_v60, %v11271_v10  ;;  %1794 = vmatmul.mubr.f32.vlgmr.msra.gmra.mrb[48].mxu0 %v1793_v56  ;;  %6908 = vmatprep.subr.bf16.mxu1 %v6907_v19  ;;  %v9010_v31 = vsub.f32 %v348_v50, %v8986_v43  ;;  %v9012_v56 = vand.u32 4294901760, %v350_v42  ;;  %v349_v19 = vld [vmem:[%s8760_s21 + $0x60] sm:$0xff]  ;;  %v6919_v13 = vpack.c.bf16 %v11275_v35, %v11274_v39 }
  0xd5   : > { %6914 = vmatpush3.bf16.msra.mxu0 %v6913_v22  ;;  %1803 = vmatprep.mubr.f32.mxu0 %v1802_v25  ;;  %v1817_v16 = vand.u32 4294901760, %v1816_v46  ;;  %v1831_v10 = vsub.f32 %v8957_v1, %v11272_v57  ;;  %v6921_v22 = vpack.c.bf16 %v8573_v28, %v8569_v44  ;;  %v11276_v50 = vand.u32 4294901760, %v8970_v49 }
  0xd6   : > { %11273 = vst [vmem:[#allocation16_spill] sm:$0xff] %v9010_v31  ;;  %1682 = vmatmul.mubr.f32.gmra.mrb[46].mxu1 %v11266_v24  ;;  %6916 = vmatprep.subr.bf16.mxu0 %v6915_v7  ;;  %v1823_v46 = vand.u32 4294901760, %v1822_v18  ;;  %v11277_v25 = vand.u32 4294901760, %v8977_v52  ;;  %v9031_v24 = vsub.f32 %v347_v11, %v9004_v62  ;;  %v9033_v18 = vand.u32 4294901760, %v349_v19 }
  0xd7   : > { %6910 = vmatpush3.bf16.msra.mxu1 %v6909_v40  ;;  %2129 = vmatprep.mubr.f32.mxu1 %v8813_v2  ;;  %v1837_v57 = vsub.f32 %v8970_v49, %v11276_v50  ;;  %v10841_v40 = vand.u32 4294901760, %v9002_v27  ;;  %v1832_v2 = vand.u32 4294901760, %v1831_v10  ;;  %v9039_v50 = vand.u32 4294901760, %v352_v55  ;;  %v351_v49 = vld [vmem:[%s8760_s21 + $0x70] sm:$0xff] }
  0xd8   : > { %1809 = vmatmul.mubr.f32.gmra.mrb[50].mxu0 %v1808_v45  ;;  %6944 = vmatprep.subr.bf16.mxu1 %v8495_v36  ;;  %v1846_v7 = vsub.f32 %v8977_v52, %v11277_v25  ;;  %11278 = vst [vmem:[#allocation18_spill] sm:$0xff] %v9031_v24  ;;  %v9037_v45 = vsub.f32 %v350_v42, %v9012_v56  ;;  %v11280_v42 = vld [vmem:[#allocation17_spill] sm:$0xff]  ;;  %v9057_v1 = vand.u32 4294901760, %v351_v49 }
  0xd9   : > { %6918 = vmatpush3.bf16.msra.mxu0 %v6917_v38  ;;  %1818 = vmatprep.mubr.f32.mxu0 %v1817_v16  ;;  %v6923_v11 = vpack.c.bf16 %v8603_v5, %v8575_v8  ;;  %v1838_v38 = vand.u32 4294901760, %v1837_v57  ;;  %v6925_v16 = vpack.c.bf16 %v8627_v53, %v8625_v4  ;;  %v1852_v10 = vsub.f32 %v9002_v27, %v10841_v40  ;;  %v11284_v40 = vld [vmem:[#allocation11_spill] sm:$0xff] }
  0xda   : > { %11279 = vst [vmem:[#allocation19_spill] sm:$0xff] %v9037_v45  ;;  %2131 = vmatmul.mubr.f32.vlgmr.msra.gmra.mrb[48].mxu1 %v8815_v14  ;;  %6920 = vmatprep.subr.bf16.mxu0 %v6919_v13  ;;  %v9055_v25 = vsub.f32 %v349_v19, %v9033_v18  ;;  %v1847_v57 = vand.u32 4294901760, %v1846_v7  ;;  %v9064_v52 = vsub.f32 %v352_v55, %v9039_v50  ;;  %v11285_v19 = vld [vmem:[#allocation84_spill] sm:$0xff]  ;;  %v11289_v14 = vld [vmem:[#allocation87_spill] sm:$0xff]  ;;  %v11292_v55 = vld [vmem:[#allocation90_spill] sm:$0xff] }
  0xdb   : > { %6946 = vmatpush3.bf16.msra.mxu1 %v8497_v54  ;;  %2136 = vmatprep.mubr.f32.mxu1 %v8853_v47  ;;  %v11282_v47 = vand.u32 4294901760, %v9010_v31  ;;  %v6927_v13 = vpack.c.bf16 %v11285_v19, %v11284_v40  ;;  %v9077_v7 = vsub.f32 %v351_v49, %v9057_v1  ;;  %v11293_v49 = vld [vmem:[#allocation21_spill] sm:$0xff] }
  0xdc   : > { %1824 = vmatmul.mubr.f32.gmra.mrb[52].mxu0 %v1823_v46  ;;  %6948 = vmatprep.subr.bf16.mxu1 %v11280_v42  ;;  %11281 = vst [vmem:[#allocation17_spill] sm:$0xff] %v9055_v25  ;;  %11283 = vst [vmem:[#allocation114_spill] sm:$0xff] %v9064_v52 }
  0xdd   : > { %6922 = vmatpush3.bf16.msra.mxu0 %v6921_v22  ;;  %1833 = vmatprep.mubr.f32.mxu0 %v1832_v2  ;;  %v1861_v46 = vsub.f32 %v9010_v31, %v11282_v47  ;;  %v1853_v2 = vand.u32 4294901760, %v1852_v10  ;;  %v11286_v47 = vand.u32 4294901760, %v9031_v24  ;;  %11287 = vst [vmem:[#allocation11_spill] sm:$0xff] %v9077_v7 }
  0xde   : > { %2138 = vmatmul.mubr.f32.gmra.mrb[50].mxu1 %v8875_v59  ;;  %6924 = vmatprep.subr.bf16.mxu0 %v6923_v11  ;;  %v11288_v11 = vld [vmem:[#allocation85_spill] sm:$0xff] }
  0xdf   : > { %6950 = vmatpush3.bf16.msra.mxu1 %v8539_v26  ;;  %2143 = vmatprep.mubr.f32.mxu1 %v8887_v48  ;;  %v1867_v22 = vsub.f32 %v9031_v24, %v11286_v47  ;;  %v6929_v59 = vpack.c.bf16 %v11289_v14, %v11288_v11  ;;  %v1862_v31 = vand.u32 4294901760, %v1861_v46  ;;  %v11291_v47 = vld [vmem:[#allocation89_spill] sm:$0xff]  ;;  %v11295_v46 = vand.u32 4294901760, %v9055_v25 }
  0xe0   : > { %1839 = vmatmul.mubr.f32.gmra.mrb[54].mxu0 %v1838_v38  ;;  %6952 = vmatprep.subr.bf16.mxu1 %v8547_v33  ;;  %v11290_v38 = vand.u32 4294901760, %v9037_v45  ;;  %v6931_v24 = vpack.c.bf16 %v11292_v55, %v11291_v47  ;;  %v10864_v48 = vand.u32 4294901760, %v9077_v7 }
  0xe1   : > { %6926 = vmatpush3.bf16.msra.mxu0 %v6925_v16  ;;  %1848 = vmatprep.mubr.f32.mxu0 %v1847_v57  ;;  %v1868_v16 = vand.u32 4294901760, %v1867_v22  ;;  %v11294_v57 = vld [vmem:[#allocation8_spill] sm:$0xff]  ;;  %v11297_v22 = vld [vmem:[#allocation9_spill] sm:$0xff] }
  0xe2   : > { %v1876_v10 = vsub.f32 %v9037_v45, %v11290_v38  ;;  %2145 = vmatmul.mubr.f32.gmra.mrb[52].mxu1 %v8902_v34  ;;  %6928 = vmatprep.subr.bf16.mxu0 %v6927_v13  ;;  %v1882_v38 = vsub.f32 %v9055_v25, %v11295_v46  ;;  %v6933_v13 = vpack.c.bf16 %v8735_v61, %v8731_v41  ;;  %v11296_v45 = vand.u32 4294901760, %v9064_v52  ;;  %v11300_v46 = vld [vmem:[#allocation95_spill] sm:$0xff]  ;;  %v11302_v25 = vld [vmem:[#allocation100_spill] sm:$0xff] }
  0xe3   : > { %6954 = vmatpush3.bf16.msra.mxu1 %v11293_v49  ;;  %2150 = vmatprep.mubr.f32.mxu1 %v8925_v51 }
  0xe4   : > { %1854 = vmatmul.mubr.f32.gmra.mrb[56].mxu0 %v1853_v2  ;;  %6956 = vmatprep.subr.bf16.mxu1 %v11294_v57  ;;  %v1877_v34 = vand.u32 4294901760, %v1876_v10  ;;  %v1891_v51 = vsub.f32 %v9064_v52, %v11296_v45  ;;  %v6935_v2 = vpack.c.bf16 %v8778_v9, %v8776_v63  ;;  %v1897_v10 = vsub.f32 %v9077_v7, %v10864_v48  ;;  %v11299_v45 = vld [vmem:[#allocation94_spill] sm:$0xff]  ;;  %v11301_v52 = vld [vmem:[#allocation99_spill] sm:$0xff] }
  0xe5   : > { %6930 = vmatpush3.bf16.msra.mxu0 %v6929_v59  ;;  %1863 = vmatprep.mubr.f32.mxu0 %v1862_v31  ;;  %v1883_v59 = vand.u32 4294901760, %v1882_v38  ;;  %v11298_v31 = vld [vmem:[#allocation10_spill] sm:$0xff]  ;;  %v11309_v7 = vld [vmem:[#allocation91_spill] sm:$0xff] }
  0xe6   : > { %2152 = vmatmul.mubr.f32.gmra.mrb[54].mxu1 %v8944_v37  ;;  %6932 = vmatprep.subr.bf16.mxu0 %v6931_v24  ;;  %v6937_v24 = vpack.c.bf16 %v11300_v46, %v11299_v45  ;;  %v1892_v37 = vand.u32 4294901760, %v1891_v51  ;;  %v1898_v38 = vand.u32 4294901760, %v1897_v10  ;;  %v11307_v51 = vand.u32 4294901760, %v11261_v3 }
  0xe7   : > { %6958 = vmatpush3.bf16.msra.mxu1 %v11297_v22  ;;  %2157 = vmatprep.mubr.f32.mxu1 %v8948_v21  ;;  %v6939_v21 = vpack.c.bf16 %v11302_v25, %v11301_v52  ;;  %v11312_v10 = vand.u32 4294901760, %v11263_v58  ;;  %v11315_v3 = vand.u32 4294901760, %v8475_v12  ;;  %v11319_v58 = vld [vmem:[#allocation107_spill] sm:$0xff]  ;;  %v11323_v12 = vand.u32 4294901760, %v11275_v35 }
  0xe8   : > { %1869 = vmatmul.mubr.f32.gmra.mrb[58].mxu0 %v1868_v16  ;;  %6960 = vmatprep.subr.bf16.mxu1 %v11298_v31  ;;  %v11303_v16 = vld [vmem:[#allocation86_spill] sm:$0xff]  ;;  %v11304_v31 = vld [vmem:[#allocation88_spill] sm:$0xff] }
  0xe9   : > { %6934 = vmatpush3.bf16.msra.mxu0 %v6933_v13  ;;  %1878 = vmatprep.mubr.f32.mxu0 %v1877_v34  ;;  %v11305_v34 = vld [vmem:[#allocation101_spill] sm:$0xff] }
  0xea   : > { %2159 = vmatmul.mubr.f32.gmra.mrb[56].mxu1 %v8979_v17  ;;  %6936 = vmatprep.subr.bf16.mxu0 %v6935_v2  ;;  %v11306_v13 = vld [vmem:[#allocation105_spill] sm:$0xff]  ;;  %v11308_v2 = vand.u32 4294901760, %v11262_v20  ;;  %v11314_v20 = vand.u32 4294901760, %v8473_v15  ;;  %v11322_v15 = vand.u32 4294901760, %v11274_v39 }
  0xeb   : > { %6962 = vmatpush3.bf16.msra.mxu1 %v11303_v16  ;;  %2164 = vmatprep.mubr.f32.mxu1 %v8986_v43  ;;  %v6941_v48 = vpack.c.bf16 %v11306_v13, %v11305_v34 }
  0xec   : > { %1884 = vmatmul.mubr.f32.gmra.mrb[60].mxu0 %v1883_v59  ;;  %6964 = vmatprep.subr.bf16.mxu1 %v11304_v31  ;;  %v6975_v17 = vpack.c.bf16 %v11308_v2, %v11307_v51  ;;  %v11310_v59 = vld [vmem:[#allocation92_spill] sm:$0xff]  ;;  %v6979_v51 = vpack.c.bf16 %v11315_v3, %v11314_v20  ;;  %v11316_v2 = vld [vmem:[#allocation93_spill] sm:$0xff] }
  0xed   : > { %6938 = vmatpush3.bf16.msra.mxu0 %v6937_v24  ;;  %1893 = vmatprep.mubr.f32.mxu0 %v1892_v37  ;;  %v11311_v37 = vld [vmem:[#allocation102_spill] sm:$0xff]  ;;  %v11313_v24 = vand.u32 4294901760, %v11264_v30  ;;  %v11320_v30 = vand.u32 4294901760, %v8520_v32  ;;  %v11325_v32 = vand.u32 4294901760, %v8569_v44  ;;  %v11332_v44 = vand.u32 4294901760, %v8625_v4 }
  0xee   : > { %2166 = vmatmul.mubr.f32.gmra.mrb[58].mxu1 %v9004_v62  ;;  %6940 = vmatprep.subr.bf16.mxu0 %v6939_v21  ;;  %v11324_v20 = vand.u32 4294901760, %v11311_v37  ;;  %v11339_v4 = vld [vmem:[#allocation14_spill] sm:$0xff] }
  0xef   : > { %6966 = vmatpush3.bf16.msra.mxu1 %v11309_v7  ;;  %2171 = vmatprep.mubr.f32.mxu1 %v9012_v56  ;;  %v6977_v21 = vpack.c.bf16 %v11313_v24, %v11312_v10  ;;  %v6983_v24 = vpack.c.bf16 %v11323_v12, %v11322_v15  ;;  %v11353_v12 = vld [vmem:[#allocation18_spill] sm:$0xff] }
  0xf0   : > { %1899 = vmatmul.mubr.f32.gmra.mrb[62].mxu0 %v1898_v38  ;;  %6968 = vmatprep.subr.bf16.mxu1 %v11310_v59  ;;  %v11318_v38 = vld [vmem:[#allocation98_spill] sm:$0xff] }
  0xf1   : > { %6942 = vmatpush3.bf16.msra.mxu0 %v6941_v48  ;;  %2315 = vmatprep.mubr.f32.mxu0 %v11311_v37  ;;  %v11317_v48 = vld [vmem:[#allocation103_spill] sm:$0xff]  ;;  %v11329_v37 = vand.u32 4294901760, %v8603_v5  ;;  %v11334_v5 = vand.u32 4294901760, %v8907_v0 }
  0xf2   : > { %2173 = vmatmul.mubr.f32.gmra.mrb[60].mxu1 %v9033_v18  ;;  %6976 = vmatprep.subr.bf16.mxu0 %v6975_v17  ;;  %v11321_v17 = vand.u32 4294901760, %v8522_v23  ;;  %v11326_v23 = vand.u32 4294901760, %v8573_v28  ;;  %v11327_v35 = vand.u32 4294901760, %v11317_v48  ;;  %v11331_v28 = vld [vmem:[#allocation113_spill] sm:$0xff] }
  0xf3   : > { %6970 = vmatpush3.bf16.msra.mxu1 %v11316_v2  ;;  %2178 = vmatprep.mubr.f32.mxu1 %v9039_v50 }
  0xf4   : > { %2318 = vmatmul.mubr.f32.vlgmr.msra.gmra.mrb[64].mxu0 %v11317_v48  ;;  %6972 = vmatprep.subr.bf16.mxu1 %v11318_v38  ;;  %v6981_v10 = vpack.c.bf16 %v11321_v17, %v11320_v30  ;;  %v6985_v39 = vpack.c.bf16 %v11326_v23, %v11325_v32  ;;  %v11336_v48 = vand.u32 4294901760, %v11285_v19  ;;  %v11338_v30 = vld [vmem:[#allocation22_spill] sm:$0xff]  ;;  %v11342_v19 = vand.u32 4294901760, %v8942_v60 }
  0xf5   : > { %6978 = vmatpush3.bf16.msra.mxu0 %v6977_v21  ;;  %2324 = vmatprep.mubr.f32.mxu0 %v11319_v58  ;;  %v11328_v21 = vand.u32 4294901760, %v8575_v8  ;;  %v11360_v32 = vand.u32 4294901760, %v11302_v25  ;;  %v11366_v25 = vand.u32 4294901760, %v11353_v12 }
  0xf6   : > { %2180 = vmatmul.mubr.f32.gmra.mrb[62].mxu1 %v9057_v1  ;;  %6980 = vmatprep.subr.bf16.mxu0 %v6979_v51  ;;  %v11333_v51 = vand.u32 4294901760, %v8627_v53  ;;  %v11340_v53 = vand.u32 4294901760, %v11288_v11  ;;  %v11348_v11 = vand.u32 4294901760, %v8735_v61  ;;  %v11355_v61 = vld [vmem:[#allocation19_spill] sm:$0xff] }
  0xf7   : > { %6974 = vmatpush3.bf16.msra.mxu1 %v8869_v29  ;;  %2485 = vmatprep.mubr.f32.mxu1 %v11324_v20  ;;  %v6987_v3 = vpack.c.bf16 %v11329_v37, %v11328_v21  ;;  %v11357_v20 = vand.u32 4294901760, %v11300_v46  ;;  %v11365_v46 = vand.u32 4294901760, %v11306_v13  ;;  %v11368_v21 = vld [vmem:[#allocation11_spill] sm:$0xff]  ;;  %v11372_v37 = vld [vmem:[#allocation97_spill] sm:$0xff] }
  0xf8   : > { %2327 = vmatmul.mubr.f32.gmra.mrb[66].mxu0 %v8907_v0  ;;  %7008 = vmatprep.subr.bf16.mxu1 %v8495_v36  ;;  %v11330_v36 = vand.u32 4294901760, %v11319_v58  ;;  %v6989_v8 = vpack.c.bf16 %v11333_v51, %v11332_v44  ;;  %v11341_v0 = vand.u32 4294901760, %v11289_v14  ;;  %v11346_v14 = vld [vmem:[#allocation16_spill] sm:$0xff]  ;;  %v11381_v44 = vld [vmem:[#allocation15_spill] sm:$0xff] }
  0xf9   : > { %6982 = vmatpush3.bf16.msra.mxu0 %v6981_v10  ;;  %2333 = vmatprep.mubr.f32.mxu0 %v8923_v6  ;;  %v11351_v10 = vand.u32 4294901760, %v8778_v9  ;;  %v11358_v9 = vand.u32 4294901760, %v9002_v27  ;;  %v11382_v51 = vld [vmem:[#allocation31_spill] sm:$0xff] }
  0xfa   : > { %2489 = vmatmul.mubr.f32.vlgmr.msra.gmra.mrb[64].mxu1 %v11327_v35  ;;  %6984 = vmatprep.subr.bf16.mxu0 %v6983_v24  ;;  %v11356_v24 = vand.u32 4294901760, %v11299_v45  ;;  %v11362_v35 = vld [vmem:[#allocation17_spill] sm:$0xff]  ;;  %v11363_v45 = vld [vmem:[#allocation114_spill] sm:$0xff] }
  0xfb   : > { %7010 = vmatpush3.bf16.msra.mxu1 %v8497_v54  ;;  %2496 = vmatprep.mubr.f32.mxu1 %v11330_v36  ;;  %v11335_v54 = vand.u32 4294901760, %v11284_v40  ;;  %v6993_v40 = vpack.c.bf16 %v11341_v0, %v11340_v53  ;;  %v11371_v13 = vand.u32 4294901760, %v11363_v45  ;;  %v11376_v36 = vld [vmem:[#allocation108_spill] sm:$0xff] }
  0xfc   : > { %2336 = vmatmul.mubr.f32.gmra.mrb[68].mxu0 %v8942_v60  ;;  %7012 = vmatprep.subr.bf16.mxu1 %v11280_v42  ;;  %v11337_v42 = vand.u32 4294901760, %v8923_v6  ;;  %v11344_v6 = vand.u32 4294901760, %v11292_v55  ;;  %v11347_v60 = vand.u32 4294901760, %v8731_v41  ;;  %v11349_v55 = vand.u32 4294901760, %v11338_v30  ;;  %v11354_v41 = vld [vmem:[#allocation10_spill] sm:$0xff] }
  0xfd   : > { %6986 = vmatpush3.bf16.msra.mxu0 %v6985_v39  ;;  %2342 = vmatprep.mubr.f32.mxu0 %v11331_v28  ;;  %v6991_v58 = vpack.c.bf16 %v11336_v48, %v11335_v54  ;;  %v11361_v39 = vand.u32 4294901760, %v11346_v14 }
  0xfe   : > { %2500 = vmatmul.mubr.f32.gmra.mrb[66].mxu1 %v11334_v5  ;;  %6988 = vmatprep.subr.bf16.mxu0 %v6987_v3  ;;  %v11374_v3 = vand.u32 4294901760, %v11368_v21 }
  0xff   : > { %7014 = vmatpush3.bf16.msra.mxu1 %v8539_v26  ;;  %2507 = vmatprep.mubr.f32.mxu1 %v11337_v42  ;;  %v11343_v26 = vand.u32 4294901760, %v11291_v47  ;;  %v6997_v47 = vpack.c.bf16 %v11348_v11, %v11347_v60 }
 0x100   : > { %2345 = vmatmul.mubr.f32.gmra.mrb[70].mxu0 %v11338_v30  ;;  %7016 = vmatprep.subr.bf16.mxu1 %v8547_v33  ;;  %v11345_v33 = vand.u32 4294901760, %v11331_v28  ;;  %v11379_v28 = vld [vmem:[#allocation111_spill] sm:$0xff] }
 0x101   : > { %6990 = vmatpush3.bf16.msra.mxu0 %v6989_v8  ;;  %2351 = vmatprep.mubr.f32.mxu0 %v11339_v4  ;;  %v6995_v17 = vpack.c.bf16 %v11344_v6, %v11343_v26 }
 0x102   : > { %2511 = vmatmul.mubr.f32.gmra.mrb[68].mxu1 %v11342_v19  ;;  %6992 = vmatprep.subr.bf16.mxu0 %v6991_v58 }
 0x103   : > { %7018 = vmatpush3.bf16.msra.mxu1 %v11293_v49  ;;  %2518 = vmatprep.mubr.f32.mxu1 %v11345_v33  ;;  %v11350_v49 = vand.u32 4294901760, %v8776_v63  ;;  %v7001_v63 = vpack.c.bf16 %v11357_v20, %v11356_v24 }
 0x104   : > { %2354 = vmatmul.mubr.f32.gmra.mrb[72].mxu0 %v9002_v27  ;;  %7020 = vmatprep.subr.bf16.mxu1 %v11294_v57  ;;  %v11352_v57 = vand.u32 4294901760, %v11339_v4  ;;  %v11364_v27 = vand.u32 4294901760, %v11305_v34  ;;  %v11370_v34 = vand.u32 4294901760, %v11362_v35 }
 0x105   : > { %6994 = vmatpush3.bf16.msra.mxu0 %v6993_v40  ;;  %2360 = vmatprep.mubr.f32.mxu0 %v11346_v14  ;;  %v6999_v15 = vpack.c.bf16 %v11351_v10, %v11350_v49 }
 0x106   : > { %2522 = vmatmul.mubr.f32.gmra.mrb[70].mxu1 %v11349_v55  ;;  %6996 = vmatprep.subr.bf16.mxu0 %v6995_v17 }
 0x107   : > { %7022 = vmatpush3.bf16.msra.mxu1 %v11297_v22  ;;  %2529 = vmatprep.mubr.f32.mxu1 %v11352_v57  ;;  %v11359_v22 = vand.u32 4294901760, %v11301_v52  ;;  %v7005_v52 = vpack.c.bf16 %v11365_v46, %v11364_v27 }
 0x108   : > { %2363 = vmatmul.mubr.f32.gmra.mrb[74].mxu0 %v11353_v12  ;;  %7024 = vmatprep.subr.bf16.mxu1 %v11354_v41 }
 0x109   : > { %6998 = vmatpush3.bf16.msra.mxu0 %v6997_v47  ;;  %2369 = vmatprep.mubr.f32.mxu0 %v11355_v61  ;;  %v7003_v23 = vpack.c.bf16 %v11360_v32, %v11359_v22 }
 0x10a   : > { %2533 = vmatmul.mubr.f32.gmra.mrb[72].mxu1 %v11358_v9  ;;  %7000 = vmatprep.subr.bf16.mxu0 %v6999_v15 }
 0x10b   : > { %7026 = vmatpush3.bf16.msra.mxu1 %v11303_v16  ;;  %2540 = vmatprep.mubr.f32.mxu1 %v11361_v39  ;;  %v11367_v16 = vand.u32 4294901760, %v11355_v61 }
 0x10c   : > { %2372 = vmatmul.mubr.f32.gmra.mrb[76].mxu0 %v11362_v35  ;;  %7028 = vmatprep.subr.bf16.mxu1 %v11304_v31  ;;  %v11369_v31 = vld [vmem:[#allocation96_spill] sm:$0xff] }
 0x10d   : > { %7002 = vmatpush3.bf16.msra.mxu0 %v7001_v63  ;;  %2378 = vmatprep.mubr.f32.mxu0 %v11363_v45 }
 0x10e   : > { %2544 = vmatmul.mubr.f32.gmra.mrb[74].mxu1 %v11366_v25  ;;  %7004 = vmatprep.subr.bf16.mxu0 %v7003_v23 }
 0x10f   : > { %7030 = vmatpush3.bf16.msra.mxu1 %v11309_v7  ;;  %2551 = vmatprep.mubr.f32.mxu1 %v11367_v16  ;;  %v11373_v7 = vld [vmem:[#allocation104_spill] sm:$0xff] }
 0x110   : > { %2381 = vmatmul.mubr.f32.gmra.mrb[78].mxu0 %v11368_v21  ;;  %7032 = vmatprep.subr.bf16.mxu1 %v11310_v59  ;;  %v11375_v59 = vld [vmem:[#allocation106_spill] sm:$0xff] }
 0x111   : > { %7006 = vmatpush3.bf16.msra.mxu0 %v7005_v52  ;;  %2732 = vmatprep.mubr.f32.mxu0 %v11369_v31 }
 0x112   : > { %2555 = vmatmul.mubr.f32.gmra.mrb[76].mxu1 %v11370_v34 }
 0x113   : > { %7034 = vmatpush3.bf16.msra.mxu1 %v11316_v2  ;;  %2562 = vmatprep.mubr.f32.mxu1 %v11371_v13  ;;  %v11377_v2 = vld [vmem:[#allocation109_spill] sm:$0xff] }
 0x114   : > { %2734 = vmatmul.mubr.f32.vlgmr.msra.gmra.mrb[80].mxu0 %v11372_v37  ;;  %7036 = vmatprep.subr.bf16.mxu1 %v11318_v38  ;;  %v11378_v38 = vld [vmem:[#allocation110_spill] sm:$0xff] }
 0x115   : > { %2739 = vmatprep.mubr.f32.mxu0 %v11373_v7 }
 0x116   : > { %2566 = vmatmul.mubr.f32.gmra.mrb[78].mxu1 %v11374_v3 }
 0x117   : > { %7038 = vmatpush3.bf16.msra.mxu1 %v8869_v29  ;;  %2885 = vmatprep.mubr.f32.mxu1 %v11369_v31  ;;  %v11380_v29 = vld [vmem:[#allocation112_spill] sm:$0xff] }
 0x118   : > { %2741 = vmatmul.mubr.f32.gmra.mrb[82].mxu0 %v11375_v59 }
 0x119   : > { %2746 = vmatprep.mubr.f32.mxu0 %v11376_v36 }
 0x11a   : > { %2887 = vmatmul.mubr.f32.vlgmr.msra.gmra.mrb[80].mxu1 %v11372_v37 }
 0x11b   : > { %2892 = vmatprep.mubr.f32.mxu1 %v11373_v7 }
 0x11c   : > { %2748 = vmatmul.mubr.f32.gmra.mrb[84].mxu0 %v11377_v2 }
 0x11d   : > { %2753 = vmatprep.mubr.f32.mxu0 %v11378_v38 }
 0x11e   : > { %2894 = vmatmul.mubr.f32.gmra.mrb[82].mxu1 %v11375_v59 }
 0x11f   : > { %2899 = vmatprep.mubr.f32.mxu1 %v11376_v36 }
 0x120   : > { %2755 = vmatmul.mubr.f32.gmra.mrb[86].mxu0 %v11379_v28 }
 0x121   : > { %2760 = vmatprep.mubr.f32.mxu0 %v11380_v29 }
 0x122   : > { %2901 = vmatmul.mubr.f32.gmra.mrb[84].mxu1 %v11377_v2 }
 0x123   : > { %2906 = vmatprep.mubr.f32.mxu1 %v11378_v38 }
 0x124   : > { %2762 = vmatmul.mubr.f32.gmra.mrb[88].mxu0 %v11381_v44 }
 0x125   : > { %2767 = vmatprep.mubr.f32.mxu0 %v8986_v43 }
 0x126   : > { %2908 = vmatmul.mubr.f32.gmra.mrb[86].mxu1 %v11379_v28 }
 0x127   : > { %2913 = vmatprep.mubr.f32.mxu1 %v11380_v29 }
 0x128   : > { %2769 = vmatmul.mubr.f32.gmra.mrb[90].mxu0 %v9004_v62 }
 0x129   : > { %2774 = vmatprep.mubr.f32.mxu0 %v9012_v56 }
 0x12a   : > { %2915 = vmatmul.mubr.f32.gmra.mrb[88].mxu1 %v11381_v44 }
 0x12b   : > { %2920 = vmatprep.mubr.f32.mxu1 %v8986_v43 }
 0x12c   : > { %2776 = vmatmul.mubr.f32.gmra.mrb[92].mxu0 %v9033_v18 }
 0x12d   : > { %2781 = vmatprep.mubr.f32.mxu0 %v9039_v50 }
 0x12e   : > { %2922 = vmatmul.mubr.f32.gmra.mrb[90].mxu1 %v9004_v62 }
 0x12f   : > { %2927 = vmatprep.mubr.f32.mxu1 %v9012_v56 }
 0x130   : > { %2783 = vmatmul.mubr.f32.gmra.mrb[94].mxu0 %v9057_v1 }
 0x132   : > { %2929 = vmatmul.mubr.f32.gmra.mrb[92].mxu1 %v9033_v18 }
 0x133   : > { %2934 = vmatprep.mubr.f32.mxu1 %v9039_v50 }
 0x136   : > { %2936 = vmatmul.mubr.f32.gmra.mrb[94].mxu1 %v9057_v1 }
 0x137   : > { %4065 = vmatprep.mubr.f32.mxu1 %v11382_v51 }
 0x13d   : > { %v5415_v8 = vpop.f32.mrb[0].mxu0 }
 0x13e   : > { %v5416_v43 = vpop.f32.mrb[1].mxu0 }
 0x13f   : > { %v5417_v5 = vadd.f32 %v5416_v43, %v5415_v8 }
 0x143   : > { %v5418_v54 = vpop.f32.mrb[2].mxu0 }
 0x144   : > { %v5419_v48 = vpop.f32.mrb[3].mxu0 }
 0x145   : > { %v5420_v58 = vadd.f32 %v5419_v48, %v5418_v54 }
 0x149   : > { %v5471_v42 = vpop.f32.mrb[0].mxu1  ;;  %v5421_v56 = vpop.f32.mrb[4].mxu0 }
 0x14a   : > { %v5472_v62 = vpop.f32.mrb[1].mxu1  ;;  %v5422_v4 = vpop.f32.mrb[5].mxu0 }
 0x14b   : > { %v5473_v30 = vadd.f32 %v5472_v62, %v5471_v42  ;;  %v5423_v18 = vadd.f32 %v5422_v4, %v5421_v56 }
 0x14d   : > { %v879_v53 = vadd.f32 %v5473_v30, %v5417_v5  ;;  %v5474_v0 = vpop.f32.mrb[2].mxu1 }
 0x14e   : > { %v5475_v40 = vpop.f32.mrb[3].mxu1  ;;  %v5424_v19 = vpop.f32.mrb[6].mxu0 }
 0x14f   : > { %v5476_v50 = vadd.f32 %v5475_v40, %v5474_v0  ;;  %v5425_v1 = vpop.f32.mrb[7].mxu0 }
 0x150   : > { %v5426_v17 = vadd.f32 %v5425_v1, %v5424_v19 }
 0x151   : > { %v886_v26 = vadd.f32 %v5476_v50, %v5420_v58  ;;  %v5477_v6 = vpop.f32.mrb[4].mxu1 }
 0x152   : > { %v5478_v33 = vpop.f32.mrb[5].mxu1 }
 0x153   : > { %v5479_v14 = vadd.f32 %v5478_v33, %v5477_v6  ;;  %v5427_v60 = vpop.f32.mrb[8].mxu0 }
 0x154   : > { %v5428_v11 = vpop.f32.mrb[9].mxu0 }
 0x155   : > { %v893_v47 = vadd.f32 %v5479_v14, %v5423_v18  ;;  %v5480_v55 = vpop.f32.mrb[6].mxu1  ;;  %v5429_v49 = vadd.f32 %v5428_v11, %v5427_v60 }
 0x156   : > { %v5481_v10 = vpop.f32.mrb[7].mxu1 }
 0x157   : > { %v5482_v15 = vadd.f32 %v5481_v10, %v5480_v55  ;;  %v5430_v57 = vpop.f32.mrb[10].mxu0 }
 0x158   : > { %v5431_v12 = vpop.f32.mrb[11].mxu0 }
 0x159   : > { %v900_v41 = vadd.f32 %v5482_v15, %v5426_v17  ;;  %v5432_v24 = vadd.f32 %v5431_v12, %v5430_v57 }
 0x15d   : > { %v5483_v61 = vpop.f32.mrb[8].mxu1  ;;  %v5433_v9 = vpop.f32.mrb[12].mxu0 }
 0x15e   : > { %v5484_v20 = vpop.f32.mrb[9].mxu1  ;;  %v5434_v22 = vpop.f32.mrb[13].mxu0 }
 0x15f   : > { %v5485_v63 = vadd.f32 %v5484_v20, %v5483_v61  ;;  %v5435_v39 = vadd.f32 %v5434_v22, %v5433_v9 }
 0x161   : > { %v907_v32 = vadd.f32 %v5485_v63, %v5429_v49  ;;  %v5486_v23 = vpop.f32.mrb[10].mxu1  ;;  %v5436_v27 = vpop.f32.mrb[14].mxu0 }
 0x162   : > { %v5487_v35 = vpop.f32.mrb[11].mxu1  ;;  %v5437_v46 = vpop.f32.mrb[15].mxu0 }
 0x163   : > { %v5488_v45 = vadd.f32 %v5487_v35, %v5486_v23  ;;  %v5438_v25 = vadd.f32 %v5437_v46, %v5436_v27 }
 0x165   : > { %v914_v52 = vadd.f32 %v5488_v45, %v5432_v24  ;;  %v5489_v16 = vpop.f32.mrb[12].mxu1  ;;  %v5527_v31 = vpop.f32.mrb[16].mxu0 }
 0x166   : > { %v5490_v21 = vpop.f32.mrb[13].mxu1  ;;  %v5528_v13 = vpop.f32.mrb[17].mxu0 }
 0x167   : > { %v5491_v34 = vadd.f32 %v5490_v21, %v5489_v16  ;;  %v5529_v7 = vadd.f32 %v5528_v13, %v5527_v31 }
 0x169   : > { %v921_v37 = vadd.f32 %v5491_v34, %v5435_v39  ;;  %v5492_v3 = vpop.f32.mrb[14].mxu1  ;;  %v1066_v36 = vadd.f32 %v5529_v7, %v879_v53  ;;  %v5530_v2 = vpop.f32.mrb[18].mxu0 }
 0x16a   : > { %v5493_v59 = vpop.f32.mrb[15].mxu1  ;;  %v5531_v28 = vpop.f32.mrb[19].mxu0 }
 0x16b   : > { %v5494_v38 = vadd.f32 %v5493_v59, %v5492_v3  ;;  %v5532_v44 = vadd.f32 %v5531_v28, %v5530_v2 }
 0x16d   : > { %v928_v29 = vadd.f32 %v5494_v38, %v5438_v25  ;;  %v5583_v51 = vpop.f32.mrb[16].mxu1  ;;  %v1075_v43 = vadd.f32 %v5532_v44, %v886_v26  ;;  %v5533_v5 = vpop.f32.mrb[20].mxu0 }
 0x16e   : > { %v5584_v8 = vpop.f32.mrb[17].mxu1  ;;  %v5534_v48 = vpop.f32.mrb[21].mxu0 }
 0x16f   : > { %v5585_v54 = vadd.f32 %v5584_v8, %v5583_v51  ;;  %v5535_v58 = vadd.f32 %v5534_v48, %v5533_v5 }
 0x171   : > { %v1237_v42 = vadd.f32 %v5585_v54, %v1066_v36  ;;  %v5586_v62 = vpop.f32.mrb[18].mxu1  ;;  %v1084_v56 = vadd.f32 %v5535_v58, %v893_v47  ;;  %v5536_v4 = vpop.f32.mrb[22].mxu0 }
 0x172   : > { %v5587_v30 = vpop.f32.mrb[19].mxu1  ;;  %v5537_v18 = vpop.f32.mrb[23].mxu0 }
 0x173   : > { %v5588_v0 = vadd.f32 %v5587_v30, %v5586_v62  ;;  %v5538_v53 = vadd.f32 %v5537_v18, %v5536_v4  ;;  %v9305_v18 = vld [vmem:[%s10582_s4 + $0x80] sm:$0xff] }
 0x175   : > { %v1248_v40 = vadd.f32 %v5588_v0, %v1075_v43  ;;  %v5589_v50 = vpop.f32.mrb[20].mxu1  ;;  %v1093_v1 = vadd.f32 %v5538_v53, %v900_v41  ;;  %v9310_v53 = vld [vmem:[%s10582_s4 + $0x88] sm:$0xff] }
 0x176   : > { %v5590_v19 = vpop.f32.mrb[21].mxu1 }
 0x177   : > { %v5539_v6 = vpop.f32.mrb[24].mxu0  ;;  %v5591_v17 = vadd.f32 %v5590_v19, %v5589_v50  ;;  %v10880_v19 = vand.u32 4294901760, %v9305_v18 }
 0x178   : > { %v5540_v33 = vpop.f32.mrb[25].mxu0 }
 0x179   : > { %v5541_v26 = vadd.f32 %v5540_v33, %v5539_v6  ;;  %v1259_v14 = vadd.f32 %v5591_v17, %v1084_v56  ;;  %v5592_v60 = vpop.f32.mrb[22].mxu1  ;;  %v3933_v6 = vld [vmem:[%s10582_s4 + $0x8] sm:$0xff]  ;;  %v9323_v33 = vld [vmem:[%s10582_s4 + $0x90] sm:$0xff] }
 0x17a   : > { %v5593_v11 = vpop.f32.mrb[23].mxu1 }
 0x17b   : > { %v1102_v55 = vadd.f32 %v5541_v26, %v907_v32  ;;  %v5542_v49 = vpop.f32.mrb[26].mxu0  ;;  %v5594_v10 = vadd.f32 %v5593_v11, %v5592_v60  ;;  %v3968_v11 = vand.u32 4294901760, %v3933_v6 }
 0x17c   : > { %v5543_v15 = vpop.f32.mrb[27].mxu0 }
 0x17d   : > { %v5544_v47 = vadd.f32 %v5543_v15, %v5542_v49  ;;  %v9290_v57 = vadd.f32 %v5594_v10, %v1093_v1  ;;  %v5595_v12 = vpop.f32.mrb[24].mxu1  ;;  %v10879_v1 = vand.u32 4294901760, %v9310_v53  ;;  %v10876_v49 = vand.u32 4294901760, %v9323_v33  ;;  %v3934_v10 = vld [vmem:[%s10582_s4 + $0x10] sm:$0xff]  ;;  %v3935_v15 = vld [vmem:[%s10582_s4 + $0x18] sm:$0xff] }
 0x17e   : > { %v5596_v61 = vpop.f32.mrb[25].mxu1 }
 0x17f   : > { %v1111_v24 = vadd.f32 %v5544_v47, %v914_v52  ;;  %v5545_v20 = vpop.f32.mrb[28].mxu0  ;;  %v5597_v63 = vadd.f32 %v5596_v61, %v5595_v12  ;;  %v9343_v12 = vpack.c.bf16 %v10879_v1, %v10880_v19 }
 0x180   : > { %v5546_v41 = vpop.f32.mrb[29].mxu0 }
 0x181   : > { %v5547_v9 = vadd.f32 %v5546_v41, %v5545_v20  ;;  %v9292_v22 = vadd.f32 %v5597_v63, %v1102_v55  ;;  %v5598_v23 = vpop.f32.mrb[26].mxu1  ;;  %v9330_v55 = vld [vmem:[%s10582_s4 + $0x98] sm:$0xff]  ;;  %11383 = vst [vmem:[#allocation84_spill] sm:$0xff] %v9343_v12  ;;  %v3971_v20 = vand.u32 4294901760, %v3934_v10  ;;  %v9351_v63 = vld [vmem:[%s10582_s4 + $0xa0] sm:$0xff]  ;;  %v9356_v41 = vld [vmem:[%s10582_s4 + $0xa8] sm:$0xff]  ;;  %7136 = vmatprep.subr.bf16.mxu1 %v9343_v12 }
 0x182   : > { %v5599_v39 = vpop.f32.mrb[27].mxu1 }
 0x183   : > { %v1120_v35 = vadd.f32 %v5547_v9, %v921_v37  ;;  %v5548_v45 = vpop.f32.mrb[30].mxu0  ;;  %v5600_v32 = vadd.f32 %v5599_v39, %v5598_v23  ;;  %v3936_v9 = vld [vmem:[%s10582_s4 + $0x20] sm:$0xff] }
 0x184   : > { %v5549_v27 = vpop.f32.mrb[31].mxu0 }
 0x185   : > { %v5550_v46 = vadd.f32 %v5549_v27, %v5548_v45  ;;  %v9294_v25 = vadd.f32 %v5600_v32, %v1111_v24  ;;  %v5601_v16 = vpop.f32.mrb[28].mxu1  ;;  %v10875_v24 = vand.u32 4294901760, %v9330_v55  ;;  %v9364_v32 = vsub.f32 %v3933_v6, %v3968_v11  ;;  %v3937_v27 = vld [vmem:[%s10582_s4 + $0x28] sm:$0xff] }
 0x186   : > { %v5602_v21 = vpop.f32.mrb[29].mxu1 }
 0x187   : > { %v1129_v31 = vadd.f32 %v5550_v46, %v928_v29  ;;  %v5639_v34 = vpop.f32.mrb[32].mxu0  ;;  %v5603_v52 = vadd.f32 %v5602_v21, %v5601_v16  ;;  %11386 = vst [vmem:[#allocation89_spill] sm:$0xff] %v9364_v32  ;;  %v9372_v46 = vld [vmem:[%s10582_s4 + $0xb0] sm:$0xff]  ;;  %v3974_v21 = vand.u32 4294901760, %v3935_v15 }
 0x188   : > { %v5640_v13 = vpop.f32.mrb[33].mxu0 }
 0x189   : > { %v9296_v7 = vadd.f32 %v5603_v52, %v1120_v35  ;;  %v5641_v3 = vadd.f32 %v5640_v13, %v5639_v34  ;;  %v5604_v59 = vpop.f32.mrb[30].mxu1  ;;  %v10874_v34 = vand.u32 4294901760, %v9351_v63 }
 0x18a   : > { %v5605_v36 = vpop.f32.mrb[31].mxu1 }
 0x18b   : > { %v1482_v2 = vadd.f32 %v5641_v3, %v1237_v42  ;;  %v5642_v38 = vpop.f32.mrb[34].mxu0  ;;  %v5606_v37 = vadd.f32 %v5605_v36, %v5604_v59  ;;  %v10873_v59 = vand.u32 4294901760, %v9356_v41  ;;  %v3977_v36 = vand.u32 4294901760, %v3936_v9 }
 0x18c   : > { %v5643_v28 = vpop.f32.mrb[35].mxu0 }
 0x18d   : > { %v9298_v44 = vadd.f32 %v5606_v37, %v1129_v31  ;;  %v5644_v51 = vadd.f32 %v5643_v28, %v5642_v38  ;;  %v5695_v8 = vpop.f32.mrb[32].mxu1  ;;  %v9381_v31 = vsub.f32 %v3934_v10, %v3971_v20  ;;  %v3938_v38 = vld [vmem:[%s10582_s4 + $0x30] sm:$0xff]  ;;  %v9397_v28 = vpack.c.bf16 %v3974_v21, %v3971_v20 }
 0x18e   : > { %v5696_v43 = vpop.f32.mrb[33].mxu1  ;;  %v3983_v6 = vand.u32 4294901760, %v3938_v38 }
 0x18f   : > { %v1489_v5 = vadd.f32 %v5644_v51, %v1248_v40  ;;  %v5645_v54 = vpop.f32.mrb[36].mxu0  ;;  %v5697_v29 = vadd.f32 %v5696_v43, %v5695_v8  ;;  %v3932_v40 = vld [vmem:[%s10582_s4] sm:$0xff]  ;;  %11388 = vst [vmem:[#allocation21_spill] sm:$0xff] %v9381_v31  ;;  %11389 = vst [vmem:[#allocation8_spill] sm:$0xff] %v9397_v28  ;;  %v9399_v51 = vsub.f32 %v3935_v15, %v3974_v21  ;;  %v3980_v8 = vand.u32 4294901760, %v3937_v27  ;;  %v3941_v15 = vld [vmem:[%s10582_s4 + $0x48] sm:$0xff] }
 0x190   : > { %v5646_v48 = vpop.f32.mrb[37].mxu0  ;;  %v3965_v17 = vand.u32 4294901760, %v3932_v40  ;;  %v10872_v43 = vand.u32 4294901760, %v9372_v46 }
 0x191   : > { %v5647_v58 = vadd.f32 %v5646_v48, %v5645_v54  ;;  %v9300_v62 = vadd.f32 %v5697_v29, %v1482_v2  ;;  %v5698_v30 = vpop.f32.mrb[34].mxu1  ;;  %v9391_v2 = vld [vmem:[%s10582_s4 + $0xb8] sm:$0xff]  ;;  %11390 = vst [vmem:[#allocation9_spill] sm:$0xff] %v9399_v51  ;;  %v9408_v54 = vld [vmem:[%s10582_s4 + $0xc0] sm:$0xff] }
 0x192   : > { %v5699_v56 = vpop.f32.mrb[35].mxu1  ;;  %v9345_v61 = vsub.f32 %v3932_v40, %v3965_v17  ;;  %v9362_v45 = vpack.c.bf16 %v3968_v11, %v3965_v17  ;;  %v9429_v40 = vsub.f32 %v3937_v27, %v3980_v8  ;;  %v10871_v10 = vand.u32 4294901760, %v9408_v54  ;;  %v9457_v27 = vld [vmem:[%s10582_s4 + $0xd8] sm:$0xff] }
 0x193   : > { %v1496_v4 = vadd.f32 %v5647_v58, %v1259_v14  ;;  %v5648_v0 = vpop.f32.mrb[38].mxu0  ;;  %v5700_v42 = vadd.f32 %v5699_v56, %v5698_v30  ;;  %v9415_v30 = vpack.c.bf16 %v10873_v59, %v10874_v34  ;;  %v9417_v56 = vsub.f32 %v3936_v9, %v3977_v36 }
 0x194   : > { %v5649_v50 = vpop.f32.mrb[39].mxu0  ;;  %11384 = vst [vmem:[#allocation85_spill] sm:$0xff] %v9345_v61  ;;  %11385 = vst [vmem:[#allocation87_spill] sm:$0xff] %v9362_v45  ;;  %7138 = vmatpush3.bf16.msra.mxu1 %v9362_v45 }
 0x195   : > { %v5650_v26 = vadd.f32 %v5649_v50, %v5648_v0  ;;  %v9325_v14 = vadd.f32 %v5700_v42, %v1489_v5  ;;  %v5701_v60 = vpop.f32.mrb[36].mxu1  ;;  %v3939_v5 = vld [vmem:[%s10582_s4 + $0x38] sm:$0xff]  ;;  %11391 = vst [vmem:[#allocation94_spill] sm:$0xff] %v9415_v30  ;;  %11392 = vst [vmem:[#allocation95_spill] sm:$0xff] %v9417_v56  ;;  %v3940_v0 = vld [vmem:[%s10582_s4 + $0x40] sm:$0xff]  ;;  %v9427_v42 = vpack.c.bf16 %v3980_v8, %v3977_v36  ;;  %v10869_v50 = vand.u32 4294901760, %v9391_v2 }
 0x196   : > { %v5702_v47 = vpop.f32.mrb[37].mxu1  ;;  %11394 = vst [vmem:[#allocation100_spill] sm:$0xff] %v9429_v40  ;;  %v3986_v11 = vand.u32 4294901760, %v3939_v5  ;;  %v9473_v8 = vld [vmem:[%s10582_s4 + $0xe0] sm:$0xff] }
 0x197   : > { %v1503_v23 = vadd.f32 %v5650_v26, %v9290_v57  ;;  %v5651_v39 = vpop.f32.mrb[40].mxu0  ;;  %v5703_v35 = vadd.f32 %v5702_v47, %v5701_v60  ;;  %v9379_v57 = vpack.c.bf16 %v10875_v24, %v10876_v49  ;;  %11393 = vst [vmem:[#allocation99_spill] sm:$0xff] %v9427_v42  ;;  %v9442_v47 = vld [vmem:[%s10582_s4 + $0xd0] sm:$0xff]  ;;  %v9449_v9 = vpack.c.bf16 %v10869_v50, %v10872_v43  ;;  %v9491_v50 = vld [vmem:[%s10582_s4 + $0xe8] sm:$0xff] }
 0x198   : > { %v5652_v16 = vpop.f32.mrb[41].mxu0  ;;  %v9463_v36 = vpack.c.bf16 %v3986_v11, %v3983_v6  ;;  %v9508_v43 = vld [vmem:[%s10582_s4 + $0xf0] sm:$0xff] }
 0x199   : > { %11387 = vst [vmem:[#allocation90_spill] sm:$0xff] %v9379_v57  ;;  %v5653_v52 = vadd.f32 %v5652_v16, %v5651_v39  ;;  %v9384_v13 = vadd.f32 %v5703_v35, %v1496_v4  ;;  %v5704_v3 = vpop.f32.mrb[38].mxu1  ;;  %7140 = vmatprep.subr.bf16.mxu1 %v9379_v57  ;;  %v9422_v4 = vld [vmem:[%s10582_s4 + $0xc8] sm:$0xff]  ;;  %11395 = vst [vmem:[#allocation86_spill] sm:$0xff] %v9449_v9  ;;  %v3989_v35 = vand.u32 4294901760, %v3940_v0  ;;  %v3942_v16 = vld [vmem:[%s10582_s4 + $0x50] sm:$0xff] }
 0x19a   : > { %v5705_v37 = vpop.f32.mrb[39].mxu1  ;;  %7142 = vmatpush3.bf16.msra.mxu1 %v9397_v28  ;;  %v10870_v39 = vand.u32 4294901760, %v9422_v4  ;;  %11397 = vst [vmem:[#allocation101_spill] sm:$0xff] %v9463_v36  ;;  %v3946_v49 = vld [vmem:[%s10582_s4 + $0x70] sm:$0xff]  ;;  %v11412_v28 = vand.u32 4294901760, %v9508_v43  ;;  %v11415_v57 = vand.u32 4294901760, %v9305_v18 }
 0x19b   : > { %v1510_v29 = vadd.f32 %v5653_v52, %v9292_v22  ;;  %v5654_v48 = vpop.f32.mrb[42].mxu0  ;;  %v5706_v58 = vadd.f32 %v5705_v37, %v5704_v3  ;;  %7144 = vmatprep.subr.bf16.mxu1 %v9415_v30  ;;  %v3943_v37 = vld [vmem:[%s10582_s4 + $0x58] sm:$0xff] }
 0x19c   : > { %v5655_v22 = vpop.f32.mrb[43].mxu0 }
 0x19d   : > { %v5656_v17 = vadd.f32 %v5655_v22, %v5654_v48  ;;  %v9432_v26 = vadd.f32 %v5706_v58, %v1503_v23  ;;  %v5707_v60 = vpop.f32.mrb[40].mxu1  ;;  %v9451_v23 = vsub.f32 %v3938_v38, %v3983_v6  ;;  %v9465_v38 = vsub.f32 %v3939_v5, %v3986_v11 }
 0x19e   : > { %v5708_v20 = vpop.f32.mrb[41].mxu1  ;;  %v3992_v58 = vand.u32 4294901760, %v3941_v15  ;;  %v9481_v22 = vsub.f32 %v3940_v0, %v3989_v35  ;;  %v10878_v5 = vand.u32 4294901760, %v9442_v47  ;;  %7146 = vmatpush3.bf16.msra.mxu1 %v9427_v42  ;;  %v10877_v11 = vand.u32 4294901760, %v9457_v27  ;;  %v3944_v0 = vld [vmem:[%s10582_s4 + $0x60] sm:$0xff] }
 0x19f   : > { %11396 = vst [vmem:[#allocation88_spill] sm:$0xff] %v9451_v23  ;;  %v1517_v21 = vadd.f32 %v5656_v17, %v9294_v25  ;;  %v5657_v52 = vpop.f32.mrb[44].mxu0  ;;  %v5709_v3 = vadd.f32 %v5708_v20, %v5707_v60  ;;  %11398 = vst [vmem:[#allocation105_spill] sm:$0xff] %v9465_v38  ;;  %v9479_v25 = vpack.c.bf16 %v10870_v39, %v10871_v10  ;;  %v3995_v20 = vand.u32 4294901760, %v3942_v16  ;;  %v3945_v10 = vld [vmem:[%s10582_s4 + $0x68] sm:$0xff] }
 0x1a0   : > { %v5658_v48 = vpop.f32.mrb[45].mxu0  ;;  %11400 = vst [vmem:[#allocation92_spill] sm:$0xff] %v9481_v22  ;;  %7148 = vmatprep.subr.bf16.mxu1 %v9449_v9  ;;  %v4004_v19 = vand.u32 4294901760, %v3945_v10  ;;  %v3947_v9 = vld [vmem:[%s10582_s4 + $0x78] sm:$0xff] }
 0x1a1   : > { %11399 = vst [vmem:[#allocation91_spill] sm:$0xff] %v9479_v25  ;;  %v5659_v6 = vadd.f32 %v5658_v48, %v5657_v52  ;;  %v9484_v17 = vadd.f32 %v5709_v3, %v1510_v29  ;;  %v5710_v60 = vpop.f32.mrb[42].mxu1  ;;  %v9497_v29 = vpack.c.bf16 %v3992_v58, %v3989_v35  ;;  %v9499_v52 = vsub.f32 %v3941_v15, %v3992_v58  ;;  %v9522_v58 = vld [vmem:[%s10582_s4 + $0xf8] sm:$0xff] }
 0x1a2   : > { %v5711_v39 = vpop.f32.mrb[43].mxu1  ;;  %v3998_v3 = vand.u32 4294901760, %v3943_v37  ;;  %v9515_v15 = vpack.c.bf16 %v10877_v11, %v10878_v5  ;;  %v9517_v35 = vsub.f32 %v3942_v16, %v3995_v20  ;;  %v4001_v11 = vand.u32 4294901760, %v3944_v0  ;;  %7150 = vmatpush3.bf16.msra.mxu1 %v9463_v36 }
 0x1a3   : > { %11401 = vst [vmem:[#allocation102_spill] sm:$0xff] %v9497_v29  ;;  %11402 = vst [vmem:[#allocation93_spill] sm:$0xff] %v9499_v52  ;;  %v1524_v59 = vadd.f32 %v5659_v6, %v9296_v7  ;;  %v5660_v34 = vpop.f32.mrb[46].mxu0  ;;  %v5712_v24 = vadd.f32 %v5711_v39, %v5710_v60  ;;  %v10893_v60 = vand.u32 4294901760, %v9491_v50  ;;  %7152 = vmatprep.subr.bf16.mxu1 %v9479_v25 }
 0x1a4   : > { %11403 = vst [vmem:[#allocation103_spill] sm:$0xff] %v9515_v15  ;;  %11404 = vst [vmem:[#allocation98_spill] sm:$0xff] %v9517_v35  ;;  %v5661_v7 = vpop.f32.mrb[47].mxu0  ;;  %v9527_v6 = vpack.c.bf16 %v3998_v3, %v3995_v20  ;;  %v9529_v39 = vsub.f32 %v3943_v37, %v3998_v3  ;;  %v11407_v37 = vand.u32 4294901760, %v9473_v8  ;;  %v4007_v3 = vand.u32 4294901760, %v3946_v49 }
 0x1a5   : > { %v5662_v5 = vadd.f32 %v5661_v7, %v5660_v34  ;;  %v9532_v16 = vadd.f32 %v5712_v24, %v1517_v21  ;;  %v5713_v1 = vpop.f32.mrb[44].mxu1  ;;  %v9546_v24 = vsub.f32 %v3944_v0, %v4001_v11  ;;  %v10896_v21 = vand.u32 4294901760, %v9522_v58 }
 0x1a6   : > { %11405 = vst [vmem:[#allocation107_spill] sm:$0xff] %v9527_v6  ;;  %11406 = vst [vmem:[#allocation113_spill] sm:$0xff] %v9529_v39  ;;  %v5714_v20 = vpop.f32.mrb[45].mxu1  ;;  %v9544_v34 = vpack.c.bf16 %v10893_v60, %v11407_v37  ;;  %v9550_v42 = vpack.c.bf16 %v4004_v19, %v4001_v11  ;;  %v9552_v30 = vsub.f32 %v3945_v10, %v4004_v19  ;;  %v4010_v0 = vand.u32 4294901760, %v3947_v9 }
 0x1a7   : > { %11409 = vst [vmem:[#allocation14_spill] sm:$0xff] %v9546_v24  ;;  %v1531_v7 = vadd.f32 %v5662_v5, %v9298_v44  ;;  %v5751_v48 = vpop.f32.mrb[48].mxu0  ;;  %v5715_v36 = vadd.f32 %v5714_v20, %v5713_v1  ;;  %v9558_v37 = vpack.c.bf16 %v10896_v21, %v11412_v28  ;;  %v9560_v60 = vsub.f32 %v3946_v49, %v4007_v3 }
 0x1a8   : > { %11408 = vst [vmem:[#allocation22_spill] sm:$0xff] %v9544_v34  ;;  %11410 = vst [vmem:[#allocation16_spill] sm:$0xff] %v9550_v42  ;;  %v5752_v25 = vpop.f32.mrb[49].mxu0  ;;  %v9565_v44 = vsub.f32 %v9305_v18, %v11415_v57  ;;  %7154 = vmatpush3.bf16.msra.mxu1 %v9497_v29  ;;  %v11417_v10 = vand.u32 4294901760, %v9310_v53  ;;  %v10897_v28 = vand.u32 4294901760, %v9345_v61  ;;  %v9577_v20 = vpack.c.bf16 %v4010_v0, %v4007_v3 }
 0x1a9   : > { %11411 = vst [vmem:[#allocation18_spill] sm:$0xff] %v9552_v30  ;;  %11413 = vst [vmem:[#allocation10_spill] sm:$0xff] %v9558_v37  ;;  %v9567_v1 = vadd.f32 %v5715_v36, %v1524_v59  ;;  %v5753_v5 = vadd.f32 %v5752_v25, %v5751_v48  ;;  %v5716_v19 = vpop.f32.mrb[46].mxu1  ;;  %7156 = vmatprep.subr.bf16.mxu1 %v9515_v15  ;;  %v9579_v18 = vsub.f32 %v3947_v9, %v4010_v0 }
 0x1aa   : > { %11414 = vst [vmem:[#allocation19_spill] sm:$0xff] %v9560_v60  ;;  %11416 = vst [vmem:[#allocation17_spill] sm:$0xff] %v9565_v44  ;;  %v9573_v11 = vsub.f32 %v9310_v53, %v11417_v10  ;;  %v5717_v49 = vpop.f32.mrb[47].mxu1  ;;  %v10898_v57 = vand.u32 4294901760, %v9565_v44  ;;  %v10899_v59 = vand.u32 4294901760, %v9364_v32  ;;  %v4185_v10 = vsub.f32 %v9345_v61, %v10897_v28 }
 0x1ab   : > { %11419 = vst [vmem:[#allocation11_spill] sm:$0xff] %v9577_v20  ;;  %11420 = vst [vmem:[#allocation96_spill] sm:$0xff] %v9579_v18  ;;  %v1796_v36 = vadd.f32 %v5753_v5, %v9300_v62  ;;  %v5754_v25 = vpop.f32.mrb[50].mxu0  ;;  %v5718_v48 = vadd.f32 %v5717_v49, %v5716_v19  ;;  %v11421_v0 = vand.u32 4294901760, %v9323_v33  ;;  %v11423_v5 = vand.u32 4294901760, %v9330_v55 }
 0x1ac   : > { %11418 = vst [vmem:[#allocation114_spill] sm:$0xff] %v9573_v11  ;;  %v5755_v21 = vpop.f32.mrb[51].mxu0  ;;  %v4297_v9 = vsub.f32 %v9565_v44, %v10898_v57  ;;  %v4192_v3 = vsub.f32 %v9364_v32, %v10899_v59  ;;  %7158 = vmatpush3.bf16.msra.mxu1 %v9527_v6  ;;  %v11425_v57 = vand.u32 4294901760, %v9573_v11  ;;  %v4186_v15 = vand.u32 4294901760, %v4185_v10 }
 0x1ad   : > { %v9597_v62 = vsub.f32 %v9323_v33, %v11421_v0  ;;  %v9602_v19 = vsub.f32 %v9330_v55, %v11423_v5  ;;  %v9604_v49 = vadd.f32 %v5718_v48, %v1531_v7  ;;  %v5756_v28 = vadd.f32 %v5755_v21, %v5754_v25  ;;  %v5807_v53 = vpop.f32.mrb[48].mxu1  ;;  %7160 = vmatprep.subr.bf16.mxu1 %v9544_v34 }
 0x1ae   : > { %v4304_v59 = vsub.f32 %v9573_v11, %v11425_v57  ;;  %v5808_v29 = vpop.f32.mrb[49].mxu1  ;;  %v4298_v33 = vand.u32 4294901760, %v4297_v9  ;;  %v4193_v0 = vand.u32 4294901760, %v4192_v3  ;;  %v10912_v5 = vand.u32 4294901760, %v9381_v31 }
 0x1af   : > { %11422 = vst [vmem:[#allocation97_spill] sm:$0xff] %v9597_v62  ;;  %11424 = vst [vmem:[#allocation104_spill] sm:$0xff] %v9602_v19  ;;  %v10914_v45 = vand.u32 4294901760, %v9597_v62  ;;  %v10913_v55 = vand.u32 4294901760, %v9602_v19  ;;  %v1811_v7 = vadd.f32 %v5756_v28, %v9325_v14  ;;  %v5757_v21 = vpop.f32.mrb[52].mxu0  ;;  %v5809_v25 = vadd.f32 %v5808_v29, %v5807_v53 }
 0x1b0   : > { %v4305_v48 = vand.u32 4294901760, %v4304_v59  ;;  %v5758_v6 = vpop.f32.mrb[53].mxu0  ;;  %v7169_v12 = vpack.c.bf16 %v4193_v0, %v4186_v15  ;;  %v10915_v9 = vand.u32 4294901760, %v9399_v51  ;;  %7162 = vmatpush3.bf16.msra.mxu1 %v9550_v42  ;;  %v4199_v15 = vsub.f32 %v9381_v31, %v10912_v5 }
 0x1b1   : > { %v4311_v57 = vsub.f32 %v9597_v62, %v10914_v45  ;;  %v4318_v10 = vsub.f32 %v9602_v19, %v10913_v55  ;;  %v5759_v3 = vadd.f32 %v5758_v6, %v5757_v21  ;;  %v9622_v34 = vadd.f32 %v5809_v25, %v1796_v36  ;;  %v5810_v14 = vpop.f32.mrb[50].mxu1  ;;  %7164 = vmatprep.subr.bf16.mxu1 %v9558_v37 }
 0x1b2   : > { %v7167_v29 = vpack.c.bf16 %v4305_v48, %v4298_v33  ;;  %v5811_v28 = vpop.f32.mrb[51].mxu1  ;;  %v4206_v0 = vsub.f32 %v9399_v51, %v10915_v9  ;;  %v11426_v6 = vand.u32 4294901760, %v9351_v63  ;;  %v4200_v48 = vand.u32 4294901760, %v4199_v15 }
 0x1b3   : > { %v4312_v59 = vand.u32 4294901760, %v4311_v57  ;;  %v4319_v53 = vand.u32 4294901760, %v4318_v10  ;;  %v1826_v33 = vadd.f32 %v5759_v3, %v9384_v13  ;;  %v5760_v21 = vpop.f32.mrb[54].mxu0  ;;  %v5812_v25 = vadd.f32 %v5811_v28, %v5810_v14 }
 0x1b4   : > { %v9635_v36 = vsub.f32 %v9351_v63, %v11426_v6  ;;  %v11428_v5 = vand.u32 4294901760, %v9356_v41  ;;  %v5761_v57 = vpop.f32.mrb[55].mxu0  ;;  %v4207_v45 = vand.u32 4294901760, %v4206_v0  ;;  %v10920_v37 = vand.u32 4294901760, %v9417_v56  ;;  %7166 = vmatpush3.bf16.msra.mxu1 %v9577_v20 }
 0x1b5   : > { %v7171_v10 = vpack.c.bf16 %v4319_v53, %v4312_v59  ;;  %v5762_v42 = vadd.f32 %v5761_v57, %v5760_v21  ;;  %v9645_v63 = vadd.f32 %v5812_v25, %v1811_v7  ;;  %v5813_v6 = vpop.f32.mrb[52].mxu1  ;;  %v10921_v3 = vand.u32 4294901760, %v9429_v40  ;;  %7168 = vmatprep.subr.bf16.mxu1 %v7167_v29  ;;  %v11432_v25 = vld [vmem:[#allocation32_spill] sm:$0xff] }
 0x1b6   : > { %11427 = vst [vmem:[#allocation106_spill] sm:$0xff] %v9635_v36  ;;  %v9641_v55 = vsub.f32 %v9356_v41, %v11428_v5  ;;  %v10923_v9 = vand.u32 4294901760, %v9635_v36  ;;  %v5814_v14 = vpop.f32.mrb[53].mxu1  ;;  %v7173_v41 = vpack.c.bf16 %v4207_v45, %v4200_v48  ;;  %v4213_v15 = vsub.f32 %v9417_v56, %v10920_v37  ;;  %v11435_v37 = vld [vmem:[#allocation40_spill] sm:$0xff] }
 0x1b7   : > { %v11430_v7 = vand.u32 4294901760, %v9372_v46  ;;  %v1841_v59 = vadd.f32 %v5762_v42, %v9432_v26  ;;  %v5763_v53 = vpop.f32.mrb[56].mxu0  ;;  %v5815_v0 = vadd.f32 %v5814_v14, %v5813_v6  ;;  %v4220_v29 = vsub.f32 %v9429_v40, %v10921_v3  ;;  %4071 = vmatmul.mubr.f32.vlgmr.msra.gmra.mrb[96].mxu1 %v11432_v25 }
 0x1b8   : > { %11429 = vst [vmem:[#allocation108_spill] sm:$0xff] %v9641_v55  ;;  %v10922_v13 = vand.u32 4294901760, %v9641_v55  ;;  %v4325_v5 = vsub.f32 %v9635_v36, %v10923_v9  ;;  %v5764_v21 = vpop.f32.mrb[57].mxu0  ;;  %v4214_v57 = vand.u32 4294901760, %v4213_v15  ;;  %7170 = vmatpush3.bf16.msra.mxu1 %v7169_v12  ;;  %4080 = vmatprep.mubr.f32.mxu1 %v11435_v37 }
 0x1b9   : > { %v9659_v28 = vsub.f32 %v9372_v46, %v11430_v7  ;;  %v11433_v7 = vand.u32 4294901760, %v9391_v2  ;;  %v5765_v26 = vadd.f32 %v5764_v21, %v5763_v53  ;;  %v9675_v6 = vadd.f32 %v5815_v0, %v1826_v33  ;;  %v5816_v14 = vpop.f32.mrb[54].mxu1  ;;  %7172 = vmatprep.subr.bf16.mxu1 %v7171_v10 }
 0x1ba   : > { %v4332_v45 = vsub.f32 %v9641_v55, %v10922_v13  ;;  %v4326_v48 = vand.u32 4294901760, %v4325_v5  ;;  %v4221_v13 = vand.u32 4294901760, %v4220_v29  ;;  %v5817_v9 = vpop.f32.mrb[55].mxu1  ;;  %v10926_v53 = vand.u32 4294901760, %v9465_v38  ;;  %v11436_v29 = vld [vmem:[#allocation41_spill] sm:$0xff] }
 0x1bb   : > { %11431 = vst [vmem:[#allocation109_spill] sm:$0xff] %v9659_v28  ;;  %v10931_v46 = vand.u32 4294901760, %v9659_v28  ;;  %v9673_v42 = vsub.f32 %v9391_v2, %v11433_v7  ;;  %v10924_v2 = vand.u32 4294901760, %v9451_v23  ;;  %v1856_v33 = vadd.f32 %v5765_v26, %v9484_v17  ;;  %v5766_v0 = vpop.f32.mrb[58].mxu0  ;;  %4086 = vmatmul.mubr.f32.gmra.mrb[98].mxu1 %v11436_v29 }
 0x1bc   : > { %v4333_v3 = vand.u32 4294901760, %v4332_v45  ;;  %v5818_v12 = vadd.f32 %v5817_v9, %v5816_v14  ;;  %v7177_v37 = vpack.c.bf16 %v4221_v13, %v4214_v57  ;;  %v5767_v45 = vpop.f32.mrb[59].mxu0  ;;  %v4234_v17 = vsub.f32 %v9465_v38, %v10926_v53  ;;  %7174 = vmatpush3.bf16.msra.mxu1 %v7173_v41 }
 0x1bd   : > { %11434 = vst [vmem:[#allocation110_spill] sm:$0xff] %v9673_v42  ;;  %v4339_v5 = vsub.f32 %v9659_v28, %v10931_v46  ;;  %v10925_v15 = vand.u32 4294901760, %v9673_v42  ;;  %v4227_v7 = vsub.f32 %v9451_v23, %v10924_v2  ;;  %v5768_v26 = vadd.f32 %v5767_v45, %v5766_v0  ;;  %v5819_v13 = vpop.f32.mrb[56].mxu1 }
 0x1be   : > { %v7175_v21 = vpack.c.bf16 %v4333_v3, %v4326_v48  ;;  %v9695_v9 = vadd.f32 %v5818_v12, %v1841_v59  ;;  %v11437_v3 = vld [vmem:[#allocation51_spill] sm:$0xff]  ;;  %v11438_v48 = vand.u32 4294901760, %v9408_v54  ;;  %v10927_v14 = vand.u32 4294901760, %v9481_v22 }
 0x1bf   : > { %v4340_v10 = vand.u32 4294901760, %v4339_v5  ;;  %v4346_v25 = vsub.f32 %v9673_v42, %v10925_v15  ;;  %4095 = vmatprep.mubr.f32.mxu1 %v11437_v3  ;;  %v5820_v5 = vpop.f32.mrb[57].mxu1  ;;  %v4228_v2 = vand.u32 4294901760, %v4227_v7  ;;  %v4235_v15 = vand.u32 4294901760, %v4234_v17  ;;  %v5769_v12 = vpop.f32.mrb[60].mxu0 }
 0x1c0   : > { %v9701_v57 = vsub.f32 %v9408_v54, %v11438_v48  ;;  %7176 = vmatprep.subr.bf16.mxu1 %v7175_v21  ;;  %v11440_v0 = vand.u32 4294901760, %v9422_v4  ;;  %v1871_v41 = vadd.f32 %v5768_v26, %v9532_v16  ;;  %v5821_v45 = vadd.f32 %v5820_v5, %v5819_v13  ;;  %v5770_v48 = vpop.f32.mrb[61].mxu0  ;;  %v11442_v21 = vld [vmem:[#allocation57_spill] sm:$0xff]  ;;  %v11443_v26 = vld [vmem:[#allocation64_spill] sm:$0xff] }
 0x1c1   : > { %v4347_v29 = vand.u32 4294901760, %v4346_v25  ;;  %v4241_v54 = vsub.f32 %v9481_v22, %v10927_v14  ;;  %4101 = vmatmul.mubr.f32.gmra.mrb[100].mxu1 %v11442_v21  ;;  %v7181_v7 = vpack.c.bf16 %v4235_v15, %v4228_v2  ;;  %v5822_v16 = vpop.f32.mrb[58].mxu1  ;;  %v10933_v21 = vand.u32 4294901760, %v9517_v35 }
 0x1c2   : > { %11439 = vst [vmem:[#allocation111_spill] sm:$0xff] %v9701_v57  ;;  %v9707_v59 = vsub.f32 %v9422_v4, %v11440_v0  ;;  %v10930_v3 = vand.u32 4294901760, %v9701_v57  ;;  %v10928_v4 = vand.u32 4294901760, %v9499_v52  ;;  %v5771_v0 = vadd.f32 %v5770_v48, %v5769_v12  ;;  %7178 = vmatpush3.bf16.msra.mxu1 %v7177_v37  ;;  %4110 = vmatprep.mubr.f32.mxu1 %v11443_v26  ;;  %v5823_v14 = vpop.f32.mrb[59].mxu1  ;;  %v11448_v26 = vld [vmem:[#allocation65_spill] sm:$0xff] }
 0x1c3   : > { %v7179_v25 = vpack.c.bf16 %v4347_v29, %v4340_v10  ;;  %v9717_v53 = vadd.f32 %v5821_v45, %v1856_v33  ;;  %v4242_v5 = vand.u32 4294901760, %v4241_v54  ;;  %v11444_v33 = vand.u32 4294901760, %v9442_v47  ;;  %v5772_v45 = vpop.f32.mrb[62].mxu0 }
 0x1c4   : > { %11441 = vst [vmem:[#allocation112_spill] sm:$0xff] %v9707_v59  ;;  %v10929_v17 = vand.u32 4294901760, %v9707_v59  ;;  %v4353_v13 = vsub.f32 %v9701_v57, %v10930_v3  ;;  %v4248_v2 = vsub.f32 %v9499_v52, %v10928_v4  ;;  %v11446_v10 = vand.u32 4294901760, %v9457_v27 }
 0x1c5   : > { %7180 = vmatprep.subr.bf16.mxu1 %v7179_v25  ;;  %v9732_v37 = vsub.f32 %v9442_v47, %v11444_v33  ;;  %v1886_v12 = vadd.f32 %v5771_v0, %v9567_v1  ;;  %v5824_v54 = vadd.f32 %v5823_v14, %v5822_v16  ;;  %v5773_v25 = vpop.f32.mrb[63].mxu0  ;;  %4116 = vmatmul.mubr.f32.gmra.mrb[102].mxu1 %v11448_v26  ;;  %v11449_v1 = vld [vmem:[#allocation67_spill] sm:$0xff]  ;;  %v10932_v0 = vand.u32 4294901760, %v9529_v39 }
 0x1c6   : > { %v4360_v15 = vsub.f32 %v9707_v59, %v10929_v17  ;;  %v9737_v29 = vsub.f32 %v9457_v27, %v11446_v10  ;;  %v4354_v48 = vand.u32 4294901760, %v4353_v13  ;;  %v4249_v17 = vand.u32 4294901760, %v4248_v2  ;;  %v5825_v27 = vpop.f32.mrb[60].mxu1  ;;  %7182 = vmatpush3.bf16.msra.mxu1 %v7181_v7  ;;  %4125 = vmatprep.mubr.f32.mxu1 %v11449_v1 }
 0x1c7   : > { %11445 = vst [vmem:[#allocation15_spill] sm:$0xff] %v9732_v37  ;;  %v10942_v47 = vand.u32 4294901760, %v9732_v37  ;;  %v5774_v3 = vadd.f32 %v5773_v25, %v5772_v45  ;;  %v9744_v46 = vadd.f32 %v5824_v54, %v1871_v41  ;;  %v4255_v14 = vsub.f32 %v9517_v35, %v10933_v21  ;;  %v5826_v16 = vpop.f32.mrb[61].mxu1  ;;  %v5863_v10 = vpop.f32.mrb[64].mxu0 }
 0x1c8   : > { %11447 = vst [vmem:[#allocation31_spill] sm:$0xff] %v9737_v29  ;;  %v4361_v4 = vand.u32 4294901760, %v4360_v15  ;;  %v10941_v33 = vand.u32 4294901760, %v9737_v29  ;;  %v7185_v15 = vpack.c.bf16 %v4249_v17, %v4242_v5  ;;  %v5827_v45 = vadd.f32 %v5826_v16, %v5825_v27  ;;  %v5864_v26 = vpop.f32.mrb[65].mxu0 }
 0x1c9   : > { %v4367_v2 = vsub.f32 %v9732_v37, %v10942_v47  ;;  %v1901_v7 = vadd.f32 %v5774_v3, %v9604_v49  ;;  %v4256_v54 = vand.u32 4294901760, %v4255_v14  ;;  %v4262_v25 = vsub.f32 %v9529_v39, %v10932_v0  ;;  %v5828_v16 = vpop.f32.mrb[62].mxu1  ;;  %v11455_v0 = vld [vmem:[#allocation75_spill] sm:$0xff] }
 0x1ca   : > { %v7183_v13 = vpack.c.bf16 %v4361_v4, %v4354_v48  ;;  %v4374_v41 = vsub.f32 %v9737_v29, %v10941_v33  ;;  %v11450_v4 = vld [vmem:[#allocation71_spill] sm:$0xff]  ;;  %v11451_v48 = vand.u32 4294901760, %v9473_v8  ;;  %v11453_v49 = vand.u32 4294901760, %v9491_v50 }
 0x1cb   : > { %4131 = vmatmul.mubr.f32.gmra.mrb[104].mxu1 %v11450_v4  ;;  %v4368_v17 = vand.u32 4294901760, %v4367_v2  ;;  %v9772_v27 = vadd.f32 %v5827_v45, %v1886_v12  ;;  %v5865_v14 = vadd.f32 %v5864_v26, %v5863_v10  ;;  %v10934_v2 = vand.u32 4294901760, %v9546_v24  ;;  %v5866_v12 = vpop.f32.mrb[66].mxu0 }
 0x1cc   : > { %7184 = vmatprep.subr.bf16.mxu1 %v7183_v13  ;;  %v4375_v5 = vand.u32 4294901760, %v4374_v41  ;;  %v9765_v1 = vsub.f32 %v9473_v8, %v11451_v48  ;;  %v9770_v3 = vsub.f32 %v9491_v50, %v11453_v49  ;;  %4140 = vmatprep.mubr.f32.mxu1 %v11455_v0  ;;  %v4263_v13 = vand.u32 4294901760, %v4262_v25  ;;  %v5829_v41 = vpop.f32.mrb[63].mxu1  ;;  %v11456_v25 = vld [vmem:[#allocation79_spill] sm:$0xff] }
 0x1cd   : > { %7186 = vmatpush3.bf16.msra.mxu1 %v7185_v15  ;;  %v10937_v21 = vand.u32 4294901760, %v9552_v30  ;;  %v2320_v50 = vadd.f32 %v5865_v14, %v9622_v34  ;;  %v5830_v45 = vadd.f32 %v5829_v41, %v5828_v16  ;;  %v4269_v0 = vsub.f32 %v9546_v24, %v10934_v2  ;;  %v5867_v15 = vpop.f32.mrb[67].mxu0  ;;  %v5919_v14 = vpop.f32.mrb[64].mxu1  ;;  %v11457_v16 = vld [vmem:[#allocation81_spill] sm:$0xff] }
 0x1ce   : > { %11452 = vst [vmem:[#allocation32_spill] sm:$0xff] %v9765_v1  ;;  %11454 = vst [vmem:[#allocation40_spill] sm:$0xff] %v9770_v3  ;;  %v7187_v4 = vpack.c.bf16 %v4375_v5, %v4368_v17  ;;  %v10936_v8 = vand.u32 4294901760, %v9765_v1  ;;  %v10935_v48 = vand.u32 4294901760, %v9770_v3  ;;  %v7189_v10 = vpack.c.bf16 %v4263_v13, %v4256_v54 }
 0x1cf   : > { %4146 = vmatmul.mubr.f32.gmra.mrb[106].mxu1 %v11456_v25  ;;  %v4276_v34 = vsub.f32 %v9552_v30, %v10937_v21  ;;  %v10938_v54 = vand.u32 4294901760, %v9560_v60  ;;  %v9794_v5 = vadd.f32 %v5830_v45, %v1901_v7  ;;  %v5868_v49 = vadd.f32 %v5867_v15, %v5866_v12  ;;  %v5920_v25 = vpop.f32.mrb[65].mxu1  ;;  %v5869_v45 = vpop.f32.mrb[68].mxu0 }
 0x1d0   : > { %7188 = vmatprep.subr.bf16.mxu1 %v7187_v4  ;;  %v4381_v26 = vsub.f32 %v9765_v1, %v10936_v8  ;;  %v4388_v17 = vsub.f32 %v9770_v3, %v10935_v48  ;;  %4155 = vmatprep.mubr.f32.mxu1 %v11457_v16  ;;  %v4270_v13 = vand.u32 4294901760, %v4269_v0  ;;  %v11458_v41 = vand.u32 4294901760, %v9508_v43  ;;  %v5870_v15 = vpop.f32.mrb[69].mxu0  ;;  %v11462_v16 = vld [vmem:[#allocation12_spill] sm:$0xff] }
 0x1d1   : > { %7190 = vmatpush3.bf16.msra.mxu1 %v7189_v10  ;;  %v4277_v8 = vand.u32 4294901760, %v4276_v34  ;;  %v11460_v21 = vand.u32 4294901760, %v9522_v58  ;;  %v2329_v12 = vadd.f32 %v5868_v49, %v9645_v63  ;;  %v5921_v10 = vadd.f32 %v5920_v25, %v5919_v14  ;;  %v5922_v63 = vpop.f32.mrb[66].mxu1  ;;  %v11463_v49 = vld [vmem:[#allocation13_spill] sm:$0xff] }
 0x1d2   : > { %v9800_v4 = vsub.f32 %v9508_v43, %v11458_v41  ;;  %v4382_v2 = vand.u32 4294901760, %v4381_v26  ;;  %v4389_v48 = vand.u32 4294901760, %v4388_v17  ;;  %v4283_v43 = vsub.f32 %v9560_v60, %v10938_v54  ;;  %v5923_v25 = vpop.f32.mrb[67].mxu1 }
 0x1d3   : > { %v9805_v7 = vsub.f32 %v9522_v58, %v11460_v21  ;;  %4161 = vmatmul.mubr.f32.gmra.mrb[108].mxu1 %v11462_v16  ;;  %v7193_v17 = vpack.c.bf16 %v4277_v8, %v4270_v13  ;;  %v10943_v58 = vand.u32 4294901760, %v9579_v18  ;;  %v5871_v21 = vadd.f32 %v5870_v15, %v5869_v45  ;;  %v5872_v13 = vpop.f32.mrb[70].mxu0  ;;  %v11464_v16 = vld [vmem:[#allocation20_spill] sm:$0xff] }
 0x1d4   : > { %11459 = vst [vmem:[#allocation41_spill] sm:$0xff] %v9800_v4  ;;  %v10939_v0 = vand.u32 4294901760, %v9800_v4  ;;  %v7191_v26 = vpack.c.bf16 %v4389_v48, %v4382_v2  ;;  %v9815_v41 = vadd.f32 %v5921_v10, %v2320_v50  ;;  %4170 = vmatprep.mubr.f32.mxu1 %v11463_v49  ;;  %v4284_v8 = vand.u32 4294901760, %v4283_v43  ;;  %v5873_v15 = vpop.f32.mrb[71].mxu0  ;;  %v11465_v43 = vld [vmem:[#allocation23_spill] sm:$0xff] }
 0x1d5   : > { %11461 = vst [vmem:[#allocation51_spill] sm:$0xff] %v9805_v7  ;;  %v10940_v34 = vand.u32 4294901760, %v9805_v7  ;;  %v4290_v48 = vsub.f32 %v9579_v18, %v10943_v58  ;;  %v2338_v50 = vadd.f32 %v5871_v21, %v9675_v6  ;;  %v5924_v45 = vadd.f32 %v5923_v25, %v5922_v63 }
 0x1d6   : > { %v4395_v14 = vsub.f32 %v9800_v4, %v10939_v0  ;;  %7192 = vmatprep.subr.bf16.mxu1 %v7191_v26  ;;  %v5874_v54 = vadd.f32 %v5873_v15, %v5872_v13  ;;  %v7199_v6 = vpack.c.bf16 %v9573_v11, %v9565_v44  ;;  %v7205_v15 = vpack.c.bf16 %v9399_v51, %v9381_v31  ;;  %v11505_v31 = vld [vmem:[#allocation62_spill] sm:$0xff] }
 0x1d7   : > { %v4402_v2 = vsub.f32 %v9805_v7, %v10940_v34  ;;  %7194 = vmatpush3.bf16.msra.mxu1 %v7193_v17  ;;  %v4291_v26 = vand.u32 4294901760, %v4290_v48  ;;  %v9829_v0 = vadd.f32 %v5924_v45, %v2329_v12  ;;  %v5925_v34 = vpop.f32.mrb[68].mxu1  ;;  %v5875_v21 = vpop.f32.mrb[72].mxu0  ;;  %v7201_v48 = vpack.c.bf16 %v9364_v32, %v9345_v61  ;;  %v11508_v32 = vld [vmem:[#allocation22_spill] sm:$0xff] }
 0x1d8   : > { %v4396_v10 = vand.u32 4294901760, %v4395_v14  ;;  %4176 = vmatmul.mubr.f32.gmra.mrb[110].mxu1 %v11464_v16  ;;  %v5926_v33 = vpop.f32.mrb[69].mxu1  ;;  %v2347_v17 = vadd.f32 %v5874_v54, %v9695_v9  ;;  %v5876_v14 = vpop.f32.mrb[73].mxu0 }
 0x1d9   : > { %v4403_v49 = vand.u32 4294901760, %v4402_v2  ;;  %4406 = vmatprep.mubr.f32.mxu1 %v11465_v43  ;;  %v7197_v58 = vpack.c.bf16 %v4291_v26, %v4284_v8  ;;  %v5927_v63 = vadd.f32 %v5926_v33, %v5925_v34  ;;  %v5877_v25 = vadd.f32 %v5876_v14, %v5875_v21  ;;  %v5928_v12 = vpop.f32.mrb[70].mxu1  ;;  %v11466_v34 = vld [vmem:[#allocation24_spill] sm:$0xff] }
 0x1da   : > { %v5929_v13 = vpop.f32.mrb[71].mxu1  ;;  %v7203_v8 = vpack.c.bf16 %v9602_v19, %v9597_v62  ;;  %v11507_v19 = vld [vmem:[#allocation69_spill] sm:$0xff] }
 0x1db   : > { %v7195_v47 = vpack.c.bf16 %v4403_v49, %v4396_v10  ;;  %v9835_v2 = vadd.f32 %v5927_v63, %v2338_v50  ;;  %v2356_v45 = vadd.f32 %v5877_v25, %v9717_v53  ;;  %v5878_v9 = vpop.f32.mrb[74].mxu0  ;;  %v5930_v54 = vadd.f32 %v5929_v13, %v5928_v12  ;;  %v11468_v63 = vld [vmem:[#allocation30_spill] sm:$0xff]  ;;  %v11469_v12 = vld [vmem:[#allocation37_spill] sm:$0xff] }
 0x1dc   : > { %v5879_v33 = vpop.f32.mrb[75].mxu0  ;;  %v7207_v53 = vpack.c.bf16 %v9641_v55, %v9635_v36  ;;  %v11503_v55 = vld [vmem:[#allocation61_spill] sm:$0xff]  ;;  %v11504_v36 = vld [vmem:[#allocation103_spill] sm:$0xff] }
 0x1dd   : > { %7196 = vmatprep.subr.bf16.mxu1 %v7195_v47  ;;  %v5880_v47 = vadd.f32 %v5879_v33, %v5878_v9  ;;  %v9843_v50 = vadd.f32 %v5930_v54, %v2347_v17  ;;  %v5931_v10 = vpop.f32.mrb[72].mxu1 }
 0x1de   : > { %7198 = vmatpush3.bf16.msra.mxu1 %v7197_v58  ;;  %v11467_v58 = vld [vmem:[#allocation29_spill] sm:$0xff]  ;;  %v5932_v16 = vpop.f32.mrb[73].mxu1 }
 0x1df   : > { %7200 = vmatprep.subr.bf16.mxu1 %v7199_v6  ;;  %v2365_v49 = vadd.f32 %v5880_v47, %v9744_v46  ;;  %v5881_v26 = vpop.f32.mrb[76].mxu0  ;;  %v5933_v6 = vadd.f32 %v5932_v16, %v5931_v10  ;;  %v7211_v46 = vpack.c.bf16 %v9673_v42, %v9659_v28  ;;  %v11470_v47 = vld [vmem:[#allocation39_spill] sm:$0xff]  ;;  %v11471_v16 = vld [vmem:[#allocation44_spill] sm:$0xff] }
 0x1e0   : > { %v5882_v21 = vpop.f32.mrb[77].mxu0  ;;  %v11499_v28 = vld [vmem:[#allocation52_spill] sm:$0xff] }
 0x1e1   : > { %4408 = vmatmul.mubr.f32.vlgmr.msra.gmra.mrb[112].mxu1 %v11466_v34  ;;  %v5883_v17 = vadd.f32 %v5882_v21, %v5881_v26  ;;  %v9852_v14 = vadd.f32 %v5933_v6, %v2356_v45  ;;  %v5934_v25 = vpop.f32.mrb[74].mxu1 }
 0x1e2   : > { %7202 = vmatpush3.bf16.msra.mxu1 %v7201_v48  ;;  %4413 = vmatprep.mubr.f32.mxu1 %v11467_v58  ;;  %v7209_v48 = vpack.c.bf16 %v9429_v40, %v9417_v56  ;;  %v5935_v13 = vpop.f32.mrb[75].mxu1  ;;  %v11501_v40 = vld [vmem:[#allocation55_spill] sm:$0xff]  ;;  %v11502_v56 = vld [vmem:[#allocation102_spill] sm:$0xff] }
 0x1e3   : > { %7204 = vmatprep.subr.bf16.mxu1 %v7203_v8  ;;  %v2374_v8 = vadd.f32 %v5883_v17, %v9772_v27  ;;  %v5884_v9 = vpop.f32.mrb[78].mxu0  ;;  %v5936_v54 = vadd.f32 %v5935_v13, %v5934_v25  ;;  %v7215_v27 = vpack.c.bf16 %v9707_v59, %v9701_v57  ;;  %v11472_v13 = vld [vmem:[#allocation45_spill] sm:$0xff]  ;;  %v11480_v57 = vld [vmem:[#allocation76_spill] sm:$0xff] }
 0x1e4   : > { %v5885_v33 = vpop.f32.mrb[79].mxu0 }
 0x1e5   : > { %4415 = vmatmul.mubr.f32.gmra.mrb[114].mxu1 %v11468_v63  ;;  %v5886_v45 = vadd.f32 %v5885_v33, %v5884_v9  ;;  %v9861_v10 = vadd.f32 %v5936_v54, %v2365_v49  ;;  %v11473_v54 = vld [vmem:[#allocation47_spill] sm:$0xff] }
 0x1e6   : > { %7206 = vmatpush3.bf16.msra.mxu1 %v7205_v15  ;;  %4420 = vmatprep.mubr.f32.mxu1 %v11469_v12  ;;  %v5937_v15 = vpop.f32.mrb[76].mxu1 }
 0x1e7   : > { %7208 = vmatprep.subr.bf16.mxu1 %v7207_v53  ;;  %v7213_v53 = vpack.c.bf16 %v9465_v38, %v9451_v23  ;;  %v5938_v26 = vpop.f32.mrb[77].mxu1  ;;  %v2383_v6 = vadd.f32 %v5886_v45, %v9794_v5  ;;  %v5975_v21 = vpop.f32.mrb[80].mxu0 }
 0x1e8   : > { %v5939_v17 = vadd.f32 %v5938_v26, %v5937_v15  ;;  %v5976_v25 = vpop.f32.mrb[81].mxu0  ;;  %v11474_v26 = vld [vmem:[#allocation50_spill] sm:$0xff] }
 0x1e9   : > { %4422 = vmatmul.mubr.f32.gmra.mrb[116].mxu1 %v11470_v47  ;;  %v5940_v9 = vpop.f32.mrb[78].mxu1 }
 0x1ea   : > { %7210 = vmatpush3.bf16.msra.mxu1 %v7209_v48  ;;  %4427 = vmatprep.mubr.f32.mxu1 %v11471_v16  ;;  %v9870_v49 = vadd.f32 %v5939_v17, %v2374_v8  ;;  %v5977_v48 = vadd.f32 %v5976_v25, %v5975_v21  ;;  %v5941_v33 = vpop.f32.mrb[79].mxu1 }
 0x1eb   : > { %7212 = vmatprep.subr.bf16.mxu1 %v7211_v46  ;;  %v7217_v46 = vpack.c.bf16 %v9499_v52, %v9481_v22  ;;  %v5978_v5 = vpop.f32.mrb[82].mxu0  ;;  %v5942_v45 = vadd.f32 %v5941_v33, %v5940_v9  ;;  %v11476_v52 = vld [vmem:[#allocation59_spill] sm:$0xff] }
 0x1ec   : > { %v2736_v63 = vadd.f32 %v5977_v48, %v9815_v41  ;;  %v5979_v15 = vpop.f32.mrb[83].mxu0  ;;  %v11477_v33 = vld [vmem:[#allocation63_spill] sm:$0xff] }
 0x1ed   : > { %4429 = vmatmul.mubr.f32.gmra.mrb[118].mxu1 %v11472_v13  ;;  %v9877_v58 = vadd.f32 %v5942_v45, %v2383_v6  ;;  %v5980_v8 = vadd.f32 %v5979_v15, %v5978_v5  ;;  %v6031_v21 = vpop.f32.mrb[80].mxu1 }
 0x1ee   : > { %7214 = vmatpush3.bf16.msra.mxu1 %v7213_v53  ;;  %4434 = vmatprep.mubr.f32.mxu1 %v11473_v54  ;;  %v11475_v53 = vld [vmem:[#allocation56_spill] sm:$0xff]  ;;  %v6032_v17 = vpop.f32.mrb[81].mxu1 }
 0x1ef   : > { %7216 = vmatprep.subr.bf16.mxu1 %v7215_v27  ;;  %v2743_v25 = vadd.f32 %v5980_v8, %v9829_v0  ;;  %v5981_v34 = vpop.f32.mrb[84].mxu0  ;;  %v6033_v43 = vadd.f32 %v6032_v17, %v6031_v21  ;;  %v11478_v0 = vld [vmem:[#allocation70_spill] sm:$0xff] }
 0x1f0   : > { %v5982_v27 = vpop.f32.mrb[85].mxu0 }
 0x1f1   : > { %4436 = vmatmul.mubr.f32.gmra.mrb[120].mxu1 %v11474_v26  ;;  %v5983_v41 = vadd.f32 %v5982_v27, %v5981_v34  ;;  %v2889_v48 = vadd.f32 %v6033_v43, %v2736_v63  ;;  %v6034_v9 = vpop.f32.mrb[82].mxu1  ;;  %v11479_v43 = vld [vmem:[#allocation74_spill] sm:$0xff] }
 0x1f2   : > { %7218 = vmatpush3.bf16.msra.mxu1 %v7217_v46  ;;  %4441 = vmatprep.mubr.f32.mxu1 %v11475_v53  ;;  %v6035_v6 = vpop.f32.mrb[83].mxu1 }
 0x1f3   : > { %v2750_v5 = vadd.f32 %v5983_v41, %v9835_v2  ;;  %v5984_v46 = vpop.f32.mrb[86].mxu0  ;;  %v6036_v45 = vadd.f32 %v6035_v6, %v6034_v9  ;;  %vm2941_vm1 = vcmp.gt.f32.partialorder %v2889_v48, 0.0  ;;  %v2949_v15 = vmul.f32 0.2, %v2889_v48 }
 0x1f4   : > { %v5985_v22 = vpop.f32.mrb[87].mxu0 }
 0x1f5   : > { %4443 = vmatmul.mubr.f32.gmra.mrb[122].mxu1 %v11476_v52  ;;  %v5986_v8 = vadd.f32 %v5985_v22, %v5984_v46  ;;  %v2896_v21 = vadd.f32 %v6036_v45, %v2743_v25  ;;  %v6037_v17 = vpop.f32.mrb[84].mxu1  ;;  %v9885_v59 = vsel %vm2941_vm1, %v2889_v48, %v2949_v15  ;;  %v11481_v45 = vld [vmem:[#allocation25_spill] sm:$0xff] }
 0x1f6   : > { %4448 = vmatprep.mubr.f32.mxu1 %v11477_v33  ;;  %v6038_v34 = vpop.f32.mrb[85].mxu1  ;;  %v2966_v63 = vsel %vm2965_vm0, %v9885_v59, -inf }
 0x1f7   : > { %v2757_v2 = vadd.f32 %v5986_v8, %v9843_v50  ;;  %v5987_v27 = vpop.f32.mrb[88].mxu0  ;;  %v6039_v41 = vadd.f32 %v6038_v34, %v6037_v17  ;;  %2967 = vmax.xlane.f32.xlu0 %v2966_v63  ;;  %vm2942_vm2 = vcmp.gt.f32.partialorder %v2896_v21, 0.0  ;;  %v2950_v9 = vmul.f32 0.2, %v2896_v21 }
 0x1f8   : > { %v5988_v6 = vpop.f32.mrb[89].mxu0 }
 0x1f9   : > { %4450 = vmatmul.mubr.f32.gmra.mrb[124].mxu1 %v11478_v0  ;;  %v5989_v22 = vadd.f32 %v5988_v6, %v5987_v27  ;;  %v2903_v25 = vadd.f32 %v6039_v41, %v2750_v5  ;;  %v6040_v48 = vpop.f32.mrb[86].mxu1  ;;  %v9892_v46 = vsel %vm2942_vm2, %v2896_v21, %v2950_v9 }
 0x1fa   : > { %4455 = vmatprep.mubr.f32.mxu1 %v11479_v43  ;;  %v6041_v15 = vpop.f32.mrb[87].mxu1  ;;  %v2969_v38 = vsel %vm2965_vm0, %v9892_v46, -inf }
 0x1fb   : > { %v2764_v50 = vadd.f32 %v5989_v22, %v9852_v14  ;;  %v5990_v8 = vpop.f32.mrb[90].mxu0  ;;  %v6042_v17 = vadd.f32 %v6041_v15, %v6040_v48  ;;  %2970 = vmax.xlane.f32.xlu0 %v2969_v38  ;;  %vm2943_vm3 = vcmp.gt.f32.partialorder %v2903_v25, 0.0  ;;  %v2951_v34 = vmul.f32 0.2, %v2903_v25 }
 0x1fc   : > { %v5991_v63 = vpop.f32.mrb[91].mxu0 }
 0x1fd   : > { %4457 = vmatmul.mubr.f32.gmra.mrb[126].mxu1 %v11480_v57  ;;  %v5992_v23 = vadd.f32 %v5991_v63, %v5990_v8  ;;  %v2910_v27 = vadd.f32 %v6042_v17, %v2757_v2  ;;  %v6043_v5 = vpop.f32.mrb[88].mxu1  ;;  %v9898_v41 = vsel %vm2943_vm3, %v2903_v25, %v2951_v34 }
 0x1fe   : > { %4592 = vmatprep.mubr.f32.mxu1 %v11481_v45  ;;  %v6044_v21 = vpop.f32.mrb[89].mxu1  ;;  %v2972_v9 = vsel %vm2965_vm0, %v9898_v41, -inf }
 0x1ff   : > { %v2771_v6 = vadd.f32 %v5992_v23, %v9861_v10  ;;  %v5993_v45 = vpop.f32.mrb[92].mxu0  ;;  %v6045_v42 = vadd.f32 %v6044_v21, %v6043_v5  ;;  %2973 = vmax.xlane.f32.xlu1 %v2972_v9  ;;  %vm2944_vm4 = vcmp.gt.f32.partialorder %v2910_v27, 0.0  ;;  %v2952_v14 = vmul.f32 0.2, %v2910_v27 }
 0x200   : > { %v5994_v38 = vpop.f32.mrb[93].mxu0 }
 0x201   : > { %v5995_v22 = vadd.f32 %v5994_v38, %v5993_v45  ;;  %v2917_v48 = vadd.f32 %v6045_v42, %v2764_v50  ;;  %v6046_v15 = vpop.f32.mrb[90].mxu1  ;;  %v9903_v8 = vsel %vm2944_vm4, %v2910_v27, %v2952_v14  ;;  %v7219_v42 = vpack.c.bf16 %v9737_v29, %v9732_v37  ;;  %v11496_v29 = vld [vmem:[#allocation49_spill] sm:$0xff] }
 0x202   : > { %v6047_v2 = vpop.f32.mrb[91].mxu1  ;;  %v2975_v25 = vsel %vm2965_vm0, %v9903_v8, -inf }
 0x203   : > { %v2778_v17 = vadd.f32 %v5995_v22, %v9870_v49  ;;  %v5996_v34 = vpop.f32.mrb[94].mxu0  ;;  %v6048_v63 = vadd.f32 %v6047_v2, %v6046_v15  ;;  %2976 = vmax.xlane.f32.xlu1 %v2975_v25  ;;  %vm2945_vm5 = vcmp.gt.f32.partialorder %v2917_v48, 0.0  ;;  %v2953_v23 = vmul.f32 0.2, %v2917_v48  ;;  %7220 = vmatprep.subr.bf16.mxu1 %v7219_v42 }
 0x204   : > { %v5997_v10 = vpop.f32.mrb[95].mxu0  ;;  %v7221_v49 = vpack.c.bf16 %v9529_v39, %v9517_v35  ;;  %v7223_v2 = vpack.c.bf16 %v9770_v3, %v9765_v1  ;;  %v3020_v3 = vld [vmem:[#allocation2 + $0x30] sm:$0xff] }
 0x205   : > { %v5998_v5 = vadd.f32 %v5997_v10, %v5996_v34  ;;  %v2924_v21 = vadd.f32 %v6048_v63, %v2771_v6  ;;  %v6049_v9 = vpop.f32.mrb[92].mxu1  ;;  %v9908_v45 = vsel %vm2945_vm5, %v2917_v48, %v2953_v23  ;;  %v11495_v1 = vld [vmem:[#allocation86_spill] sm:$0xff]  ;;  %v3065_v39 = vand.u32 4294901760, %v3020_v3 }
 0x206   : > { %v6050_v50 = vpop.f32.mrb[93].mxu1  ;;  %v2978_v27 = vsel %vm2965_vm0, %v9908_v45, -inf  ;;  %7222 = vmatpush3.bf16.msra.mxu1 %v7221_v49 }
 0x207   : > { %v2785_v14 = vadd.f32 %v5998_v5, %v9877_v58  ;;  %v6051_v38 = vadd.f32 %v6050_v50, %v6049_v9  ;;  %2979 = vmax.xlane.f32.xlu0 %v2978_v27  ;;  %vm2946_vm6 = vcmp.gt.f32.partialorder %v2924_v21, 0.0  ;;  %v2954_v22 = vmul.f32 0.2, %v2924_v21  ;;  %7224 = vmatprep.subr.bf16.mxu1 %v7223_v2  ;;  %v3014_v50 = vld [vmem:[#allocation2] sm:$0xff]  ;;  %v3015_v27 = vld [vmem:[#allocation2 + $0x8] sm:$0xff]  ;;  %v11483_v2 = vld [vmem:[#allocation26_spill] sm:$0xff] }
 0x208   : > { %v7225_v58 = vpack.c.bf16 %v9552_v30, %v9546_v24  ;;  %v7227_v5 = vpack.c.bf16 %v9805_v7, %v9800_v4  ;;  %v7229_v9 = vpack.c.bf16 %v9579_v18, %v9560_v60  ;;  %v11490_v18 = vld [vmem:[#allocation94_spill] sm:$0xff]  ;;  %v11491_v4 = vld [vmem:[#allocation43_spill] sm:$0xff]  ;;  %v11494_v24 = vld [vmem:[#allocation48_spill] sm:$0xff] }
 0x209   : > { %v2931_v6 = vadd.f32 %v6051_v38, %v2778_v17  ;;  %v6052_v48 = vpop.f32.mrb[94].mxu1  ;;  %v9917_v15 = vsel %vm2946_vm6, %v2924_v21, %v2954_v22  ;;  %v3050_v38 = vand.u32 4294901760, %v3015_v27  ;;  %v11482_v22 = vld [vmem:[#allocation84_spill] sm:$0xff] }
 0x20a   : > { %v6053_v25 = vpop.f32.mrb[95].mxu1  ;;  %v2981_v34 = vsel %vm2965_vm0, %v9917_v15, -inf  ;;  %7226 = vmatpush3.bf16.msra.mxu1 %v7225_v58  ;;  %v3016_v58 = vld [vmem:[#allocation2 + $0x10] sm:$0xff] }
 0x20b   : > { %v6054_v63 = vadd.f32 %v6053_v25, %v6052_v48  ;;  %2982 = vmax.xlane.f32.xlu1 %v2981_v34  ;;  %vm2947_vm7 = vcmp.gt.f32.partialorder %v2931_v6, 0.0  ;;  %v2955_v23 = vmul.f32 0.2, %v2931_v6  ;;  %7228 = vmatprep.subr.bf16.mxu1 %v7227_v5  ;;  %v11484_v25 = vld [vmem:[#allocation87_spill] sm:$0xff]  ;;  %v11485_v34 = vld [vmem:[#allocation33_spill] sm:$0xff]  ;;  %v9976_v51 = vsub.f32 %v3015_v27, %v3050_v38 }
 0x20d   : > { %v2938_v17 = vadd.f32 %v6054_v63, %v2785_v14  ;;  %v9925_v10 = vsel %vm2947_vm7, %v2931_v6, %v2955_v23  ;;  %v3047_v14 = vand.u32 4294901760, %v3014_v50  ;;  %v3017_v63 = vld [vmem:[#allocation2 + $0x18] sm:$0xff]  ;;  %v11486_v23 = vld [vmem:[#allocation90_spill] sm:$0xff] }
 0x20e   : > { %v2984_v21 = vsel %vm2965_vm0, %v9925_v10, -inf  ;;  %7230 = vmatpush3.bf16.msra.mxu1 %v7229_v9  ;;  %v3056_v5 = vand.u32 4294901760, %v3017_v63 }
 0x20f   : > { %2985 = vmax.xlane.f32.xlu0 %v2984_v21  ;;  %vm2948_vm8 = vcmp.gt.f32.partialorder %v2938_v17, 0.0  ;;  %v2956_v42 = vmul.f32 0.2, %v2938_v17  ;;  %7232 = vmatprep.subr.bf16.mxu1 %v11482_v22  ;;  %v9938_v48 = vpack.c.bf16 %v3050_v38, %v3047_v14  ;;  %v11487_v21 = vld [vmem:[#allocation34_spill] sm:$0xff] }
 0x210   : > { %v11511_v38 = vld [vmem:[#allocation78_spill] sm:$0xff] }
 0x211   : > { %v9933_v49 = vsel %vm2948_vm8, %v2938_v17, %v2956_v42  ;;  %4595 = vmatmul.mubr.f32.vlgmr.msra.gmra.mrb[128].mxu1 %v11483_v2  ;;  %7040 = vmatprep.subr.bf16.mxu0 %v9938_v48  ;;  %v3053_v17 = vand.u32 4294901760, %v3016_v58  ;;  %v11488_v42 = vld [vmem:[#allocation8_spill] sm:$0xff] }
 0x212   : > { %v2987_v6 = vsel %vm2965_vm0, %v9933_v49, -inf  ;;  %7234 = vmatpush3.bf16.msra.mxu1 %v11484_v25  ;;  %4601 = vmatprep.mubr.f32.mxu1 %v11485_v34  ;;  %v3018_v2 = vld [vmem:[#allocation2 + $0x20] sm:$0xff]  ;;  %v3019_v34 = vld [vmem:[#allocation2 + $0x28] sm:$0xff] }
 0x213   : > { %2988 = vmax.xlane.f32.xlu1 %v2987_v6  ;;  %7236 = vmatprep.subr.bf16.mxu1 %v11486_v23  ;;  %v9947_v9 = vpack.c.bf16 %v3056_v5, %v3053_v17  ;;  %v11489_v6 = vld [vmem:[#allocation38_spill] sm:$0xff]  ;;  %v3059_v60 = vand.u32 4294901760, %v3018_v2  ;;  %v3062_v7 = vand.u32 4294901760, %v3019_v34  ;;  %v9990_v27 = vsub.f32 %v3016_v58, %v3053_v17 }
 0x214   : > { %7042 = vmatpush3.bf16.msra.mxu0 %v9938_v48 }
 0x215   : > { %4604 = vmatmul.mubr.f32.gmra.mrb[130].mxu1 %v11487_v21  ;;  %7044 = vmatprep.subr.bf16.mxu0 %v9947_v9  ;;  %v9955_v30 = vpack.c.bf16 %v3062_v7, %v3059_v60  ;;  %v11493_v21 = vld [vmem:[#allocation99_spill] sm:$0xff]  ;;  %v3216_v44 = vand.u32 4294901760, %v9990_v27  ;;  %v10008_v17 = vsub.f32 %v3018_v2, %v3059_v60  ;;  %v10024_v2 = vsub.f32 %v3020_v3, %v3065_v39 }
 0x216   : > { %7238 = vmatpush3.bf16.msra.mxu1 %v11488_v42  ;;  %4610 = vmatprep.mubr.f32.mxu1 %v11489_v6  ;;  %v3021_v6 = vld [vmem:[#allocation2 + $0x38] sm:$0xff] }
 0x217   : > { %7240 = vmatprep.subr.bf16.mxu1 %v11490_v18  ;;  %11492 = vst [vmem:[#allocation57_spill] sm:$0xff] %v9955_v30  ;;  %v3068_v35 = vand.u32 4294901760, %v3021_v6  ;;  %v3217_v58 = vsub.f32 %v9990_v27, %v3216_v44 }
 0x218   : > { %7046 = vmatpush3.bf16.msra.mxu0 %v9947_v9 }
 0x219   : > { %4613 = vmatmul.mubr.f32.gmra.mrb[132].mxu1 %v11491_v4  ;;  %7048 = vmatprep.subr.bf16.mxu0 %v9955_v30  ;;  %v9963_v37 = vpack.c.bf16 %v3068_v35, %v3065_v39  ;;  %v11498_v4 = vld [vmem:[#allocation101_spill] sm:$0xff] }
 0x21a   : > { %7242 = vmatpush3.bf16.msra.mxu1 %v11493_v21  ;;  %4619 = vmatprep.mubr.f32.mxu1 %v11494_v24  ;;  %v11500_v24 = vld [vmem:[#allocation91_spill] sm:$0xff] }
 0x21b   : > { %7244 = vmatprep.subr.bf16.mxu1 %v11495_v1  ;;  %11497 = vst [vmem:[#allocation64_spill] sm:$0xff] %v9963_v37 }
 0x21c   : > { %7050 = vmatpush3.bf16.msra.mxu0 %v9955_v30 }
 0x21d   : > { %4622 = vmatmul.mubr.f32.gmra.mrb[134].mxu1 %v11496_v29  ;;  %7052 = vmatprep.subr.bf16.mxu0 %v9963_v37  ;;  %v9974_v29 = vsub.f32 %v3014_v50, %v3047_v14  ;;  %v11509_v14 = vld [vmem:[#allocation73_spill] sm:$0xff] }
 0x21e   : > { %7246 = vmatpush3.bf16.msra.mxu1 %v11498_v4  ;;  %4628 = vmatprep.mubr.f32.mxu1 %v11499_v28  ;;  %v11506_v28 = vld [vmem:[#allocation107_spill] sm:$0xff] }
 0x21f   : > { %7248 = vmatprep.subr.bf16.mxu1 %v11500_v24  ;;  %v10976_v62 = vand.u32 4294901760, %v9974_v29 }
 0x220   : > { %7054 = vmatpush3.bf16.msra.mxu0 %v9963_v37  ;;  %v11512_v37 = vld [vmem:[#allocation10_spill] sm:$0xff] }
 0x221   : > { %4631 = vmatmul.mubr.f32.gmra.mrb[136].mxu1 %v11501_v40  ;;  %v3209_v40 = vand.u32 4294901760, %v9976_v51 }
 0x222   : > { %7250 = vmatpush3.bf16.msra.mxu1 %v11502_v56  ;;  %4637 = vmatprep.mubr.f32.mxu1 %v11503_v55  ;;  %v3203_v55 = vsub.f32 %v9974_v29, %v10976_v62 }
 0x223   : > { %7252 = vmatprep.subr.bf16.mxu1 %v11504_v36  ;;  %v3210_v50 = vsub.f32 %v9976_v51, %v3209_v40 }
 0x224   : > { %v3204_v61 = vand.u32 4294901760, %v3203_v55  ;;  %v10011_v55 = vsub.f32 %v3019_v34, %v3062_v7  ;;  %v3250_v34 = vsub.f32 %v3021_v6, %v3068_v35  ;;  %v11517_v6 = vld [vmem:[#allocation36_spill] sm:$0xff] }
 0x225   : > { %4640 = vmatmul.mubr.f32.gmra.mrb[138].mxu1 %v11505_v31  ;;  %v9992_v31 = vsub.f32 %v3017_v63, %v3056_v5  ;;  %v3211_v11 = vand.u32 4294901760, %v3210_v50  ;;  %v11513_v5 = vld [vmem:[#allocation80_spill] sm:$0xff]  ;;  %v10983_v50 = vand.u32 4294901760, %v10008_v17 }
 0x226   : > { %7254 = vmatpush3.bf16.msra.mxu1 %v11506_v28  ;;  %4646 = vmatprep.mubr.f32.mxu1 %v11507_v19  ;;  %v11510_v19 = vld [vmem:[#allocation16_spill] sm:$0xff] }
 0x227   : > { %7256 = vmatprep.subr.bf16.mxu1 %v11508_v32  ;;  %v10981_v62 = vand.u32 4294901760, %v9992_v31  ;;  %v10000_v30 = vpack.c.bf16 %v3211_v11, %v3204_v61  ;;  %v3218_v61 = vand.u32 4294901760, %v3217_v58  ;;  %v3231_v7 = vsub.f32 %v10008_v17, %v10983_v50  ;;  %v11520_v50 = vld [vmem:[#allocation53_spill] sm:$0xff] }
 0x229   : > { %4649 = vmatmul.mubr.f32.gmra.mrb[140].mxu1 %v11509_v14  ;;  %v3224_v63 = vsub.f32 %v9992_v31, %v10981_v62  ;;  %7056 = vmatprep.subr.bf16.mxu0 %v10000_v30  ;;  %v11514_v14 = vld [vmem:[#allocation27_spill] sm:$0xff]  ;;  %v3244_v62 = vand.u32 4294901760, %v10024_v2 }
 0x22a   : > { %7258 = vmatpush3.bf16.msra.mxu1 %v11510_v19  ;;  %4655 = vmatprep.mubr.f32.mxu1 %v11511_v38  ;;  %v10982_v38 = vand.u32 4294901760, %v10011_v55 }
 0x22b   : > { %7260 = vmatprep.subr.bf16.mxu1 %v11512_v37  ;;  %v3225_v11 = vand.u32 4294901760, %v3224_v63  ;;  %v11516_v63 = vld [vmem:[#allocation35_spill] sm:$0xff]  ;;  %v3245_v39 = vsub.f32 %v10024_v2, %v3244_v62 }
 0x22c   : > { %v3238_v58 = vsub.f32 %v10011_v55, %v10982_v38 }
 0x22d   : > { %4658 = vmatmul.mubr.f32.gmra.mrb[142].mxu1 %v11513_v5  ;;  %v10019_v60 = vpack.c.bf16 %v3225_v11, %v3218_v61  ;;  %v11515_v5 = vld [vmem:[#allocation28_spill] sm:$0xff]  ;;  %v3251_v61 = vand.u32 4294901760, %v3250_v34  ;;  %v3246_v38 = vand.u32 4294901760, %v3245_v39  ;;  %v11522_v39 = vld [vmem:[#allocation58_spill] sm:$0xff] }
 0x22e   : > { %7262 = vmatpush3.bf16.msra.mxu1 %v9577_v20  ;;  %4762 = vmatprep.mubr.f32.mxu1 %v11514_v14  ;;  %v3232_v14 = vand.u32 4294901760, %v3231_v7  ;;  %v3239_v11 = vand.u32 4294901760, %v3238_v58  ;;  %v11519_v58 = vld [vmem:[#allocation46_spill] sm:$0xff] }
 0x22f   : > { %7327 = vmatprep.subr.bf16.mxu1 %v11482_v22  ;;  %v3252_v35 = vsub.f32 %v3250_v34, %v3251_v61 }
 0x230   : > { %v10035_v3 = vpack.c.bf16 %v3239_v11, %v3232_v14  ;;  %v10047_v14 = vpack.c.bf16 %v9976_v51, %v9974_v29  ;;  %v11521_v11 = vld [vmem:[#allocation54_spill] sm:$0xff]  ;;  %v11533_v51 = vand.u32 4294901760, %v10011_v55 }
 0x231   : > { %4766 = vmatmul.mubr.f32.vlgmr.msra.gmra.mrb[144].mxu1 %v11515_v5  ;;  %v11518_v5 = vld [vmem:[#allocation42_spill] sm:$0xff] }
 0x232   : > { %4773 = vmatprep.mubr.f32.mxu1 %v11516_v63  ;;  %7335 = vmatpush3.bf16.msra.mxu1 %v11484_v25  ;;  %v3253_v63 = vand.u32 4294901760, %v3252_v35  ;;  %v11524_v35 = vld [vmem:[#allocation66_spill] sm:$0xff] }
 0x233   : > { %7328 = vmatprep.subr.bf16.mxu1 %v11486_v23 }
 0x234   : > { %v10041_v7 = vpack.c.bf16 %v3253_v63, %v3246_v38  ;;  %v10055_v38 = vpack.c.bf16 %v9992_v31, %v9990_v27  ;;  %v11526_v63 = vld [vmem:[#allocation72_spill] sm:$0xff] }
 0x235   : > { %4777 = vmatmul.mubr.f32.gmra.mrb[146].mxu1 %v11517_v6  ;;  %v10063_v6 = vpack.c.bf16 %v10011_v55, %v10008_v17 }
 0x236   : > { %4784 = vmatprep.mubr.f32.mxu1 %v11518_v5  ;;  %7336 = vmatpush3.bf16.msra.mxu1 %v11488_v42  ;;  %v11525_v5 = vld [vmem:[#allocation68_spill] sm:$0xff] }
 0x237   : > { %7329 = vmatprep.subr.bf16.mxu1 %v11490_v18 }
 0x239   : > { %4788 = vmatmul.mubr.f32.gmra.mrb[148].mxu1 %v11519_v58  ;;  %v10070_v58 = vpack.c.bf16 %v3250_v34, %v10024_v2  ;;  %v11530_v2 = vand.u32 4294901760, %v9974_v29  ;;  %v11532_v29 = vand.u32 4294901760, %v10008_v17 }
 0x23a   : > { %4795 = vmatprep.mubr.f32.mxu1 %v11520_v50  ;;  %7337 = vmatpush3.bf16.msra.mxu1 %v11493_v21  ;;  %v11523_v50 = vld [vmem:[#allocation60_spill] sm:$0xff] }
 0x23b   : > { %7330 = vmatprep.subr.bf16.mxu1 %v11495_v1  ;;  %v10090_v34 = vpack.c.bf16 %v3209_v40, %v11530_v2  ;;  %v10106_v40 = vpack.c.bf16 %v11533_v51, %v11532_v29 }
 0x23d   : > { %4799 = vmatmul.mubr.f32.gmra.mrb[150].mxu1 %v11521_v11  ;;  %v11527_v11 = vld [vmem:[#allocation77_spill] sm:$0xff] }
 0x23e   : > { %4806 = vmatprep.mubr.f32.mxu1 %v11522_v39  ;;  %7338 = vmatpush3.bf16.msra.mxu1 %v11498_v4  ;;  %v11528_v39 = vld [vmem:[#allocation82_spill] sm:$0xff] }
 0x23f   : > { %7331 = vmatprep.subr.bf16.mxu1 %v11500_v24 }
 0x241   : > { %4810 = vmatmul.mubr.f32.gmra.mrb[152].mxu1 %v11523_v50  ;;  %v11529_v50 = vld [vmem:[#allocation83_spill] sm:$0xff] }
 0x242   : > { %4817 = vmatprep.mubr.f32.mxu1 %v11524_v35  ;;  %7339 = vmatpush3.bf16.msra.mxu1 %v11502_v56  ;;  %v11531_v35 = vand.u32 4294901760, %v9992_v31 }
 0x243   : > { %7332 = vmatprep.subr.bf16.mxu1 %v11504_v36 }
 0x245   : > { %4821 = vmatmul.mubr.f32.gmra.mrb[154].mxu1 %v11525_v5  ;;  %v10098_v5 = vpack.c.bf16 %v11531_v35, %v3216_v44 }
 0x246   : > { %4828 = vmatprep.mubr.f32.mxu1 %v11526_v63  ;;  %7340 = vmatpush3.bf16.msra.mxu1 %v11506_v28  ;;  %v10110_v63 = vpack.c.bf16 %v3251_v61, %v3244_v62 }
 0x247   : > { %7333 = vmatprep.subr.bf16.mxu1 %v11508_v32 }
 0x249   : > { %4832 = vmatmul.mubr.f32.gmra.mrb[156].mxu1 %v11527_v11 }
 0x24a   : > { %4839 = vmatprep.mubr.f32.mxu1 %v11528_v39  ;;  %7341 = vmatpush3.bf16.msra.mxu1 %v11510_v19 }
 0x24b   : > { %7334 = vmatprep.subr.bf16.mxu1 %v11512_v37 }
 0x24d   : > { %4843 = vmatmul.mubr.f32.gmra.mrb[158].mxu1 %v11529_v50 }
 0x24e   : > { %7342 = vmatpush3.bf16.msra.mxu1 %v9577_v20  ;;  %5176 = vmatprep.mubr.f32.mxu1 %v11469_v12 }
 0x251   : > { %5178 = vmatmul.mubr.f32.vlgmr.msra.gmra.mrb[160].mxu1 %v11470_v47 }
 0x252   : > { %5183 = vmatprep.mubr.f32.mxu1 %v11471_v16 }
 0x255   : > { %5185 = vmatmul.mubr.f32.gmra.mrb[162].mxu1 %v11472_v13 }
 0x256   : > { %5190 = vmatprep.mubr.f32.mxu1 %v11473_v54 }
 0x259   : > { %5192 = vmatmul.mubr.f32.gmra.mrb[164].mxu1 %v11474_v26 }
 0x25a   : > { %5197 = vmatprep.mubr.f32.mxu1 %v11475_v53 }
 0x25d   : > { %5199 = vmatmul.mubr.f32.gmra.mrb[166].mxu1 %v11476_v52 }
 0x25e   : > { %5204 = vmatprep.mubr.f32.mxu1 %v11477_v33 }
 0x261   : > { %5206 = vmatmul.mubr.f32.gmra.mrb[168].mxu1 %v11478_v0 }
 0x262   : > { %5211 = vmatprep.mubr.f32.mxu1 %v11479_v43 }
 0x265   : > { %5213 = vmatmul.mubr.f32.gmra.mrb[170].mxu1 %v11480_v57 }
 0x284   : > { %v2968_v27 = vpop.xlane.xlu0 %2967 }
 0x285   : > { %v2990_v44 = vsub.f32 %v9885_v59, %v2968_v27 }
 0x287   : > { %v2998_v31 = vmul.f32 1.442695, %v2990_v44 }
 0x288   : > { %v2971_v11 = vpop.xlane.xlu0 %2970 }
 0x289   : > { %7437 = vpow2.f32 %v2998_v31  ;;  %v2991_v39 = vsub.f32 %v9892_v46, %v2971_v11 }
 0x28b   : > { %v3000_v50 = vmul.f32 1.442695, %v2991_v39 }
 0x28c   : > { %v2974_v17 = vpop.xlane.xlu1 %2973 }
 0x28d   : > { %7439 = vpow2.f32 %v3000_v50  ;;  %v2992_v55 = vsub.f32 %v9898_v41, %v2974_v17 }
 0x28f   : > { %v3002_v2 = vmul.f32 1.442695, %v2992_v55 }
 0x290   : > { %v2977_v35 = vpop.xlane.xlu1 %2976 }
 0x291   : > { %7441 = vpow2.f32 %v3002_v2  ;;  %v2993_v29 = vsub.f32 %v9903_v8, %v2977_v35 }
 0x293   : > { %v10116_v62 = vpop.eup %7437  ;;  %v3004_v61 = vmul.f32 1.442695, %v2993_v29 }
 0x294   : > { %11534 = vst [vmem:[#allocation65_spill] sm:$0xff] %v10116_v62  ;;  %v2980_v51 = vpop.xlane.xlu0 %2979  ;;  %v3023_v59 = vsel %vm2965_vm0, %v10116_v62, 0 }
 0x295   : > { %7443 = vpow2.f32 %v3004_v61  ;;  %v2994_v46 = vsub.f32 %v9908_v45, %v2980_v51  ;;  %v10121_v27 = vand.u32 4294901760, %v3023_v59 }
 0x297   : > { %v10123_v44 = vpop.eup %7439  ;;  %v3006_v41 = vmul.f32 1.442695, %v2994_v46  ;;  %v10126_v31 = vsub.f32 %v3023_v59, %v10121_v27 }
 0x298   : > { %11535 = vst [vmem:[#allocation67_spill] sm:$0xff] %v10123_v44  ;;  %v3026_v8 = vsel %vm2965_vm0, %v10123_v44, 0  ;;  %v2983_v11 = vpop.xlane.xlu1 %2982 }
 0x299   : > { %v10130_v39 = vand.u32 4294901760, %v3026_v8  ;;  %7445 = vpow2.f32 %v3006_v41  ;;  %v2995_v50 = vsub.f32 %v9917_v15, %v2983_v11  ;;  %v10984_v17 = vand.u32 4294901760, %v10126_v31 }
 0x29b   : > { %v10134_v45 = vpop.eup %7441  ;;  %v10137_v55 = vsub.f32 %v3026_v8, %v10130_v39  ;;  %v3008_v2 = vmul.f32 1.442695, %v2995_v50  ;;  %v3122_v35 = vsub.f32 %v10126_v31, %v10984_v17 }
 0x29c   : > { %11536 = vst [vmem:[#allocation71_spill] sm:$0xff] %v10134_v45  ;;  %v2986_v29 = vpop.xlane.xlu0 %2985  ;;  %v3029_v61 = vsel %vm2965_vm0, %v10134_v45, 0 }
 0x29d   : > { %7447 = vpow2.f32 %v3008_v2  ;;  %v2996_v51 = vsub.f32 %v9925_v10, %v2986_v29  ;;  %v3123_v15 = vand.u32 4294901760, %v3122_v35  ;;  %v10986_v59 = vand.u32 4294901760, %v10137_v55 }
 0x29e   : > { %v10146_v46 = vand.u32 4294901760, %v3029_v61 }
 0x29f   : > { %v10148_v41 = vpop.eup %7443  ;;  %v3010_v8 = vmul.f32 1.442695, %v2996_v51  ;;  %6503 = vmatprep.mubr.f32.mxu0 %v3123_v15  ;;  %v3132_v11 = vsub.f32 %v10137_v55, %v10986_v59 }
 0x2a0   : > { %11537 = vst [vmem:[#allocation75_spill] sm:$0xff] %v10148_v41  ;;  %v2989_v50 = vpop.xlane.xlu1 %2988  ;;  %v10154_v17 = vsub.f32 %v3029_v61, %v10146_v46  ;;  %v3032_v10 = vsel %vm2965_vm0, %v10148_v41, 0 }
 0x2a1   : > { %7449 = vpow2.f32 %v3010_v8  ;;  %v2997_v2 = vsub.f32 %v9933_v49, %v2989_v50  ;;  %v3133_v35 = vand.u32 4294901760, %v3132_v11  ;;  %v10159_v29 = vand.u32 4294901760, %v3032_v10 }
 0x2a2   : > { %v10987_v51 = vand.u32 4294901760, %v10154_v17 }
 0x2a3   : > { %v10162_v15 = vpop.eup %7445  ;;  %v3012_v45 = vmul.f32 1.442695, %v2997_v2  ;;  %6504 = vmatmul.mubr.f32.vlgmr.msra.gmra.mrb[96].mxu0 %v3133_v35  ;;  %v10165_v59 = vsub.f32 %v3032_v10, %v10159_v29 }
 0x2a4   : > { %11538 = vst [vmem:[#allocation79_spill] sm:$0xff] %v10162_v15  ;;  %v3142_v61 = vsub.f32 %v10154_v17, %v10987_v51  ;;  %v3035_v8 = vsel %vm2965_vm0, %v10162_v15, 0  ;;  %7058 = vmatpush3.bf16.msra.mxu0 %v10000_v30 }
 0x2a5   : > { %7451 = vpow2.f32 %v3012_v45  ;;  %v10989_v49 = vand.u32 4294901760, %v10165_v59  ;;  %v10174_v11 = vand.u32 4294901760, %v3035_v8  ;;  %7060 = vmatprep.subr.bf16.mxu0 %v10019_v60 }
 0x2a6   : > { %v3143_v50 = vand.u32 4294901760, %v3142_v61 }
 0x2a7   : > { %v10177_v2 = vpop.eup %7447  ;;  %v3152_v10 = vsub.f32 %v10165_v59, %v10989_v49  ;;  %v10183_v35 = vsub.f32 %v3035_v8, %v10174_v11 }
 0x2a8   : > { %11539 = vst [vmem:[#allocation81_spill] sm:$0xff] %v10177_v2  ;;  %6506 = vmatprep.mubr.f32.mxu0 %v3143_v50  ;;  %v3038_v30 = vsel %vm2965_vm0, %v10177_v2, 0  ;;  %7062 = vmatpush3.bf16.msra.mxu0 %v10019_v60 }
 0x2a9   : > { %v3153_v45 = vand.u32 4294901760, %v3152_v10  ;;  %v10991_v51 = vand.u32 4294901760, %v10183_v35  ;;  %v10189_v15 = vand.u32 4294901760, %v3038_v30  ;;  %7064 = vmatprep.subr.bf16.mxu0 %v10035_v3 }
 0x2ab   : > { %v10192_v61 = vpop.eup %7449  ;;  %6507 = vmatmul.mubr.f32.gmra.mrb[98].mxu0 %v3153_v45  ;;  %v3162_v8 = vsub.f32 %v10183_v35, %v10991_v51  ;;  %v10198_v50 = vsub.f32 %v3038_v30, %v10189_v15 }
 0x2ac   : > { %11540 = vst [vmem:[#allocation12_spill] sm:$0xff] %v10192_v61  ;;  %v3041_v60 = vsel %vm2965_vm0, %v10192_v61, 0  ;;  %7066 = vmatpush3.bf16.msra.mxu0 %v10035_v3 }
 0x2ad   : > { %v3163_v10 = vand.u32 4294901760, %v3162_v8  ;;  %v10994_v49 = vand.u32 4294901760, %v10198_v50  ;;  %v10204_v2 = vand.u32 4294901760, %v3041_v60  ;;  %7068 = vmatprep.subr.bf16.mxu0 %v10041_v7 }
 0x2af   : > { %v10207_v45 = vpop.eup %7451  ;;  %6509 = vmatprep.mubr.f32.mxu0 %v3163_v10  ;;  %v3172_v30 = vsub.f32 %v10198_v50, %v10994_v49  ;;  %v10213_v51 = vsub.f32 %v3041_v60, %v10204_v2 }
 0x2b0   : > { %11541 = vst [vmem:[#allocation13_spill] sm:$0xff] %v10207_v45  ;;  %v3044_v3 = vsel %vm2965_vm0, %v10207_v45, 0  ;;  %7070 = vmatpush3.bf16.msra.mxu0 %v10041_v7 }
 0x2b1   : > { %v3173_v8 = vand.u32 4294901760, %v3172_v30  ;;  %v10997_v61 = vand.u32 4294901760, %v10213_v51  ;;  %v10219_v41 = vand.u32 4294901760, %v3044_v3  ;;  %7072 = vmatprep.subr.bf16.mxu0 %v10047_v14 }
 0x2b3   : > { %6510 = vmatmul.mubr.f32.gmra.mrb[100].mxu0 %v3173_v8  ;;  %v3182_v10 = vsub.f32 %v10213_v51, %v10997_v61  ;;  %v10226_v60 = vsub.f32 %v3044_v3, %v10219_v41  ;;  %v6183_v3 = vpop.f32.mrb[96].mxu1 }
 0x2b5   : > { %v3183_v49 = vand.u32 4294901760, %v3182_v10  ;;  %v10996_v45 = vand.u32 4294901760, %v10226_v60 }
 0x2b7   : > { %6512 = vmatprep.mubr.f32.mxu0 %v3183_v49  ;;  %v3192_v7 = vsub.f32 %v10226_v60, %v10996_v45  ;;  %v6184_v49 = vpop.f32.mrb[97].mxu1 }
 0x2b8   : > { %v6185_v8 = vadd.f32 %v6184_v49, %v6183_v3  ;;  %v6186_v10 = vpop.f32.mrb[98].mxu1 }
 0x2b9   : > { %v3193_v30 = vand.u32 4294901760, %v3192_v7  ;;  %v6187_v7 = vpop.f32.mrb[99].mxu1 }
 0x2bb   : > { %6513 = vmatmul.mubr.f32.gmra.mrb[102].mxu0 %v3193_v30  ;;  %v6189_v30 = vpop.f32.mrb[100].mxu1 }
 0x2bc   : > { %6531 = vmatprep.mubr.f32.mxu0 %v10121_v27  ;;  %v6190_v45 = vpop.f32.mrb[101].mxu1 }
 0x2bd   : > { %v6192_v61 = vpop.f32.mrb[102].mxu1 }
 0x2be   : > { %v6193_v62 = vpop.f32.mrb[103].mxu1 }
 0x2bf   : > { %6532 = vmatmul.mubr.f32.vlgmr.msra.gmra.mrb[96].mxu0 %v10130_v39  ;;  %v6194_v44 = vadd.f32 %v6193_v62, %v6192_v61  ;;  %v6195_v3 = vpop.f32.mrb[104].mxu1 }
 0x2c0   : > { %7074 = vmatpush3.bf16.msra.mxu0 %v10047_v14  ;;  %6534 = vmatprep.mubr.f32.mxu0 %v10146_v46  ;;  %v6188_v14 = vadd.f32 %v6187_v7, %v6186_v10  ;;  %v6196_v49 = vpop.f32.mrb[105].mxu1 }
 0x2c1   : > { %7076 = vmatprep.subr.bf16.mxu0 %v10055_v38  ;;  %v6198_v10 = vpop.f32.mrb[106].mxu1 }
 0x2c2   : > { %v6199_v7 = vpop.f32.mrb[107].mxu1 }
 0x2c3   : > { %6535 = vmatmul.mubr.f32.gmra.mrb[98].mxu0 %v10159_v29  ;;  %v6200_v20 = vadd.f32 %v6199_v7, %v6198_v10  ;;  %v11542_v10 = vld [vmem:[#allocation57_spill] sm:$0xff] }
 0x2c4   : > { %7078 = vmatpush3.bf16.msra.mxu0 %v10055_v38  ;;  %6537 = vmatprep.mubr.f32.mxu0 %v10174_v11  ;;  %v6191_v38 = vadd.f32 %v6190_v45, %v6189_v30  ;;  %v6201_v45 = vpop.f32.mrb[108].mxu1 }
 0x2c5   : > { %7080 = vmatprep.subr.bf16.mxu0 %v10063_v6  ;;  %v6202_v62 = vpop.f32.mrb[109].mxu1 }
 0x2c6   : > { %v6204_v61 = vpop.f32.mrb[110].mxu1 }
 0x2c7   : > { %6538 = vmatmul.mubr.f32.gmra.mrb[100].mxu0 %v10189_v15  ;;  %v6205_v30 = vpop.f32.mrb[111].mxu1 }
 0x2c8   : > { %7082 = vmatpush3.bf16.msra.mxu0 %v10063_v6  ;;  %6540 = vmatprep.mubr.f32.mxu0 %v10204_v2  ;;  %v6197_v6 = vadd.f32 %v6196_v49, %v6195_v3  ;;  %v6206_v57 = vadd.f32 %v6205_v30, %v6204_v61  ;;  %v6239_v3 = vpop.f32.mrb[112].mxu1  ;;  %v11543_v30 = vld [vmem:[#allocation64_spill] sm:$0xff] }
 0x2c9   : > { %7084 = vmatprep.subr.bf16.mxu0 %v10070_v58  ;;  %v6240_v49 = vpop.f32.mrb[113].mxu1 }
 0x2ca   : > { %v6241_v7 = vadd.f32 %v6240_v49, %v6239_v3  ;;  %v6242_v37 = vpop.f32.mrb[114].mxu1 }
 0x2cb   : > { %6541 = vmatmul.mubr.f32.gmra.mrb[102].mxu0 %v10219_v41  ;;  %v6243_v43 = vpop.f32.mrb[115].mxu1 }
 0x2cc   : > { %7086 = vmatpush3.bf16.msra.mxu0 %v10070_v58  ;;  %6559 = vmatprep.mubr.f32.mxu0 %v10126_v31  ;;  %v6203_v58 = vadd.f32 %v6202_v62, %v6201_v45  ;;  %v4410_v19 = vadd.f32 %v6241_v7, %v6185_v8  ;;  %v6244_v45 = vadd.f32 %v6243_v43, %v6242_v37  ;;  %v6245_v62 = vpop.f32.mrb[116].mxu1  ;;  %v11544_v37 = vand.u32 4294901760, %v10126_v31 }
 0x2cd   : > { %7088 = vmatprep.subr.bf16.mxu0 %v9938_v48  ;;  %v6246_v61 = vpop.f32.mrb[117].mxu1 }
 0x2ce   : > { %v4417_v0 = vadd.f32 %v6244_v45, %v6188_v14  ;;  %v6247_v32 = vadd.f32 %v6246_v61, %v6245_v62  ;;  %v6248_v33 = vpop.f32.mrb[118].mxu1  ;;  %v11545_v45 = vand.u32 4294901760, %v10137_v55 }
 0x2cf   : > { %6560 = vmatmul.mubr.f32.vlgmr.msra.gmra.mrb[96].mxu0 %v10137_v55  ;;  %v6249_v28 = vpop.f32.mrb[119].mxu1 }
 0x2d0   : > { %7090 = vmatpush3.bf16.msra.mxu0 %v9938_v48  ;;  %6562 = vmatprep.mubr.f32.mxu0 %v10154_v17  ;;  %v4424_v3 = vadd.f32 %v6247_v32, %v6191_v38  ;;  %v6250_v49 = vadd.f32 %v6249_v28, %v6248_v33  ;;  %v6251_v52 = vpop.f32.mrb[120].mxu1  ;;  %v11546_v33 = vand.u32 4294901760, %v10154_v17 }
 0x2d1   : > { %7092 = vmatprep.subr.bf16.mxu0 %v9947_v9  ;;  %v6252_v43 = vpop.f32.mrb[121].mxu1 }
 0x2d2   : > { %v4431_v8 = vadd.f32 %v6250_v49, %v6194_v44  ;;  %v6253_v7 = vadd.f32 %v6252_v43, %v6251_v52  ;;  %v6254_v36 = vpop.f32.mrb[122].mxu1  ;;  %v11547_v49 = vand.u32 4294901760, %v10165_v59  ;;  %v11551_v43 = vand.u32 4294901760, %v10226_v60 }
 0x2d3   : > { %6563 = vmatmul.mubr.f32.gmra.mrb[98].mxu0 %v10165_v59  ;;  %v6255_v14 = vpop.f32.mrb[123].mxu1  ;;  %v11550_v59 = vand.u32 4294901760, %v10213_v51 }
 0x2d4   : > { %7094 = vmatpush3.bf16.msra.mxu0 %v9947_v9  ;;  %6565 = vmatprep.mubr.f32.mxu0 %v10183_v35  ;;  %v4438_v62 = vadd.f32 %v6253_v7, %v6197_v6  ;;  %v6256_v61 = vadd.f32 %v6255_v14, %v6254_v36  ;;  %v6257_v32 = vpop.f32.mrb[124].mxu1  ;;  %v11548_v36 = vand.u32 4294901760, %v10183_v35 }
 0x2d5   : > { %7096 = vmatprep.subr.bf16.mxu0 %v11542_v10  ;;  %v6258_v28 = vpop.f32.mrb[125].mxu1 }
 0x2d6   : > { %v4445_v31 = vadd.f32 %v6256_v61, %v6200_v20  ;;  %v6259_v38 = vadd.f32 %v6258_v28, %v6257_v32  ;;  %v6260_v44 = vpop.f32.mrb[126].mxu1  ;;  %v11549_v20 = vand.u32 4294901760, %v10198_v50  ;;  %v11552_v32 = vld [vmem:[#allocation17_spill] sm:$0xff] }
 0x2d7   : > { %6566 = vmatmul.mubr.f32.gmra.mrb[100].mxu0 %v10198_v50  ;;  %v6261_v52 = vpop.f32.mrb[127].mxu1 }
 0x2d8   : > { %7098 = vmatpush3.bf16.msra.mxu0 %v11542_v10  ;;  %6568 = vmatprep.mubr.f32.mxu0 %v10213_v51  ;;  %v10274_v55 = vadd.f32 %v6259_v38, %v6203_v58  ;;  %v6262_v6 = vadd.f32 %v6261_v52, %v6260_v44 }
 0x2d9   : > { %7100 = vmatprep.subr.bf16.mxu0 %v11543_v30 }
 0x2db   : > { %6569 = vmatmul.mubr.f32.gmra.mrb[102].mxu0 %v10226_v60 }
 0x2dc   : > { %7102 = vmatpush3.bf16.msra.mxu0 %v11543_v30  ;;  %6587 = vmatprep.mubr.f32.mxu0 %v11544_v37 }
 0x2dd   : > { %7104 = vmatprep.subr.bf16.mxu0 %v10090_v34 }
 0x2df   : > { %6588 = vmatmul.mubr.f32.vlgmr.msra.gmra.mrb[96].mxu0 %v11545_v45 }
 0x2e0   : > { %7106 = vmatpush3.bf16.msra.mxu0 %v10090_v34  ;;  %6590 = vmatprep.mubr.f32.mxu0 %v11546_v33  ;;  %v10280_v34 = vadd.f32 %v6262_v6, %v6206_v57  ;;  %v11554_v33 = vld [vmem:[#allocation114_spill] sm:$0xff]  ;;  %v11558_v6 = vld [vmem:[#allocation89_spill] sm:$0xff] }
 0x2e1   : > { %7108 = vmatprep.subr.bf16.mxu0 %v10098_v5  ;;  %v11555_v28 = vand.u32 4294901760, %v11554_v33  ;;  %v11574_v33 = vld [vmem:[#allocation100_spill] sm:$0xff] }
 0x2e3   : > { %6591 = vmatmul.mubr.f32.gmra.mrb[98].mxu0 %v11547_v49 }
 0x2e4   : > { %7110 = vmatpush3.bf16.msra.mxu0 %v10098_v5  ;;  %6593 = vmatprep.mubr.f32.mxu0 %v11548_v36  ;;  %v6295_v17 = vpop.f32.mrb[128].mxu1  ;;  %v11559_v36 = vand.u32 4294901760, %v11558_v6 }
 0x2e5   : > { %7112 = vmatprep.subr.bf16.mxu0 %v10106_v40  ;;  %v6296_v37 = vpop.f32.mrb[129].mxu1 }
 0x2e6   : > { %v6297_v58 = vadd.f32 %v6296_v37, %v6295_v17  ;;  %v11560_v37 = vld [vmem:[#allocation97_spill] sm:$0xff] }
 0x2e7   : > { %6594 = vmatmul.mubr.f32.gmra.mrb[100].mxu0 %v11549_v20 }
 0x2e8   : > { %7114 = vmatpush3.bf16.msra.mxu0 %v10106_v40  ;;  %6596 = vmatprep.mubr.f32.mxu0 %v11550_v59  ;;  %v10288_v5 = vadd.f32 %v6297_v58, %v4410_v19  ;;  %v6298_v35 = vpop.f32.mrb[130].mxu1  ;;  %v11561_v59 = vand.u32 4294901760, %v11560_v37  ;;  %v11562_v58 = vld [vmem:[#allocation104_spill] sm:$0xff]  ;;  %v11582_v37 = vld [vmem:[#allocation105_spill] sm:$0xff] }
 0x2e9   : > { %7116 = vmatprep.subr.bf16.mxu0 %v10110_v63  ;;  %v6299_v57 = vpop.f32.mrb[131].mxu1 }
 0x2ea   : > { %v6300_v50 = vadd.f32 %v6299_v57, %v6298_v35 }
 0x2eb   : > { %6597 = vmatmul.mubr.f32.gmra.mrb[102].mxu0 %v11551_v43 }
 0x2ec   : > { %7118 = vmatpush3.bf16.msra.mxu0 %v10110_v63  ;;  %6615 = vmatprep.mubr.f32.mxu0 %v10121_v27  ;;  %v10295_v40 = vadd.f32 %v6300_v50, %v4417_v0  ;;  %v6301_v51 = vpop.f32.mrb[132].mxu1 }
 0x2ed   : > { %7120 = vmatprep.subr.bf16.mxu0 %v9938_v48  ;;  %v6302_v7 = vpop.f32.mrb[133].mxu1 }
 0x2ee   : > { %v6303_v19 = vadd.f32 %v6302_v7, %v6301_v51  ;;  %v11566_v51 = vld [vmem:[#allocation9_spill] sm:$0xff] }
 0x2ef   : > { %6616 = vmatmul.mubr.f32.vlgmr.msra.gmra.mrb[96].mxu0 %v10130_v39  ;;  %v11567_v7 = vand.u32 4294901760, %v11566_v51 }
 0x2f0   : > { %7122 = vmatpush3.bf16.msra.mxu0 %v9938_v48  ;;  %6618 = vmatprep.mubr.f32.mxu0 %v10146_v46  ;;  %v10301_v60 = vadd.f32 %v6303_v19, %v4424_v3  ;;  %v6304_v63 = vpop.f32.mrb[134].mxu1 }
 0x2f1   : > { %7124 = vmatprep.subr.bf16.mxu0 %v9947_v9  ;;  %v6305_v14 = vpop.f32.mrb[135].mxu1 }
 0x2f2   : > { %v6306_v0 = vadd.f32 %v6305_v14, %v6304_v63  ;;  %v11568_v14 = vld [vmem:[#allocation106_spill] sm:$0xff] }
 0x2f3   : > { %6619 = vmatmul.mubr.f32.gmra.mrb[98].mxu0 %v10159_v29 }
 0x2f4   : > { %7126 = vmatpush3.bf16.msra.mxu0 %v9947_v9  ;;  %6621 = vmatprep.mubr.f32.mxu0 %v10174_v11  ;;  %v10307_v45 = vadd.f32 %v6306_v0, %v4431_v8  ;;  %v6307_v48 = vpop.f32.mrb[136].mxu1  ;;  %v11553_v9 = vand.u32 4294901760, %v11552_v32  ;;  %v11569_v0 = vand.u32 4294901760, %v11568_v14 }
 0x2f5   : > { %7128 = vmatprep.subr.bf16.mxu0 %v11542_v10  ;;  %v6308_v61 = vpop.f32.mrb[137].mxu1 }
 0x2f6   : > { %v6309_v3 = vadd.f32 %v6308_v61, %v6307_v48  ;;  %v7263_v38 = vpack.c.bf16 %v11555_v28, %v11553_v9  ;;  %v11570_v48 = vld [vmem:[#allocation108_spill] sm:$0xff]  ;;  %v11575_v28 = vand.u32 4294901760, %v11574_v33  ;;  %v11597_v33 = vld [vmem:[#allocation98_spill] sm:$0xff] }
 0x2f7   : > { %6622 = vmatmul.mubr.f32.gmra.mrb[100].mxu0 %v10189_v15  ;;  %v11571_v61 = vand.u32 4294901760, %v11570_v48 }
 0x2f8   : > { %7130 = vmatpush3.bf16.msra.mxu0 %v11542_v10  ;;  %6624 = vmatprep.mubr.f32.mxu0 %v10204_v2  ;;  %v10317_v44 = vadd.f32 %v6309_v3, %v4438_v62  ;;  %v6310_v8 = vpop.f32.mrb[138].mxu1  ;;  %v11556_v10 = vld [vmem:[#allocation85_spill] sm:$0xff]  ;;  %v11563_v62 = vand.u32 4294901760, %v11562_v58 }
 0x2f9   : > { %7132 = vmatprep.subr.bf16.mxu0 %v11543_v30  ;;  %v6311_v52 = vpop.f32.mrb[139].mxu1  ;;  %v11557_v49 = vand.u32 4294901760, %v11556_v10 }
 0x2fa   : > { %v6312_v20 = vadd.f32 %v6311_v52, %v6310_v8  ;;  %v7267_v35 = vpack.c.bf16 %v11563_v62, %v11561_v59  ;;  %v11576_v52 = vld [vmem:[#allocation109_spill] sm:$0xff]  ;;  %v11583_v59 = vand.u32 4294901760, %v11582_v37  ;;  %v11605_v37 = vld [vmem:[#allocation14_spill] sm:$0xff] }
 0x2fb   : > { %6625 = vmatmul.mubr.f32.gmra.mrb[102].mxu0 %v10219_v41  ;;  %v7265_v17 = vpack.c.bf16 %v11559_v36, %v11557_v49  ;;  %v11577_v10 = vand.u32 4294901760, %v11576_v52  ;;  %v11578_v49 = vld [vmem:[#allocation110_spill] sm:$0xff] }
 0x2fc   : > { %7134 = vmatpush3.bf16.msra.mxu0 %v11543_v30  ;;  %6643 = vmatprep.mubr.f32.mxu0 %v10121_v27  ;;  %v10330_v43 = vadd.f32 %v6312_v20, %v4445_v31  ;;  %v6313_v57 = vpop.f32.mrb[140].mxu1  ;;  %v11564_v27 = vld [vmem:[#allocation21_spill] sm:$0xff]  ;;  %v7271_v31 = vpack.c.bf16 %v11571_v61, %v11569_v0  ;;  %v11579_v6 = vand.u32 4294901760, %v11578_v49  ;;  %v11592_v0 = vld [vmem:[#allocation23_spill] sm:$0xff]  ;;  %v11601_v49 = vld [vmem:[#allocation32_spill] sm:$0xff] }
 0x2fd   : > { %7264 = vmatprep.subr.bf16.mxu0 %v7263_v38  ;;  %v6314_v30 = vpop.f32.mrb[141].mxu1  ;;  %v11565_v50 = vand.u32 4294901760, %v11564_v27  ;;  %v11593_v61 = vld [vmem:[#allocation15_spill] sm:$0xff] }
 0x2fe   : > { %v6315_v63 = vadd.f32 %v6314_v30, %v6313_v57  ;;  %v11586_v30 = vld [vmem:[#allocation112_spill] sm:$0xff] }
 0x2ff   : > { %6644 = vmatmul.mubr.f32.vlgmr.msra.gmra.mrb[96].mxu0 %v10130_v39  ;;  %v7269_v19 = vpack.c.bf16 %v11567_v7, %v11565_v50  ;;  %v11587_v27 = vand.u32 4294901760, %v11586_v30  ;;  %v11609_v30 = vld [vmem:[#allocation41_spill] sm:$0xff] }
 0x300   : > { %7266 = vmatpush3.bf16.msra.mxu0 %v7265_v17  ;;  %6646 = vmatprep.mubr.f32.mxu0 %v10146_v46  ;;  %v10343_v3 = vadd.f32 %v6315_v63, %v10274_v55  ;;  %v6316_v39 = vpop.f32.mrb[142].mxu1  ;;  %v11572_v46 = vld [vmem:[#allocation95_spill] sm:$0xff]  ;;  %v7275_v55 = vpack.c.bf16 %v11579_v6, %v11577_v10  ;;  %v11602_v6 = vand.u32 4294901760, %v11601_v49 }
 0x301   : > { %7268 = vmatprep.subr.bf16.mxu0 %v7267_v35  ;;  %v6317_v32 = vpop.f32.mrb[143].mxu1  ;;  %v11573_v9 = vand.u32 4294901760, %v11572_v46  ;;  %v11584_v35 = vld [vmem:[#allocation111_spill] sm:$0xff] }
 0x302   : > { %v6318_v8 = vadd.f32 %v6317_v32, %v6316_v39  ;;  %v11585_v57 = vand.u32 4294901760, %v11584_v35  ;;  %v11595_v39 = vld [vmem:[#allocation31_spill] sm:$0xff] }
 0x303   : > { %6647 = vmatmul.mubr.f32.gmra.mrb[98].mxu0 %v10159_v29  ;;  %v7273_v38 = vpack.c.bf16 %v11575_v28, %v11573_v9  ;;  %v11596_v32 = vand.u32 4294901760, %v11595_v39  ;;  %v11598_v28 = vand.u32 4294901760, %v11597_v33  ;;  %v11617_v33 = vld [vmem:[#allocation24_spill] sm:$0xff] }
 0x304   : > { %7270 = vmatpush3.bf16.msra.mxu0 %v7269_v19  ;;  %6649 = vmatprep.mubr.f32.mxu0 %v10174_v11  ;;  %v10356_v36 = vadd.f32 %v6318_v8, %v10280_v34  ;;  %v6351_v29 = vpop.f32.mrb[144].mxu1  ;;  %v11580_v11 = vld [vmem:[#allocation88_spill] sm:$0xff]  ;;  %v7279_v34 = vpack.c.bf16 %v11587_v27, %v11585_v57  ;;  %v11590_v19 = vld [vmem:[#allocation93_spill] sm:$0xff]  ;;  %v11610_v27 = vand.u32 4294901760, %v11609_v30 }
 0x305   : > { %7272 = vmatprep.subr.bf16.mxu0 %v7271_v31  ;;  %v6352_v17 = vpop.f32.mrb[145].mxu1  ;;  %v11581_v20 = vand.u32 4294901760, %v11580_v11  ;;  %v11591_v63 = vand.u32 4294901760, %v11590_v19  ;;  %v11594_v31 = vand.u32 4294901760, %v11593_v61  ;;  %v11613_v19 = vld [vmem:[#allocation19_spill] sm:$0xff] }
 0x306   : > { %v6353_v62 = vadd.f32 %v6352_v17, %v6351_v29 }
 0x307   : > { %6650 = vmatmul.mubr.f32.gmra.mrb[100].mxu0 %v10189_v15  ;;  %v7277_v58 = vpack.c.bf16 %v11583_v59, %v11581_v20  ;;  %v11606_v59 = vand.u32 4294901760, %v11605_v37 }
 0x308   : > { %7274 = vmatpush3.bf16.msra.mxu0 %v7273_v38  ;;  %6652 = vmatprep.mubr.f32.mxu0 %v10204_v2  ;;  %v10369_v50 = vadd.f32 %v6353_v62, %v10288_v5  ;;  %v6354_v15 = vpop.f32.mrb[146].mxu1  ;;  %v11588_v2 = vld [vmem:[#allocation92_spill] sm:$0xff]  ;;  %v7283_v5 = vpack.c.bf16 %v11596_v32, %v11594_v31  ;;  %v11599_v38 = vld [vmem:[#allocation113_spill] sm:$0xff] }
 0x309   : > { %7276 = vmatprep.subr.bf16.mxu0 %v7275_v55  ;;  %v6355_v51 = vpop.f32.mrb[147].mxu1  ;;  %v11589_v7 = vand.u32 4294901760, %v11588_v2  ;;  %v11600_v8 = vand.u32 4294901760, %v11599_v38  ;;  %v11603_v55 = vld [vmem:[#allocation40_spill] sm:$0xff]  ;;  %v11618_v38 = vld [vmem:[#allocation29_spill] sm:$0xff] }
 0x30a   : > { %v6356_v48 = vadd.f32 %v6355_v51, %v6354_v15  ;;  %v11604_v29 = vand.u32 4294901760, %v11603_v55 }
 0x30b   : > { %6653 = vmatmul.mubr.f32.gmra.mrb[102].mxu0 %v10219_v41  ;;  %v7281_v14 = vpack.c.bf16 %v11591_v63, %v11589_v7  ;;  %v7285_v52 = vpack.c.bf16 %v11600_v8, %v11598_v28  ;;  %v11614_v63 = vand.u32 4294901760, %v11613_v19 }
 0x30c   : > { %7278 = vmatpush3.bf16.msra.mxu0 %v7277_v58  ;;  %5009 = vmatprep.mubr.f32.mxu0 %v11592_v0  ;;  %v10382_v46 = vadd.f32 %v6356_v48, %v10295_v40  ;;  %v6357_v41 = vpop.f32.mrb[148].mxu1  ;;  %v7287_v17 = vpack.c.bf16 %v11604_v29, %v11602_v6  ;;  %v11607_v58 = vld [vmem:[#allocation18_spill] sm:$0xff] }
 0x30d   : > { %7280 = vmatprep.subr.bf16.mxu0 %v7279_v34  ;;  %v6358_v9 = vpop.f32.mrb[149].mxu1  ;;  %v11608_v62 = vand.u32 4294901760, %v11607_v58  ;;  %v11611_v34 = vld [vmem:[#allocation51_spill] sm:$0xff] }
 0x30e   : > { %v6359_v10 = vadd.f32 %v6358_v9, %v6357_v41  ;;  %v11612_v15 = vand.u32 4294901760, %v11611_v34 }
 0x30f   : > { %v7289_v35 = vpack.c.bf16 %v11608_v62, %v11606_v59 }
 0x310   : > { %7282 = vmatpush3.bf16.msra.mxu0 %v7281_v14  ;;  %v10393_v11 = vadd.f32 %v6359_v10, %v10301_v60  ;;  %v6360_v40 = vpop.f32.mrb[150].mxu1  ;;  %v7291_v51 = vpack.c.bf16 %v11612_v15, %v11610_v27  ;;  %v11615_v14 = vld [vmem:[#allocation96_spill] sm:$0xff]  ;;  %v11619_v10 = vld [vmem:[#allocation30_spill] sm:$0xff] }
 0x311   : > { %7284 = vmatprep.subr.bf16.mxu0 %v7283_v5  ;;  %v6361_v20 = vpop.f32.mrb[151].mxu1  ;;  %v11616_v48 = vand.u32 4294901760, %v11615_v14 }
 0x312   : > { %v6362_v57 = vadd.f32 %v6361_v20, %v6360_v40 }
 0x313   : > { %v7293_v61 = vpack.c.bf16 %v11616_v48, %v11614_v63 }
 0x314   : > { %7286 = vmatpush3.bf16.msra.mxu0 %v7285_v52  ;;  %v10404_v2 = vadd.f32 %v6362_v57, %v10307_v45  ;;  %v6363_v60 = vpop.f32.mrb[152].mxu1 }
 0x315   : > { %7288 = vmatprep.subr.bf16.mxu0 %v7287_v17  ;;  %v6364_v7 = vpop.f32.mrb[153].mxu1 }
 0x316   : > { %v6365_v31 = vadd.f32 %v6364_v7, %v6363_v60 }
 0x318   : > { %7290 = vmatpush3.bf16.msra.mxu0 %v7289_v35  ;;  %v10411_v39 = vadd.f32 %v6365_v31, %v10317_v44  ;;  %v6366_v32 = vpop.f32.mrb[154].mxu1 }
 0x319   : > { %7292 = vmatprep.subr.bf16.mxu0 %v7291_v51  ;;  %v6367_v5 = vpop.f32.mrb[155].mxu1 }
 0x31a   : > { %v6368_v41 = vadd.f32 %v6367_v5, %v6366_v32 }
 0x31c   : > { %7294 = vmatpush3.bf16.msra.mxu0 %v7293_v61  ;;  %v10415_v45 = vadd.f32 %v6368_v41, %v10330_v43  ;;  %v6369_v9 = vpop.f32.mrb[156].mxu1 }
 0x31d   : > { %7296 = vmatprep.subr.bf16.mxu0 %v11482_v22  ;;  %v6370_v28 = vpop.f32.mrb[157].mxu1 }
 0x31e   : > { %v6371_v8 = vadd.f32 %v6370_v28, %v6369_v9  ;;  %v11631_v28 = vld [vmem:[#allocation67_spill] sm:$0xff] }
 0x31f   : > { %5011 = vmatmul.mubr.f32.vlgmr.msra.gmra.mrb[104].mxu0 %v11617_v33 }
 0x320   : > { %7298 = vmatpush3.bf16.msra.mxu0 %v11484_v25  ;;  %5016 = vmatprep.mubr.f32.mxu0 %v11618_v38  ;;  %v10422_v44 = vadd.f32 %v6371_v8, %v10343_v3  ;;  %v6372_v52 = vpop.f32.mrb[158].mxu1 }
 0x321   : > { %7300 = vmatprep.subr.bf16.mxu0 %v11486_v23  ;;  %v6373_v22 = vpop.f32.mrb[159].mxu1  ;;  %v11627_v23 = vld [vmem:[#allocation74_spill] sm:$0xff] }
 0x322   : > { %v6374_v43 = vadd.f32 %v6373_v22, %v6372_v52 }
 0x323   : > { %5018 = vmatmul.mubr.f32.gmra.mrb[106].mxu0 %v11619_v10 }
 0x324   : > { %7302 = vmatpush3.bf16.msra.mxu0 %v11488_v42  ;;  %5023 = vmatprep.mubr.f32.mxu0 %v11469_v12  ;;  %v10429_v25 = vadd.f32 %v6374_v43, %v10356_v36  ;;  %v11621_v12 = vld [vmem:[#allocation59_spill] sm:$0xff]  ;;  %v6469_v42 = vpop.f32.mrb[160].mxu1 }
 0x325   : > { %7304 = vmatprep.subr.bf16.mxu0 %v11490_v18  ;;  %v11620_v18 = vld [vmem:[#allocation103_spill] sm:$0xff] }
 0x327   : > { %5025 = vmatmul.mubr.f32.gmra.mrb[108].mxu0 %v11470_v47  ;;  %v11622_v47 = vld [vmem:[#allocation107_spill] sm:$0xff] }
 0x328   : > { %7306 = vmatpush3.bf16.msra.mxu0 %v11493_v21  ;;  %5030 = vmatprep.mubr.f32.mxu0 %v11471_v16  ;;  %v11624_v16 = vld [vmem:[#allocation22_spill] sm:$0xff]  ;;  %v6470_v21 = vpop.f32.mrb[161].mxu1 }
 0x329   : > { %7308 = vmatprep.subr.bf16.mxu0 %v11495_v1  ;;  %v11623_v1 = vld [vmem:[#allocation63_spill] sm:$0xff] }
 0x32b   : > { %5032 = vmatmul.mubr.f32.gmra.mrb[110].mxu0 %v11472_v13  ;;  %v11625_v13 = vld [vmem:[#allocation70_spill] sm:$0xff] }
 0x32c   : > { %7310 = vmatpush3.bf16.msra.mxu0 %v11498_v4  ;;  %5037 = vmatprep.mubr.f32.mxu0 %v11473_v54  ;;  %v11626_v54 = vld [vmem:[#allocation16_spill] sm:$0xff]  ;;  %v10457_v4 = vadd.f32 %v6470_v21, %v6469_v42 }
 0x32d   : > { %7312 = vmatprep.subr.bf16.mxu0 %v11500_v24  ;;  %v6472_v24 = vpop.f32.mrb[162].mxu1 }
 0x32e   : > { %v6473_v3 = vpop.f32.mrb[163].mxu1 }
 0x32f   : > { %5039 = vmatmul.mubr.f32.gmra.mrb[112].mxu0 %v11474_v26  ;;  %v11628_v26 = vld [vmem:[#allocation10_spill] sm:$0xff]  ;;  %v10459_v36 = vadd.f32 %v6473_v3, %v6472_v24  ;;  %v6475_v49 = vpop.f32.mrb[164].mxu1 }
 0x330   : > { %7314 = vmatpush3.bf16.msra.mxu0 %v11502_v56  ;;  %5044 = vmatprep.mubr.f32.mxu0 %v11475_v53  ;;  %v11629_v56 = vld [vmem:[#allocation76_spill] sm:$0xff]  ;;  %v11630_v53 = vld [vmem:[#allocation11_spill] sm:$0xff]  ;;  %v6476_v6 = vpop.f32.mrb[165].mxu1 }
 0x331   : > { %7316 = vmatprep.subr.bf16.mxu0 %v11620_v18  ;;  %v10461_v55 = vadd.f32 %v6476_v6, %v6475_v49  ;;  %v6478_v29 = vpop.f32.mrb[166].mxu1 }
 0x333   : > { %5046 = vmatmul.mubr.f32.gmra.mrb[114].mxu0 %v11621_v12 }
 0x334   : > { %7318 = vmatpush3.bf16.msra.mxu0 %v11622_v47  ;;  %5051 = vmatprep.mubr.f32.mxu0 %v11623_v1 }
 0x335   : > { %7320 = vmatprep.subr.bf16.mxu0 %v11624_v16 }
 0x337   : > { %5053 = vmatmul.mubr.f32.gmra.mrb[116].mxu0 %v11625_v13  ;;  %v11633_v13 = vld [vmem:[#allocation75_spill] sm:$0xff] }
 0x338   : > { %7322 = vmatpush3.bf16.msra.mxu0 %v11626_v54  ;;  %5058 = vmatprep.mubr.f32.mxu0 %v11627_v23 }
 0x339   : > { %7324 = vmatprep.subr.bf16.mxu0 %v11628_v26 }
 0x33b   : > { %5060 = vmatmul.mubr.f32.gmra.mrb[118].mxu0 %v11629_v56  ;;  %v11634_v56 = vld [vmem:[#allocation71_spill] sm:$0xff] }
 0x33c   : > { %7326 = vmatpush3.bf16.msra.mxu0 %v11630_v53  ;;  %5162 = vmatprep.mubr.f32.mxu0 %v11592_v0  ;;  %v6479_v0 = vpop.f32.mrb[167].mxu1 }
 0x33d   : > { %v10463_v17 = vadd.f32 %v6479_v0, %v6478_v29  ;;  %v6481_v40 = vpop.f32.mrb[168].mxu1  ;;  %v11635_v29 = vld [vmem:[#allocation81_spill] sm:$0xff] }
 0x33e   : > { %v6482_v20 = vpop.f32.mrb[169].mxu1 }
 0x33f   : > { %5164 = vmatmul.mubr.f32.vlgmr.msra.gmra.mrb[120].mxu0 %v11617_v33  ;;  %v10465_v37 = vadd.f32 %v6482_v20, %v6481_v40  ;;  %v6484_v59 = vpop.f32.mrb[170].mxu1  ;;  %v11636_v20 = vld [vmem:[#allocation79_spill] sm:$0xff] }
 0x340   : > { %5169 = vmatprep.mubr.f32.mxu0 %v11618_v38  ;;  %v6485_v58 = vpop.f32.mrb[171].mxu1 }
 0x341   : > { %v10467_v62 = vadd.f32 %v6485_v58, %v6484_v59 }
 0x343   : > { %5171 = vmatmul.mubr.f32.gmra.mrb[122].mxu0 %v11619_v10  ;;  %v11632_v10 = vld [vmem:[#allocation65_spill] sm:$0xff] }
 0x3d2   : > { %v6645_v35 = vpop.f32.mrb[96].mxu0 }
 0x3d3   : > { %7453 = vrcp.f32 %v6645_v35  ;;  %v3838_v57 = vpop.f32.mrb[97].mxu0 }
 0x3d4   : > { %7455 = vrcp.f32 %v3838_v57 }
 0x3d6   : > { %v6648_v30 = vpop.f32.mrb[98].mxu0 }
 0x3d7   : > { %7457 = vrcp.f32 %v6648_v30  ;;  %v3850_v27 = vpop.f32.mrb[99].mxu0 }
 0x3d8   : > { %7459 = vrcp.f32 %v3850_v27 }
 0x3da   : > { %v6651_v34 = vpop.f32.mrb[100].mxu0 }
 0x3db   : > { %7461 = vrcp.f32 %v6651_v34  ;;  %v3862_v15 = vpop.f32.mrb[101].mxu0 }
 0x3dc   : > { %7463 = vrcp.f32 %v3862_v15 }
 0x3dd   : > { %v7454_v51 = vpop.eup %7453 }
 0x3de   : > { %v7456_v60 = vpop.eup %7455  ;;  %v3893_v7 = vmul.f32 %v7454_v51, %v6645_v35  ;;  %v6654_v19 = vpop.f32.mrb[102].mxu0 }
 0x3df   : > { %v3892_v63 = vmul.f32 %v7456_v60, %v3838_v57  ;;  %7465 = vrcp.f32 %v6654_v19  ;;  %v3874_v14 = vpop.f32.mrb[103].mxu0 }
 0x3e0   : > { %v3901_v48 = vsub.f32 2.0, %v3893_v7  ;;  %7467 = vrcp.f32 %v3874_v14 }
 0x3e1   : > { %v7458_v61 = vpop.eup %7457  ;;  %v3900_v31 = vsub.f32 2.0, %v3892_v63 }
 0x3e2   : > { %v7460_v32 = vpop.eup %7459  ;;  %v3909_v5 = vmul.f32 %v7454_v51, %v3901_v48  ;;  %v3895_v41 = vmul.f32 %v7458_v61, %v6648_v30  ;;  %v11637_v30 = vld [vmem:[#allocation13_spill] sm:$0xff] }
 0x3e3   : > { %v3908_v9 = vmul.f32 %v7456_v60, %v3900_v31  ;;  %v3894_v33 = vmul.f32 %v7460_v32, %v3850_v27 }
 0x3e4   : > { %v3917_v38 = vmul.f32 %v11631_v28, %v3909_v5  ;;  %v3903_v8 = vsub.f32 2.0, %v3895_v41 }
 0x3e5   : > { %v7462_v52 = vpop.eup %7461  ;;  %v3916_v22 = vmul.f32 %v11632_v10, %v3908_v9  ;;  %v3902_v43 = vsub.f32 2.0, %v3894_v33 }
 0x3e6   : > { %v7464_v18 = vpop.eup %7463  ;;  %3925 = vst.msk [vmem:[%s10473_s9 + $0x8] sm:$0xff] %vm2965_vm0, %v3917_v38  ;;  %v3911_v12 = vmul.f32 %v7458_v61, %v3903_v8  ;;  %v3897_v47 = vmul.f32 %v7462_v52, %v6651_v34  ;;  %v11638_v34 = vld [vmem:[#allocation12_spill] sm:$0xff] }
 0x3e7   : > { %3924 = vst.msk [vmem:[%s10473_s9] sm:$0xff] %vm2965_vm0, %v3916_v22  ;;  %v3910_v1 = vmul.f32 %v7460_v32, %v3902_v43  ;;  %v3896_v16 = vmul.f32 %v7464_v18, %v3862_v15 }
 0x3e8   : > { %v3919_v54 = vmul.f32 %v11633_v13, %v3911_v12  ;;  %v3905_v23 = vsub.f32 2.0, %v3897_v47 }
 0x3e9   : > { %v7466_v26 = vpop.eup %7465  ;;  %v3918_v53 = vmul.f32 %v11634_v56, %v3910_v1  ;;  %v3904_v42 = vsub.f32 2.0, %v3896_v16 }
 0x3ea   : > { %v7468_v21 = vpop.eup %7467  ;;  %3927 = vst.msk [vmem:[%s10473_s9 + $0x18] sm:$0xff] %vm2965_vm0, %v3919_v54  ;;  %v3913_v24 = vmul.f32 %v7462_v52, %v3905_v23  ;;  %v3899_v3 = vmul.f32 %v7466_v26, %v6654_v19 }
 0x3eb   : > { %3926 = vst.msk [vmem:[%s10473_s9 + $0x10] sm:$0xff] %vm2965_vm0, %v3918_v53  ;;  %v3912_v49 = vmul.f32 %v7464_v18, %v3904_v42  ;;  %v3898_v6 = vmul.f32 %v7468_v21, %v3874_v14 }
 0x3ec   : > { %v3921_v0 = vmul.f32 %v11635_v29, %v3913_v24  ;;  %v3907_v40 = vsub.f32 2.0, %v3899_v3 }
 0x3ed   : > { %v3920_v59 = vmul.f32 %v11636_v20, %v3912_v49  ;;  %v3906_v58 = vsub.f32 2.0, %v3898_v6 }
 0x3ee   : > { %3929 = vst.msk [vmem:[%s10473_s9 + $0x28] sm:$0xff] %vm2965_vm0, %v3921_v0  ;;  %v3915_v35 = vmul.f32 %v7466_v26, %v3907_v40 }
 0x3ef   : > { %3928 = vst.msk [vmem:[%s10473_s9 + $0x20] sm:$0xff] %vm2965_vm0, %v3920_v59  ;;  %v3914_v57 = vmul.f32 %v7468_v21, %v3906_v58 }
 0x3f0   : > { %v3923_v27 = vmul.f32 %v11637_v30, %v3915_v35 }
 0x3f1   : > { %v3922_v15 = vmul.f32 %v11638_v34, %v3914_v57 }
 0x3f2   : > { %3931 = vst.msk [vmem:[%s10473_s9 + $0x38] sm:$0xff] %vm2965_vm0, %v3923_v27  ;;  %v6407_v51 = vpop.f32.mrb[104].mxu0 }
 0x3f3   : > { %3930 = vst.msk [vmem:[%s10473_s9 + $0x30] sm:$0xff] %vm2965_vm0, %v3922_v15  ;;  %v6408_v60 = vpop.f32.mrb[105].mxu0 }
 0x3f4   : > { %v6409_v7 = vadd.f32 %v6408_v60, %v6407_v51 }
 0x3f6   : > { %v5013_v19 = vadd.f32 %v6409_v7, %v10369_v50  ;;  %v6410_v63 = vpop.f32.mrb[106].mxu0 }
 0x3f7   : > { %v6411_v14 = vpop.f32.mrb[107].mxu0 }
 0x3f8   : > { %v6412_v48 = vadd.f32 %v6411_v14, %v6410_v63 }
 0x3fa   : > { %v5020_v61 = vadd.f32 %v6412_v48, %v10382_v46  ;;  %v6413_v31 = vpop.f32.mrb[108].mxu0 }
 0x3fb   : > { %v6414_v32 = vpop.f32.mrb[109].mxu0 }
 0x3fc   : > { %v6415_v5 = vadd.f32 %v6414_v32, %v6413_v31 }
 0x3fe   : > { %v5027_v41 = vadd.f32 %v6415_v5, %v10393_v11  ;;  %v6416_v9 = vpop.f32.mrb[110].mxu0 }
 0x3ff   : > { %v6417_v33 = vpop.f32.mrb[111].mxu0 }
 0x400   : > { %v5180_v28 = vadd.f32 %v10457_v4, %v5027_v41  ;;  %v6418_v38 = vadd.f32 %v6417_v33, %v6416_v9 }
 0x402   : > { %5220 = vst [vmem:[%s10506_s17 + $0x10] sm:$0xff] %v5180_v28  ;;  %v5034_v50 = vadd.f32 %v6418_v38, %v10404_v2  ;;  %v6419_v46 = vpop.f32.mrb[112].mxu0 }
 0x403   : > { %v6420_v8 = vpop.f32.mrb[113].mxu0 }
 0x404   : > { %v5187_v52 = vadd.f32 %v10459_v36, %v5034_v50  ;;  %v6421_v10 = vadd.f32 %v6420_v8, %v6419_v46 }
 0x406   : > { %5221 = vst [vmem:[%s10506_s17 + $0x18] sm:$0xff] %v5187_v52  ;;  %v5041_v11 = vadd.f32 %v6421_v10, %v10411_v39  ;;  %v6422_v22 = vpop.f32.mrb[114].mxu0 }
 0x407   : > { %v6423_v4 = vpop.f32.mrb[115].mxu0 }
 0x408   : > { %v5194_v43 = vadd.f32 %v10461_v55, %v5041_v11  ;;  %v6424_v18 = vadd.f32 %v6423_v4, %v6422_v22 }
 0x40a   : > { %5222 = vst [vmem:[%s10506_s17 + $0x20] sm:$0xff] %v5194_v43  ;;  %v5048_v12 = vadd.f32 %v6424_v18, %v10415_v45  ;;  %v6425_v47 = vpop.f32.mrb[116].mxu0 }
 0x40b   : > { %v6426_v2 = vpop.f32.mrb[117].mxu0 }
 0x40c   : > { %v5201_v1 = vadd.f32 %v10463_v17, %v5048_v12  ;;  %v6427_v36 = vadd.f32 %v6426_v2, %v6425_v47 }
 0x40e   : > { %5223 = vst [vmem:[%s10506_s17 + $0x28] sm:$0xff] %v5201_v1  ;;  %v5055_v16 = vadd.f32 %v6427_v36, %v10422_v44  ;;  %v6428_v39 = vpop.f32.mrb[118].mxu0 }
 0x40f   : > { %v6429_v13 = vpop.f32.mrb[119].mxu0 }
 0x410   : > { %v5208_v55 = vadd.f32 %v10465_v37, %v5055_v16  ;;  %v6430_v54 = vadd.f32 %v6429_v13, %v6428_v39 }
 0x412   : > { %5224 = vst [vmem:[%s10506_s17 + $0x30] sm:$0xff] %v5208_v55  ;;  %v5062_v45 = vadd.f32 %v6430_v54, %v10429_v25  ;;  %v6463_v23 = vpop.f32.mrb[120].mxu0 }
 0x413   : > { %v6464_v26 = vpop.f32.mrb[121].mxu0 }
 0x414   : > { %v5215_v17 = vadd.f32 %v10467_v62, %v5062_v45  ;;  %v6465_v56 = vadd.f32 %v6464_v26, %v6463_v23 }
 0x416   : > { %5225 = vst [vmem:[%s10506_s17 + $0x38] sm:$0xff] %v5215_v17  ;;  %v5166_v44 = vadd.f32 %v6465_v56, %v5013_v19  ;;  %v6466_v53 = vpop.f32.mrb[122].mxu0 }
 0x417   : > { %v6467_v42 = vpop.f32.mrb[123].mxu0 }
 0x418   : > { %5218 = vst [vmem:[%s10506_s17] sm:$0xff] %v5166_v44  ;;  %v6468_v37 = vadd.f32 %v6467_v42, %v6466_v53 }
 0x41a   : > { %v5173_v25 = vadd.f32 %v6468_v37, %v5020_v61 }
 0x41c   : > { %5219 = vst [vmem:[%s10506_s17 + $0x8] sm:$0xff] %v5173_v25 }
 0x41d   : > { %7510 = shalt.err (!%p7507_p7)
}
 0x41e   : > { %s7511_s8 = scalar_lea.hbm %s10532_s15, 1024  ;;  %s7515_s14 = scalar_lea.hbm %s10585_s7, 2048 }
 0x41f   : > { %p7512_p8 = scmp.ne.s32.totalorder %s10532_s15, %s7511_s8  ;;  %p7516_p1 = scmp.lt.u32.totalorder %s10532_s15, %s10585_s7 }
 0x420   : > { %p7517_p0 = scmp.lt.u32.totalorder %s7515_s14, %s7511_s8  ;;  %p7519_p6 = scmp.lt.u32.totalorder %s7511_s8, %s10532_s15 }
 0x421   : > { %p7513_p11 = pnand %p7512_p8, %p11639_p9 }
 0x422   : > { %p7518_p5 = por %p7517_p0, %p7516_p1 }
 0x423   : > { %p7514_p13 = pneg %p7513_p11 }
 0x424   : > { %p7520_p10 = por %p7519_p6, %p7518_p5 }
 0x426   : > { %p7521_p12 = pnand %p7520_p10, %p7514_p13 }
 0x428   : > { %7524 = shalt.err (!%p7521_p12)
}
 0x429   : > { %s7569_s20 = smov 128   ;;  %s7570_s21 = smov 8  }
 0x42a   : > { %7387 = dma.vmem_to_hbm [thread:$0]  (%p11639_p9), %s10527_s18, 1024, %s10532_s15, %s10537_s22, %s7569_s20, %s7569_s20, %s7570_s21  }
 0x42b PF: > { %p7399_p2 = scmp.ge.s32.totalorder %s7563_s27, 2  ;;  %s5272_s13 = sand.u32 1, %s7551_s24  }
 0x42c   : > { %p11640_p3 = scmp.ne.s32.totalorder %s11012_s12, 0  ;;  %s5273_s28 = scalar_lea.sflag [#allocation4], %s5272_s13 }
 0x42e   : > { %p7394_p4 = pnand %p7399_p2, %p11640_p3 }
 0x430   : > { %7546 = dma.done.wait (!%p7394_p4), %s5273_s28, 1024  }
 0x431   : > { %7548 = vsyncadd (!%p7394_p4), %s5273_s28, 4294966272  ;;  %p19_p7 = scmp.ge.s32.totalorder %s7636_s30, 4   ;;  %s11641_s24 = smov %s7555_s25 }
 0x432   : > { %s11642_s25 = smov %s7559_s26  ;;  %s11643_s26 = smov %s7647_s10 }
 0x433   : > { %s11644_s27 = smov %s7636_s30  ;;  %21 = sbr.rel (!%p19_p7) target bundleno = 4 (0x4), region = 99 }
 0x43a   :  { %5278 = vsyncpa [#allocation3], 1 }
 0x43b   :  { %5280 = vsyncpa [#allocation3 + $0x1], 1 }
 0x43c   :  { %5281 = vsyncpa [#allocation4], 1 }
 0x43d   :  { %5283 = vsyncpa [#allocation4 + $0x1], 1 }

</bundles_post_ra>
